<compile_context>
chip_gen: v6e
topology: v6e:2x2x1
jax: 0.10.0
libtpu: 0.0.40
codegen_flags: <defaults>
</compile_context>

<pallas_src>
import functools

import jax
import jax.numpy as jnp
from jax import lax
from jax.experimental import pallas as pl
from jax.experimental.pallas import tpu as pltpu


def _bsign(v, thr):
    """sign(v*scale + bias) / sign(scale)  ==  sign(v - thr),  thr = -bias/scale."""
    return jnp.where(v > thr, 1.0, jnp.where(v < thr, -1.0, 0.0)).astype(jnp.bfloat16)


def fire_kernel(x_ref, thr1_ref, thr2_ref, thr3_ref, wsq_ref, wexp_ref,
                out_ref, a3e_ref, *, H, W, PADF, EXT):
    """One batch element per grid step.

    x_ref   : (1, H*W, Cin) f32     flattened NHWC image
    thr*    : (1, C)        f32     folded BN thresholds (-bias/scale)
    wsq_ref : (Cin, Cs)     bf16    1x1 squeeze conv (sign(scale1) folded into rows)
    wexp_ref: (10, Cs, C1+C3) bf16  block-diagonal expand weights:
                [0]   = [sign(scale2)*w1 | 0]
                [1+k] = [0 | sign(scale3)*w3[k//3, k%3]]       k = dy*3 + dx
    out_ref : (1, H*W, C1+C3)       fused [expand1x1 | expand3x3] output
    a3e_ref : (EXT, Cs)     bf16    VMEM scratch: zero-halo'd branch-B activation
    """
    HW = H * W
    Cs = wsq_ref.shape[1]
    x = x_ref[0]                                                   # (HW, Cin)

    # --- BN1 + sign -> 1x1 squeeze (bf16 MXU, f32 accum) -> ReLU -----------
    a1 = _bsign(x, thr1_ref[...])
    s = jnp.maximum(
        jnp.dot(a1, wsq_ref[...], preferred_element_type=jnp.float32), 0.0)

    # --- branch A: BN2 + sign -> 1x1 expand, into the fused accumulator ----
    a2 = _bsign(s, thr2_ref[...])
    acc = jnp.dot(a2, wexp_ref[0], preferred_element_type=jnp.float32)

    # --- branch B: BN3 + sign, zero-halo'd in VMEM (this IS the conv's
    # top/bottom zero padding in the flattened layout) -----------------------
    a3 = _bsign(s, thr3_ref[...])                                  # (HW, Cs)
    a3e_ref[pl.ds(0, PADF), :] = jnp.zeros((PADF, Cs), jnp.bfloat16)
    a3e_ref[pl.ds(PADF + HW, EXT - PADF - HW), :] = jnp.zeros(
        (EXT - PADF - HW, Cs), jnp.bfloat16)
    a3e_ref[pl.ds(PADF, HW), :] = a3

    # 9 shifted taps of the flat layout; left/right image borders masked by
    # column index, top/bottom by the zero halo.  Each tap feeds its own small
    # MXU matmul accumulated in f32 (no im2col lane-concat / relayout copies).
    jj = lax.broadcasted_iota(jnp.int32, (HW, 1), 0) % W           # out column
    mask_l = jj >= 1
    mask_r = jj <= W - 2
    for k in range(9):
        dy, dx = k // 3, k % 3
        off = (dy - 1) * W + (dx - 1)
        tap = a3e_ref[pl.ds(PADF + off, HW), :]                    # (HW, Cs)
        if dx == 0:
            tap = jnp.where(mask_l, tap, 0.0)
        elif dx == 2:
            tap = jnp.where(mask_r, tap, 0.0)
        acc = acc + jnp.dot(tap, wexp_ref[1 + k],
                            preferred_element_type=jnp.float32)

    # Single lane-dense store of [relu(e1) | relu(e3)].
    out_ref[0] = jnp.maximum(acc, 0.0).astype(out_ref.dtype)


def fold_bn(gamma, beta, mean, var, eps=1e-5):
    scale = gamma / jnp.sqrt(var + eps)
    bias = beta - mean * scale
    return scale, bias


def _prep_params(params, Cin):
    """Fold BN into thresholds; absorb sign(scale) into conv-weight rows;
    build the block-diagonal expand weight stack (bf16)."""
    s1, b1 = fold_bn(*params["bn1"])
    s2, b2 = fold_bn(*params["bn2"])
    s3, b3 = fold_bn(*params["bn3"])
    wsq, w1, w3 = params["wsq"], params["w1"], params["w3"]
    Cs, C1, C3 = wsq.shape[1], w1.shape[1], w3.shape[3]

    # NOTE: assumes BN scale != 0 (gamma != 0), true for any trained BatchNorm.
    thr1 = (-b1 / s1).reshape(1, Cin)
    thr2 = (-b2 / s2).reshape(1, Cs)
    thr3 = (-b3 / s3).reshape(1, Cs)

    wsq_f = (jnp.sign(s1)[:, None] * wsq).astype(jnp.bfloat16)       # (Cin, Cs)
    w1_f = jnp.sign(s2)[:, None] * w1                                # (Cs, C1)
    w3_f = jnp.sign(s3)[None, None, :, None] * w3                    # (3,3,Cs,C3)

    Ctot = C1 + C3
    wexp = jnp.zeros((10, Cs, Ctot), jnp.float32)
    wexp = wexp.at[0, :, :C1].set(w1_f)
    for k in range(9):
        wexp = wexp.at[1 + k, :, C1:].set(w3_f[k // 3, k % 3])
    wexp = wexp.astype(jnp.bfloat16)
    return thr1, thr2, thr3, wsq_f, wexp, Cs, C1, C3


def _vmem_limit_bytes(HW, Cin, Cs, Ctot, EXT, out_itemsize):
    """Scoped-VMEM budget from actual buffer sizes (double-buffered blocks +
    scratch + in-register temporaries), clamped to the chip's physical VMEM."""
    blocks = 2 * HW * Cin * 4                         # input block (x2 buffers)
    blocks += 2 * HW * Ctot * out_itemsize            # output block (x2 buffers)
    blocks += 2 * ((Cin + 2 * Cs) * 4 + (Cin * Cs + 10 * Cs * Ctot) * 2)
    scratch = EXT * Cs * 2
    temps = HW * (Cin * 2 + Cs * 4 + 2 * Cs * 2 + Ctot * 4 + Cs * 2)
    est = int(1.5 * (blocks + scratch + temps)) + (8 << 20)
    try:
        info = pltpu.get_tpu_info()
        cap = int(getattr(info, "vmem_capacity_bytes", 64 * 1024 * 1024))
    except Exception:
        cap = 64 * 1024 * 1024                        # conservative (v7x-sized)
    return max(16 << 20, min(est, int(cap * 0.9)))


def fire_forward_flat(x_flat, params, *, H, W, out_dtype=jnp.float32):
    """x_flat: (N, H*W, Cin) float32 (flattened NHWC).
    Returns (N, H*W, C1+C3) in out_dtype (use bf16 when chaining Fire blocks)."""
    N, HW, Cin = x_flat.shape
    assert HW == H * W, (HW, H, W)

    thr1, thr2, thr3, wsq_f, wexp, Cs, C1, C3 = _prep_params(params, Cin)
    Ctot = C1 + C3

    # Halo of >= W+1 flat rows on each side, front offset aligned to the bf16
    # sublane packing (16) so the core scratch store is unmasked.
    PADF = ((W + 1 + 15) // 16) * 16
    EXT = ((HW + 2 * PADF + 15) // 16) * 16

    kernel = functools.partial(fire_kernel, H=H, W=W, PADF=PADF, EXT=EXT)

    def full(shape):
        zero = (0,) * len(shape)
        return pl.BlockSpec(shape, lambda n: zero)

    out = pl.pallas_call(
        kernel,
        out_shape=jax.ShapeDtypeStruct((N, HW, Ctot), out_dtype),
        grid=(N,),
        in_specs=[
            pl.BlockSpec((1, HW, Cin), lambda n: (n, 0, 0)),
            full((1, Cin)), full((1, Cs)), full((1, Cs)),
            full((Cin, Cs)),
            full((10, Cs, Ctot)),
        ],
        out_specs=pl.BlockSpec((1, HW, Ctot), lambda n: (n, 0, 0)),
        scratch_shapes=[pltpu.VMEM((EXT, Cs), jnp.bfloat16)],
        compiler_params=pltpu.CompilerParams(
            dimension_semantics=("parallel",),
            vmem_limit_bytes=_vmem_limit_bytes(
                HW, Cin, Cs, Ctot, EXT, jnp.dtype(out_dtype).itemsize)),
    )(x_flat, thr1, thr2, thr3, wsq_f, wexp)
    return out


def fire_forward(x_nchw, params, *, out_dtype=jnp.float32):
    """NCHW interface matching the PyTorch module.  When chaining Fire blocks,
    keep activations flat-NHWC and call fire_forward_flat directly to avoid
    the NCHW<->NHWC HBM round trips."""
    N, Cin, H, W = x_nchw.shape
    x_flat = jnp.transpose(x_nchw, (0, 2, 3, 1)).reshape(N, H * W, Cin)
    out_flat = fire_forward_flat(x_flat, params, H=H, W=W, out_dtype=out_dtype)
    Ctot = out_flat.shape[-1]
    return jnp.transpose(out_flat.reshape(N, H, W, Ctot), (0, 3, 1, 2))


def fire_reference(x_nchw, params):
    """Pure-JAX reference (inference-mode BN, sign activation)."""
    x = jnp.transpose(x_nchw, (0, 2, 3, 1))           # NHWC
    s1, b1 = fold_bn(*params["bn1"])
    s2, b2 = fold_bn(*params["bn2"])
    s3, b3 = fold_bn(*params["bn3"])

    a1 = jnp.sign(x * s1 + b1)
    s = jax.nn.relu(jnp.einsum("nhwc,cd->nhwd", a1, params["wsq"]))

    a2 = jnp.sign(s * s2 + b2)
    e1 = jax.nn.relu(jnp.einsum("nhwc,cd->nhwd", a2, params["w1"]))

    a3 = jnp.sign(s * s3 + b3)
    e3 = jax.nn.relu(lax.conv_general_dilated(
        a3, params["w3"], window_strides=(1, 1), padding=((1, 1), (1, 1)),
        dimension_numbers=("NHWC", "HWIO", "NHWC")))

    out = jnp.concatenate([e1, e3], axis=-1)
    return jnp.transpose(out, (0, 3, 1, 2))


def make_params(key, inplanes, squeeze_planes, e1_planes, e3_planes):
    ks = jax.random.split(key, 6)

    def bn(k, c):
        kg, kb, km, kv = jax.random.split(k, 4)
        gamma = 1.0 + 0.1 * jax.random.normal(kg, (c,), jnp.float32)
        beta = 0.1 * jax.random.normal(kb, (c,), jnp.float32)
        mean = 0.1 * jax.random.normal(km, (c,), jnp.float32)
        var = jnp.abs(jax.random.normal(kv, (c,), jnp.float32)) + 0.5
        return (gamma, beta, mean, var)

    def w(k, shape):
        # round to the bf16 grid so the kernel's bf16 MXU matmuls are exact
        v = 0.1 * jax.random.normal(k, shape, jnp.float32)
        return v.astype(jnp.bfloat16).astype(jnp.float32)

    return {
        "bn1": bn(ks[0], inplanes),
        "bn2": bn(ks[1], squeeze_planes),
        "bn3": bn(ks[2], squeeze_planes),
        "wsq": w(ks[3], (inplanes, squeeze_planes)),        # (Cin, Cs)
        "w1": w(ks[4], (squeeze_planes, e1_planes)),        # (Cs, C1)
        "w3": w(ks[5], (3, 3, squeeze_planes, e3_planes)),  # HWIO
    }


if __name__ == "__main__":
    key = jax.random.PRNGKey(0)
    kx, kp = jax.random.split(key)

    # small shapes consistent with the module: Fire(inplanes=8, sq=4, e1=8, e3=8)
    N, Cin, H, W = 2, 8, 16, 16
    SQ, E1, E3 = 4, 8, 8

    x = jax.random.normal(kx, (N, Cin, H, W), jnp.float32)
    params = make_params(kp, Cin, SQ, E1, E3)

    out = jax.jit(fire_forward)(x, params)
    out = jax.block_until_ready(out)

    ref = fire_reference(x, params)
    assert out.shape == (N, E1 + E3, H, W), out.shape
    err = float(jnp.max(jnp.abs(out - ref)))
    assert jnp.allclose(out, ref, rtol=1e-3, atol=1e-3), (
        "mismatch vs reference, max abs err = %.3e" % err)

    print("KERNEL_OK")
</pallas_src>

<mosaic_0001>
module attributes {stable_mosaic.version = 11 : i64} {
  func.func @fire_kernel(%arg0: i32, %arg1: memref<1x256x8xf32, #tpu.memory_space<vmem>>, %arg2: memref<1x8xf32, #tpu.memory_space<vmem>>, %arg3: memref<1x4xf32, #tpu.memory_space<vmem>>, %arg4: memref<1x4xf32, #tpu.memory_space<vmem>>, %arg5: memref<8x4xbf16, #tpu.memory_space<vmem>>, %arg6: memref<10x4x16xbf16, #tpu.memory_space<vmem>>, %arg7: memref<1x256x16xf32, #tpu.memory_space<vmem>>, %arg8: memref<320x4xbf16, #tpu.memory_space<vmem>>) attributes {dimension_semantics = [#tpu.dimension_semantics<parallel>], iteration_bounds = array<i64: 2>, scalar_prefetch = 0 : i64, scratch_operands = 1 : i64, tpu.core_type = #tpu.core_type<tc>, window_params = [{transform_indices = @transform_0, window_bounds = array<i64: 1, 256, 8>}, {pipeline_mode = #tpu.pipeline_mode<synchronous>, transform_indices = @transform_1, window_bounds = array<i64: 1, 8>}, {pipeline_mode = #tpu.pipeline_mode<synchronous>, transform_indices = @transform_2, window_bounds = array<i64: 1, 4>}, {pipeline_mode = #tpu.pipeline_mode<synchronous>, transform_indices = @transform_3, window_bounds = array<i64: 1, 4>}, {pipeline_mode = #tpu.pipeline_mode<synchronous>, transform_indices = @transform_4, window_bounds = array<i64: 8, 4>}, {pipeline_mode = #tpu.pipeline_mode<synchronous>, transform_indices = @transform_5, window_bounds = array<i64: 10, 4, 16>}, {transform_indices = @transform_6, window_bounds = array<i64: 1, 256, 16>}]} {
    %c0 = arith.constant 0 : index
    %c0_0 = arith.constant 0 : index
    %c0_1 = arith.constant 0 : index
    %0 = vector.load %arg1[%c0, %c0_0, %c0_1] : memref<1x256x8xf32, #tpu.memory_space<vmem>>, vector<1x256x8xf32>
    %1 = vector.shape_cast %0 : vector<1x256x8xf32> to vector<256x8xf32>
    %c0_2 = arith.constant 0 : index
    %c0_3 = arith.constant 0 : index
    %2 = vector.load %arg2[%c0_2, %c0_3] : memref<1x8xf32, #tpu.memory_space<vmem>>, vector<1x8xf32>
    %3 = vector.broadcast %2 : vector<1x8xf32> to vector<256x8xf32>
    %4 = arith.cmpf ogt, %1, %3 : vector<256x8xf32>
    %5 = vector.broadcast %2 : vector<1x8xf32> to vector<256x8xf32>
    %6 = arith.cmpf olt, %1, %5 : vector<256x8xf32>
    %cst = arith.constant -1.000000e+00 : f32
    %cst_4 = arith.constant 0.000000e+00 : f32
    %7 = vector.broadcast %cst : f32 to vector<256x8xf32>
    %8 = vector.broadcast %cst_4 : f32 to vector<256x8xf32>
    %9 = arith.select %6, %7, %8 : vector<256x8xi1>, vector<256x8xf32>
    %cst_5 = arith.constant 1.000000e+00 : f32
    %10 = vector.broadcast %cst_5 : f32 to vector<256x8xf32>
    %11 = arith.select %4, %10, %9 : vector<256x8xi1>, vector<256x8xf32>
    %12 = arith.truncf %11 : vector<256x8xf32> to vector<256x8xbf16>
    %c0_6 = arith.constant 0 : index
    %c0_7 = arith.constant 0 : index
    %13 = vector.load %arg5[%c0_6, %c0_7] : memref<8x4xbf16, #tpu.memory_space<vmem>>, vector<8x4xbf16>
    %cst_8 = arith.constant dense<0.000000e+00> : vector<256x4xf32>
    %14 = tpu.matmul %12, %13, %cst_8 {dimension_numbers = #tpu.dot_dimension_numbers<[1], [0], [0], [1], [0, 0, 1, 1], [], []>} : vector<256x8xbf16>, vector<8x4xbf16>, vector<256x4xf32> -> vector<256x4xf32>
    %cst_9 = arith.constant 0.000000e+00 : f32
    %15 = vector.broadcast %cst_9 : f32 to vector<256x4xf32>
    %16 = arith.maximumf %14, %15 : vector<256x4xf32>
    %c0_10 = arith.constant 0 : index
    %c0_11 = arith.constant 0 : index
    %17 = vector.load %arg3[%c0_10, %c0_11] : memref<1x4xf32, #tpu.memory_space<vmem>>, vector<1x4xf32>
    %18 = vector.broadcast %17 : vector<1x4xf32> to vector<256x4xf32>
    %19 = arith.cmpf ogt, %16, %18 : vector<256x4xf32>
    %20 = vector.broadcast %17 : vector<1x4xf32> to vector<256x4xf32>
    %21 = arith.cmpf olt, %16, %20 : vector<256x4xf32>
    %cst_12 = arith.constant -1.000000e+00 : f32
    %cst_13 = arith.constant 0.000000e+00 : f32
    %22 = vector.broadcast %cst_12 : f32 to vector<256x4xf32>
    %23 = vector.broadcast %cst_13 : f32 to vector<256x4xf32>
    %24 = arith.select %21, %22, %23 : vector<256x4xi1>, vector<256x4xf32>
    %cst_14 = arith.constant 1.000000e+00 : f32
    %25 = vector.broadcast %cst_14 : f32 to vector<256x4xf32>
    %26 = arith.select %19, %25, %24 : vector<256x4xi1>, vector<256x4xf32>
    %27 = arith.truncf %26 : vector<256x4xf32> to vector<256x4xbf16>
    %c0_15 = arith.constant 0 : index
    %c0_16 = arith.constant 0 : index
    %c0_17 = arith.constant 0 : index
    %28 = vector.load %arg6[%c0_15, %c0_16, %c0_17] : memref<10x4x16xbf16, #tpu.memory_space<vmem>>, vector<1x4x16xbf16>
    %29 = vector.shape_cast %28 : vector<1x4x16xbf16> to vector<4x16xbf16>
    %cst_18 = arith.constant dense<0.000000e+00> : vector<256x16xf32>
    %30 = tpu.matmul %27, %29, %cst_18 {dimension_numbers = #tpu.dot_dimension_numbers<[1], [0], [0], [1], [0, 0, 1, 1], [], []>} : vector<256x4xbf16>, vector<4x16xbf16>, vector<256x16xf32> -> vector<256x16xf32>
    %c0_19 = arith.constant 0 : index
    %c0_20 = arith.constant 0 : index
    %31 = vector.load %arg4[%c0_19, %c0_20] : memref<1x4xf32, #tpu.memory_space<vmem>>, vector<1x4xf32>
    %32 = vector.broadcast %31 : vector<1x4xf32> to vector<256x4xf32>
    %33 = arith.cmpf ogt, %16, %32 : vector<256x4xf32>
    %34 = vector.broadcast %31 : vector<1x4xf32> to vector<256x4xf32>
    %35 = arith.cmpf olt, %16, %34 : vector<256x4xf32>
    %cst_21 = arith.constant -1.000000e+00 : f32
    %cst_22 = arith.constant 0.000000e+00 : f32
    %36 = vector.broadcast %cst_21 : f32 to vector<256x4xf32>
    %37 = vector.broadcast %cst_22 : f32 to vector<256x4xf32>
    %38 = arith.select %35, %36, %37 : vector<256x4xi1>, vector<256x4xf32>
    %cst_23 = arith.constant 1.000000e+00 : f32
    %39 = vector.broadcast %cst_23 : f32 to vector<256x4xf32>
    %40 = arith.select %33, %39, %38 : vector<256x4xi1>, vector<256x4xf32>
    %41 = arith.truncf %40 : vector<256x4xf32> to vector<256x4xbf16>
    %cst_24 = arith.constant 0.000000e+00 : bf16
    %42 = vector.broadcast %cst_24 : bf16 to vector<32x4xbf16>
    %c0_25 = arith.constant 0 : index
    %c0_26 = arith.constant 0 : index
    %43 = vector.load %arg8[%c0_25, %c0_26] : memref<320x4xbf16, #tpu.memory_space<vmem>>, vector<32x4xbf16>
    tpu.vector_store %arg8[%c0_25, %c0_26], %42 {strides = array<i32>} : memref<320x4xbf16, #tpu.memory_space<vmem>>, vector<32x4xbf16>,
    %cst_27 = arith.constant 0.000000e+00 : bf16
    %44 = vector.broadcast %cst_27 : bf16 to vector<32x4xbf16>
    %c288 = arith.constant 288 : index
    %c0_28 = arith.constant 0 : index
    %45 = vector.load %arg8[%c288, %c0_28] : memref<320x4xbf16, #tpu.memory_space<vmem>>, vector<32x4xbf16>
    tpu.vector_store %arg8[%c288, %c0_28], %44 {strides = array<i32>} : memref<320x4xbf16, #tpu.memory_space<vmem>>, vector<32x4xbf16>,
    %c32 = arith.constant 32 : index
    %c0_29 = arith.constant 0 : index
    %46 = vector.load %arg8[%c32, %c0_29] : memref<320x4xbf16, #tpu.memory_space<vmem>>, vector<256x4xbf16>
    tpu.vector_store %arg8[%c32, %c0_29], %41 {strides = array<i32>} : memref<320x4xbf16, #tpu.memory_space<vmem>>, vector<256x4xbf16>,
    %47 = tpu.iota {dimensions = array<i32: 0>} : vector<256x1xi32>
    %c16_i32 = arith.constant 16 : i32
    %c0_i32 = arith.constant 0 : i32
    %48 = arith.cmpi eq, %c16_i32, %c0_i32 : i32
    %c1_i32 = arith.constant 1 : i32
    %49 = arith.select %48, %c1_i32, %c16_i32 : i32
    %50 = vector.broadcast %49 : i32 to vector<256x1xi32>
    %51 = arith.remsi %47, %50 : vector<256x1xi32>
    %c0_i32_30 = arith.constant 0 : i32
    %52 = vector.broadcast %c0_i32_30 : i32 to vector<256x1xi32>
    %53 = arith.cmpi ne, %51, %52 : vector<256x1xi32>
    %c0_i32_31 = arith.constant 0 : i32
    %54 = vector.broadcast %c0_i32_31 : i32 to vector<256x1xi32>
    %55 = arith.cmpi slt, %51, %54 : vector<256x1xi32>
    %c0_i32_32 = arith.constant 0 : i32
    %56 = arith.cmpi slt, %49, %c0_i32_32 : i32
    %57 = vector.broadcast %56 : i1 to vector<256x1xi1>
    %58 = vector.broadcast %57 : vector<256x1xi1> to vector<256x1xi1>
    %59 = arith.xori %55, %58 : vector<256x1xi1>
    %60 = arith.andi %59, %53 : vector<256x1xi1>
    %61 = vector.broadcast %49 : i32 to vector<256x1xi32>
    %62 = arith.addi %51, %61 : vector<256x1xi32>
    %63 = arith.select %60, %62, %51 : vector<256x1xi1>, vector<256x1xi32>
    %c1_i32_33 = arith.constant 1 : i32
    %64 = vector.broadcast %c1_i32_33 : i32 to vector<256x1xi32>
    %65 = arith.cmpi sge, %63, %64 : vector<256x1xi32>
    %c14_i32 = arith.constant 14 : i32
    %66 = vector.broadcast %c14_i32 : i32 to vector<256x1xi32>
    %67 = arith.cmpi sle, %63, %66 : vector<256x1xi32>
    %c15 = arith.constant 15 : index
    %c0_34 = arith.constant 0 : index
    %68 = vector.load %arg8[%c15, %c0_34] : memref<320x4xbf16, #tpu.memory_space<vmem>>, vector<256x4xbf16>
    %cst_35 = arith.constant 0.000000e+00 : f32
    %69 = arith.truncf %cst_35 : f32 to bf16
    %70 = vector.shape_cast %65 : vector<256x1xi1> to vector<256x1xi1>
    %71 = vector.broadcast %70 : vector<256x1xi1> to vector<256x4xi1>
    %72 = vector.broadcast %69 : bf16 to vector<256x4xbf16>
    %73 = arith.select %71, %68, %72 : vector<256x4xi1>, vector<256x4xbf16>
    %c1 = arith.constant 1 : index
    %c0_36 = arith.constant 0 : index
    %c0_37 = arith.constant 0 : index
    %74 = vector.load %arg6[%c1, %c0_36, %c0_37] : memref<10x4x16xbf16, #tpu.memory_space<vmem>>, vector<1x4x16xbf16>
    %75 = vector.shape_cast %74 : vector<1x4x16xbf16> to vector<4x16xbf16>
    %cst_38 = arith.constant dense<0.000000e+00> : vector<256x16xf32>
    %76 = tpu.matmul %73, %75, %cst_38 {dimension_numbers = #tpu.dot_dimension_numbers<[1], [0], [0], [1], [0, 0, 1, 1], [], []>} : vector<256x4xbf16>, vector<4x16xbf16>, vector<256x16xf32> -> vector<256x16xf32>
    %77 = arith.addf %30, %76 : vector<256x16xf32>
    %c16 = arith.constant 16 : index
    %c0_39 = arith.constant 0 : index
    %78 = vector.load %arg8[%c16, %c0_39] : memref<320x4xbf16, #tpu.memory_space<vmem>>, vector<256x4xbf16>
    %c2 = arith.constant 2 : index
    %c0_40 = arith.constant 0 : index
    %c0_41 = arith.constant 0 : index
    %79 = vector.load %arg6[%c2, %c0_40, %c0_41] : memref<10x4x16xbf16, #tpu.memory_space<vmem>>, vector<1x4x16xbf16>
    %80 = vector.shape_cast %79 : vector<1x4x16xbf16> to vector<4x16xbf16>
    %cst_42 = arith.constant dense<0.000000e+00> : vector<256x16xf32>
    %81 = tpu.matmul %78, %80, %cst_42 {dimension_numbers = #tpu.dot_dimension_numbers<[1], [0], [0], [1], [0, 0, 1, 1], [], []>} : vector<256x4xbf16>, vector<4x16xbf16>, vector<256x16xf32> -> vector<256x16xf32>
    %82 = arith.addf %77, %81 : vector<256x16xf32>
    %c17 = arith.constant 17 : index
    %c0_43 = arith.constant 0 : index
    %83 = vector.load %arg8[%c17, %c0_43] : memref<320x4xbf16, #tpu.memory_space<vmem>>, vector<256x4xbf16>
    %cst_44 = arith.constant 0.000000e+00 : f32
    %84 = arith.truncf %cst_44 : f32 to bf16
    %85 = vector.shape_cast %67 : vector<256x1xi1> to vector<256x1xi1>
    %86 = vector.broadcast %85 : vector<256x1xi1> to vector<256x4xi1>
    %87 = vector.broadcast %84 : bf16 to vector<256x4xbf16>
    %88 = arith.select %86, %83, %87 : vector<256x4xi1>, vector<256x4xbf16>
    %c3 = arith.constant 3 : index
    %c0_45 = arith.constant 0 : index
    %c0_46 = arith.constant 0 : index
    %89 = vector.load %arg6[%c3, %c0_45, %c0_46] : memref<10x4x16xbf16, #tpu.memory_space<vmem>>, vector<1x4x16xbf16>
    %90 = vector.shape_cast %89 : vector<1x4x16xbf16> to vector<4x16xbf16>
    %cst_47 = arith.constant dense<0.000000e+00> : vector<256x16xf32>
    %91 = tpu.matmul %88, %90, %cst_47 {dimension_numbers = #tpu.dot_dimension_numbers<[1], [0], [0], [1], [0, 0, 1, 1], [], []>} : vector<256x4xbf16>, vector<4x16xbf16>, vector<256x16xf32> -> vector<256x16xf32>
    %92 = arith.addf %82, %91 : vector<256x16xf32>
    %c31 = arith.constant 31 : index
    %c0_48 = arith.constant 0 : index
    %93 = vector.load %arg8[%c31, %c0_48] : memref<320x4xbf16, #tpu.memory_space<vmem>>, vector<256x4xbf16>
    %cst_49 = arith.constant 0.000000e+00 : f32
    %94 = arith.truncf %cst_49 : f32 to bf16
    %95 = vector.shape_cast %65 : vector<256x1xi1> to vector<256x1xi1>
    %96 = vector.broadcast %95 : vector<256x1xi1> to vector<256x4xi1>
    %97 = vector.broadcast %94 : bf16 to vector<256x4xbf16>
    %98 = arith.select %96, %93, %97 : vector<256x4xi1>, vector<256x4xbf16>
    %c4 = arith.constant 4 : index
    %c0_50 = arith.constant 0 : index
    %c0_51 = arith.constant 0 : index
    %99 = vector.load %arg6[%c4, %c0_50, %c0_51] : memref<10x4x16xbf16, #tpu.memory_space<vmem>>, vector<1x4x16xbf16>
    %100 = vector.shape_cast %99 : vector<1x4x16xbf16> to vector<4x16xbf16>
    %cst_52 = arith.constant dense<0.000000e+00> : vector<256x16xf32>
    %101 = tpu.matmul %98, %100, %cst_52 {dimension_numbers = #tpu.dot_dimension_numbers<[1], [0], [0], [1], [0, 0, 1, 1], [], []>} : vector<256x4xbf16>, vector<4x16xbf16>, vector<256x16xf32> -> vector<256x16xf32>
    %102 = arith.addf %92, %101 : vector<256x16xf32>
    %c32_53 = arith.constant 32 : index
    %c0_54 = arith.constant 0 : index
    %103 = vector.load %arg8[%c32_53, %c0_54] : memref<320x4xbf16, #tpu.memory_space<vmem>>, vector<256x4xbf16>
    %c5 = arith.constant 5 : index
    %c0_55 = arith.constant 0 : index
    %c0_56 = arith.constant 0 : index
    %104 = vector.load %arg6[%c5, %c0_55, %c0_56] : memref<10x4x16xbf16, #tpu.memory_space<vmem>>, vector<1x4x16xbf16>
    %105 = vector.shape_cast %104 : vector<1x4x16xbf16> to vector<4x16xbf16>
    %cst_57 = arith.constant dense<0.000000e+00> : vector<256x16xf32>
    %106 = tpu.matmul %103, %105, %cst_57 {dimension_numbers = #tpu.dot_dimension_numbers<[1], [0], [0], [1], [0, 0, 1, 1], [], []>} : vector<256x4xbf16>, vector<4x16xbf16>, vector<256x16xf32> -> vector<256x16xf32>
    %107 = arith.addf %102, %106 : vector<256x16xf32>
    %c33 = arith.constant 33 : index
    %c0_58 = arith.constant 0 : index
    %108 = vector.load %arg8[%c33, %c0_58] : memref<320x4xbf16, #tpu.memory_space<vmem>>, vector<256x4xbf16>
    %cst_59 = arith.constant 0.000000e+00 : f32
    %109 = arith.truncf %cst_59 : f32 to bf16
    %110 = vector.shape_cast %67 : vector<256x1xi1> to vector<256x1xi1>
    %111 = vector.broadcast %110 : vector<256x1xi1> to vector<256x4xi1>
    %112 = vector.broadcast %109 : bf16 to vector<256x4xbf16>
    %113 = arith.select %111, %108, %112 : vector<256x4xi1>, vector<256x4xbf16>
    %c6 = arith.constant 6 : index
    %c0_60 = arith.constant 0 : index
    %c0_61 = arith.constant 0 : index
    %114 = vector.load %arg6[%c6, %c0_60, %c0_61] : memref<10x4x16xbf16, #tpu.memory_space<vmem>>, vector<1x4x16xbf16>
    %115 = vector.shape_cast %114 : vector<1x4x16xbf16> to vector<4x16xbf16>
    %cst_62 = arith.constant dense<0.000000e+00> : vector<256x16xf32>
    %116 = tpu.matmul %113, %115, %cst_62 {dimension_numbers = #tpu.dot_dimension_numbers<[1], [0], [0], [1], [0, 0, 1, 1], [], []>} : vector<256x4xbf16>, vector<4x16xbf16>, vector<256x16xf32> -> vector<256x16xf32>
    %117 = arith.addf %107, %116 : vector<256x16xf32>
    %c47 = arith.constant 47 : index
    %c0_63 = arith.constant 0 : index
    %118 = vector.load %arg8[%c47, %c0_63] : memref<320x4xbf16, #tpu.memory_space<vmem>>, vector<256x4xbf16>
    %cst_64 = arith.constant 0.000000e+00 : f32
    %119 = arith.truncf %cst_64 : f32 to bf16
    %120 = vector.shape_cast %65 : vector<256x1xi1> to vector<256x1xi1>
    %121 = vector.broadcast %120 : vector<256x1xi1> to vector<256x4xi1>
    %122 = vector.broadcast %119 : bf16 to vector<256x4xbf16>
    %123 = arith.select %121, %118, %122 : vector<256x4xi1>, vector<256x4xbf16>
    %c7 = arith.constant 7 : index
    %c0_65 = arith.constant 0 : index
    %c0_66 = arith.constant 0 : index
    %124 = vector.load %arg6[%c7, %c0_65, %c0_66] : memref<10x4x16xbf16, #tpu.memory_space<vmem>>, vector<1x4x16xbf16>
    %125 = vector.shape_cast %124 : vector<1x4x16xbf16> to vector<4x16xbf16>
    %cst_67 = arith.constant dense<0.000000e+00> : vector<256x16xf32>
    %126 = tpu.matmul %123, %125, %cst_67 {dimension_numbers = #tpu.dot_dimension_numbers<[1], [0], [0], [1], [0, 0, 1, 1], [], []>} : vector<256x4xbf16>, vector<4x16xbf16>, vector<256x16xf32> -> vector<256x16xf32>
    %127 = arith.addf %117, %126 : vector<256x16xf32>
    %c48 = arith.constant 48 : index
    %c0_68 = arith.constant 0 : index
    %128 = vector.load %arg8[%c48, %c0_68] : memref<320x4xbf16, #tpu.memory_space<vmem>>, vector<256x4xbf16>
    %c8 = arith.constant 8 : index
    %c0_69 = arith.constant 0 : index
    %c0_70 = arith.constant 0 : index
    %129 = vector.load %arg6[%c8, %c0_69, %c0_70] : memref<10x4x16xbf16, #tpu.memory_space<vmem>>, vector<1x4x16xbf16>
    %130 = vector.shape_cast %129 : vector<1x4x16xbf16> to vector<4x16xbf16>
    %cst_71 = arith.constant dense<0.000000e+00> : vector<256x16xf32>
    %131 = tpu.matmul %128, %130, %cst_71 {dimension_numbers = #tpu.dot_dimension_numbers<[1], [0], [0], [1], [0, 0, 1, 1], [], []>} : vector<256x4xbf16>, vector<4x16xbf16>, vector<256x16xf32> -> vector<256x16xf32>
    %132 = arith.addf %127, %131 : vector<256x16xf32>
    %c49 = arith.constant 49 : index
    %c0_72 = arith.constant 0 : index
    %133 = vector.load %arg8[%c49, %c0_72] : memref<320x4xbf16, #tpu.memory_space<vmem>>, vector<256x4xbf16>
    %cst_73 = arith.constant 0.000000e+00 : f32
    %134 = arith.truncf %cst_73 : f32 to bf16
    %135 = vector.shape_cast %67 : vector<256x1xi1> to vector<256x1xi1>
    %136 = vector.broadcast %135 : vector<256x1xi1> to vector<256x4xi1>
    %137 = vector.broadcast %134 : bf16 to vector<256x4xbf16>
    %138 = arith.select %136, %133, %137 : vector<256x4xi1>, vector<256x4xbf16>
    %c9 = arith.constant 9 : index
    %c0_74 = arith.constant 0 : index
    %c0_75 = arith.constant 0 : index
    %139 = vector.load %arg6[%c9, %c0_74, %c0_75] : memref<10x4x16xbf16, #tpu.memory_space<vmem>>, vector<1x4x16xbf16>
    %140 = vector.shape_cast %139 : vector<1x4x16xbf16> to vector<4x16xbf16>
    %cst_76 = arith.constant dense<0.000000e+00> : vector<256x16xf32>
    %141 = tpu.matmul %138, %140, %cst_76 {dimension_numbers = #tpu.dot_dimension_numbers<[1], [0], [0], [1], [0, 0, 1, 1], [], []>} : vector<256x4xbf16>, vector<4x16xbf16>, vector<256x16xf32> -> vector<256x16xf32>
    %142 = arith.addf %132, %141 : vector<256x16xf32>
    %cst_77 = arith.constant 0.000000e+00 : f32
    %143 = vector.broadcast %cst_77 : f32 to vector<256x16xf32>
    %144 = arith.maximumf %142, %143 : vector<256x16xf32>
    %c0_78 = arith.constant 0 : index
    %c0_79 = arith.constant 0 : index
    %c0_80 = arith.constant 0 : index
    %145 = vector.load %arg7[%c0_78, %c0_79, %c0_80] : memref<1x256x16xf32, #tpu.memory_space<vmem>>, vector<1x256x16xf32>
    %146 = vector.shape_cast %145 : vector<1x256x16xf32> to vector<256x16xf32>
    %147 = vector.shape_cast %144 : vector<256x16xf32> to vector<1x256x16xf32>
    tpu.vector_store %arg7[%c0_78, %c0_79, %c0_80], %147 {strides = array<i32>} : memref<1x256x16xf32, #tpu.memory_space<vmem>>, vector<1x256x16xf32>,
    return
  }
  func.func @transform_0(%arg0: i32) -> (i32, i32, i32) {
    %c0_i32 = arith.constant 0 : i32
    %c0_i32_0 = arith.constant 0 : i32
    %c0_i32_1 = arith.constant 0 : i32
    return %arg0, %c0_i32, %c0_i32_0 : i32, i32, i32
  }
  func.func @transform_1(%arg0: i32) -> (i32, i32) {
    %c0_i32 = arith.constant 0 : i32
    %c0_i32_0 = arith.constant 0 : i32
    %c0_i32_1 = arith.constant 0 : i32
    return %c0_i32, %c0_i32_0 : i32, i32
  }
  func.func @transform_2(%arg0: i32) -> (i32, i32) {
    %c0_i32 = arith.constant 0 : i32
    %c0_i32_0 = arith.constant 0 : i32
    %c0_i32_1 = arith.constant 0 : i32
    return %c0_i32, %c0_i32_0 : i32, i32
  }
  func.func @transform_3(%arg0: i32) -> (i32, i32) {
    %c0_i32 = arith.constant 0 : i32
    %c0_i32_0 = arith.constant 0 : i32
    %c0_i32_1 = arith.constant 0 : i32
    return %c0_i32, %c0_i32_0 : i32, i32
  }
  func.func @transform_4(%arg0: i32) -> (i32, i32) {
    %c0_i32 = arith.constant 0 : i32
    %c0_i32_0 = arith.constant 0 : i32
    %c0_i32_1 = arith.constant 0 : i32
    return %c0_i32, %c0_i32_0 : i32, i32
  }
  func.func @transform_5(%arg0: i32) -> (i32, i32, i32) {
    %c0_i32 = arith.constant 0 : i32
    %c0_i32_0 = arith.constant 0 : i32
    %c0_i32_1 = arith.constant 0 : i32
    %c0_i32_2 = arith.constant 0 : i32
    return %c0_i32, %c0_i32_0, %c0_i32_1 : i32, i32, i32
  }
  func.func @transform_6(%arg0: i32) -> (i32, i32, i32) {
    %c0_i32 = arith.constant 0 : i32
    %c0_i32_0 = arith.constant 0 : i32
    %c0_i32_1 = arith.constant 0 : i32
    return %arg0, %c0_i32, %c0_i32_0 : i32, i32, i32
  }
}

</mosaic_0001>

<bundles_post_ra>
// kernel: fire_forward.1
= control target key start
LH: loop header
LB: loop body
LE: loop exit
PB: predicated region body
PF: predicated region fallthrough
CT: control target
= control target key end

     0   :  { %s8181_s21 = smov 0   ;;  %s11881_s0 = inlined_call_operand.vmem [shape: f32[2,256,8], index: 0, kind: input, shape index: {}]   ;;  %s11882_s1 = inlined_call_operand.vmem [shape: f32[1,8], index: 1, kind: input, shape index: {}]   ;;  %s11883_s2 = inlined_call_operand.vmem [shape: f32[1,4], index: 2, kind: input, shape index: {}]   ;;  %s11884_s3 = inlined_call_operand.vmem [shape: f32[1,4], index: 3, kind: input, shape index: {}]   ;;  %s11885_s4 = inlined_call_operand.vmem [shape: bf16[8,4], index: 4, kind: input, shape index: {}]   ;;  %s11886_s5 = inlined_call_operand.vmem [shape: bf16[10,4,16], index: 5, kind: input, shape index: {}]   ;;  %s11887_s6 = inlined_call_operand.vmem [shape: f32[2,256,16], index: 6, kind: output, shape index: {}]  }
   0x1 LB: > { %s7060_s22 = sadd.s32 4294967295, %s8141_s21   ;;  %p7064_p0 = scmp.ge.s32.totalorder %s8141_s21, 1  ;;  %s8141_s21 = sphi %s8181_s21, %s16_s21  }
   0x2   : > { %p212_p1 = scmp.lt.s32.totalorder %s8141_s21, 3 }
   0x4   : > { %p213_p2 = pnand %p7064_p0, %p212_p1 }
   0x6   : > { %216 = sbr.rel (%p213_p2) target bundleno = 902 (0x386), region = 44 }
   0xb   : > { %v438_v0 = vld [vmem:[%s11885_s4] sm:$0xf]  ;;  %vm488_vm0 = vcmask 1043456   ;;  %p242_p3 = scmp.lt.s32.totalorder %s7060_s22, 1  ;;  %vm11901_vm1 = vcmask 1041408   ;;  %vm439_vm2 = vcmask 64512  }
   0xc   : > { %8038 = vmatprep.subr.msk.bf16.mxu0 %vm488_vm0, %v438_v0  ;;  %v490_v1 = vsel %vm488_vm0, %v438_v0, 0  ;;  %8039 = vmatprep.subr.msk.bf16.mxu1 %vm488_vm0, %v438_v0  ;;  %v8195_v2 = vld [vmem:[%s11886_s5 + $0x2] sm:$0x3]  ;;  %v8205_v3 = vld [vmem:[%s11882_s1] ss:$0 sm:$0xff]  ;;  %v11911_v9 = vmov 0.0  }
   0xd   : > { %7663 = vmatpush3.bf16.msra.mxu0 %v490_v1  ;;  %s13049_s22 = smov (!%p242_p3, %s7060_s22), 1  ;;  %8037 = vmatpush3.bf16.msra.mxu1 %v490_v1 }
   0xe   : > { %8040 = vmatprep.subr.msk.bf16.mxu1 %vm11901_vm1, %v8195_v2  ;;  %s7441_s27 = sshll.u32 %s13049_s22, 8 }
   0xf   : > { %s8212_s8 = scalar_lea.vmem %s11881_s0, %s7441_s27  ;;  %s11729_s16 = scalar_lea.vmem %s11887_s6, %s7441_s27 }
  0x10   : > { %v255_v4 = vld [vmem:[%s8212_s8] sm:$0xff]  ;;  %v256_v5 = vld [vmem:[%s8212_s8 + $0x8] sm:$0xff]  ;;  %v257_v6 = vld [vmem:[%s8212_s8 + $0x10] sm:$0xff] }
  0x11   : > { %vm294_vm3 = vcmp.gt.f32.partialorder %v255_v4, %v8205_v3  ;;  %vm295_vm4 = vcmp.gt.f32.partialorder %v256_v5, %v8205_v3  ;;  %vm326_vm5 = vcmp.lt.f32.partialorder %v255_v4, %v8205_v3  ;;  %vm327_vm6 = vcmp.lt.f32.partialorder %v256_v5, %v8205_v3  ;;  %v258_v7 = vld [vmem:[%s8212_s8 + $0x18] sm:$0xff]  ;;  %v259_v8 = vld [vmem:[%s8212_s8 + $0x20] sm:$0xff]  ;;  %v260_v12 = vld [vmem:[%s8212_s8 + $0x28] sm:$0xff] }
  0x12   : > { %v358_v10 = vsel %vm326_vm5, -1.0, %v11911_v9  ;;  %v359_v11 = vsel %vm327_vm6, -1.0, %v11911_v9  ;;  %vm296_vm7 = vcmp.gt.f32.partialorder %v257_v6, %v8205_v3  ;;  %vm297_vm8 = vcmp.gt.f32.partialorder %v258_v7, %v8205_v3  ;;  %v261_v15 = vld [vmem:[%s8212_s8 + $0x30] sm:$0xff]  ;;  %v262_v19 = vld [vmem:[%s8212_s8 + $0x38] sm:$0xff]  ;;  %v263_v22 = vld [vmem:[%s8212_s8 + $0x40] sm:$0xff] }
  0x13   : > { %v390_v13 = vsel %vm294_vm3, 1.0, %v358_v10  ;;  %v391_v14 = vsel %vm295_vm4, 1.0, %v359_v11  ;;  %vm328_vm9 = vcmp.lt.f32.partialorder %v257_v6, %v8205_v3  ;;  %vm329_vm10 = vcmp.lt.f32.partialorder %v258_v7, %v8205_v3  ;;  %v264_v25 = vld [vmem:[%s8212_s8 + $0x48] sm:$0xff]  ;;  %v265_v28 = vld [vmem:[%s8212_s8 + $0x50] sm:$0xff]  ;;  %v266_v31 = vld [vmem:[%s8212_s8 + $0x58] sm:$0xff] }
  0x14   : > { %v422_v16 = vpack.c.bf16 %v391_v14, %v390_v13  ;;  %v360_v17 = vsel %vm328_vm9, -1.0, %v11911_v9  ;;  %v361_v18 = vsel %vm329_vm10, -1.0, %v11911_v9  ;;  %vm298_vm11 = vcmp.gt.f32.partialorder %v259_v8, %v8205_v3  ;;  %v271_v36 = vld [vmem:[%s8212_s8 + $0x80] sm:$0xff]  ;;  %v272_v40 = vld [vmem:[%s8212_s8 + $0x88] sm:$0xff]  ;;  %v273_v43 = vld [vmem:[%s8212_s8 + $0x90] sm:$0xff] }
  0x15   : > { %v392_v20 = vsel %vm296_vm7, 1.0, %v360_v17  ;;  %v393_v21 = vsel %vm297_vm8, 1.0, %v361_v18  ;;  %vm299_vm12 = vcmp.gt.f32.partialorder %v260_v12, %v8205_v3  ;;  %vm330_vm13 = vcmp.lt.f32.partialorder %v259_v8, %v8205_v3  ;;  %v274_v47 = vld [vmem:[%s8212_s8 + $0x98] sm:$0xff]  ;;  %v267_v50 = vld [vmem:[%s8212_s8 + $0x60] sm:$0xff]  ;;  %v268_v53 = vld [vmem:[%s8212_s8 + $0x68] sm:$0xff] }
  0x16   : > { %7664 = vmatprep.mubr.msk.bf16.mxu0 %vm439_vm2, %v422_v16  ;;  %v423_v23 = vpack.c.bf16 %v393_v21, %v392_v20  ;;  %vm331_vm14 = vcmp.lt.f32.partialorder %v260_v12, %v8205_v3  ;;  %v362_v24 = vsel %vm330_vm13, -1.0, %v11911_v9  ;;  %vm300_vm15 = vcmp.gt.f32.partialorder %v261_v15, %v8205_v3  ;;  %v269_v56 = vld [vmem:[%s8212_s8 + $0x70] sm:$0xff]  ;;  %v270_v59 = vld [vmem:[%s8212_s8 + $0x78] sm:$0xff]  ;;  %v275_v0 = vld [vmem:[%s8212_s8 + $0xa0] sm:$0xff] }
  0x17   : > { %v363_v26 = vsel %vm331_vm14, -1.0, %v11911_v9  ;;  %v394_v27 = vsel %vm298_vm11, 1.0, %v362_v24  ;;  %vm301_vm0 = vcmp.gt.f32.partialorder %v262_v19, %v8205_v3  ;;  %vm332_vm3 = vcmp.lt.f32.partialorder %v261_v15, %v8205_v3  ;;  %v276_v6 = vld [vmem:[%s8212_s8 + $0xa8] sm:$0xff]  ;;  %v277_v10 = vld [vmem:[%s8212_s8 + $0xb0] sm:$0xff]  ;;  %v278_v14 = vld [vmem:[%s8212_s8 + $0xb8] sm:$0xff] }
  0x18   : > { %7665 = vmatmul.mubr.msk.bf16.vlgmr.msra.gmra.mxu0 %vm439_vm2, %v423_v23  ;;  %v395_v29 = vsel %vm299_vm12, 1.0, %v363_v26  ;;  %vm333_vm4 = vcmp.lt.f32.partialorder %v262_v19, %v8205_v3  ;;  %v364_v30 = vsel %vm332_vm3, -1.0, %v11911_v9  ;;  %vm302_vm5 = vcmp.gt.f32.partialorder %v263_v22, %v8205_v3  ;;  %v279_v17 = vld [vmem:[%s8212_s8 + $0xc0] sm:$0xff]  ;;  %v280_v20 = vld [vmem:[%s8212_s8 + $0xc8] sm:$0xff]  ;;  %v281_v23 = vld [vmem:[%s8212_s8 + $0xd0] sm:$0xff] }
  0x19   : > { %v424_v32 = vpack.c.bf16 %v395_v29, %v394_v27  ;;  %v365_v33 = vsel %vm333_vm4, -1.0, %v11911_v9  ;;  %v396_v34 = vsel %vm300_vm15, 1.0, %v364_v30  ;;  %vm303_vm6 = vcmp.gt.f32.partialorder %v264_v25, %v8205_v3  ;;  %v282_v26 = vld [vmem:[%s8212_s8 + $0xd8] sm:$0xff] }
  0x1a   : > { %v397_v35 = vsel %vm301_vm0, 1.0, %v365_v33  ;;  %vm334_vm7 = vcmp.lt.f32.partialorder %v263_v22, %v8205_v3  ;;  %vm335_vm8 = vcmp.lt.f32.partialorder %v264_v25, %v8205_v3  ;;  %vm304_vm9 = vcmp.gt.f32.partialorder %v265_v28, %v8205_v3 }
  0x1b   : > { %7668 = vmatprep.mubr.msk.bf16.mxu0 %vm439_vm2, %v424_v32  ;;  %v425_v37 = vpack.c.bf16 %v397_v35, %v396_v34  ;;  %v366_v38 = vsel %vm334_vm7, -1.0, %v11911_v9  ;;  %v367_v39 = vsel %vm335_vm8, -1.0, %v11911_v9  ;;  %vm305_vm10 = vcmp.gt.f32.partialorder %v266_v31, %v8205_v3  ;;  %v284_v35 = vld [vmem:[%s8212_s8 + $0xe8] sm:$0xff] }
  0x1c   : > { %v398_v41 = vsel %vm302_vm5, 1.0, %v366_v38  ;;  %v399_v42 = vsel %vm303_vm6, 1.0, %v367_v39  ;;  %vm336_vm11 = vcmp.lt.f32.partialorder %v265_v28, %v8205_v3  ;;  %vm337_vm12 = vcmp.lt.f32.partialorder %v266_v31, %v8205_v3  ;;  %v283_v31 = vld [vmem:[%s8212_s8 + $0xe0] sm:$0xff] }
  0x1d   : > { %v426_v44 = vpack.c.bf16 %v399_v42, %v398_v41  ;;  %v368_v45 = vsel %vm336_vm11, -1.0, %v11911_v9  ;;  %v369_v46 = vsel %vm337_vm12, -1.0, %v11911_v9  ;;  %vm310_vm13 = vcmp.gt.f32.partialorder %v271_v36, %v8205_v3  ;;  %v285_v41 = vld [vmem:[%s8212_s8 + $0xf0] sm:$0xff] }
  0x1e   : > { %v400_v48 = vsel %vm304_vm9, 1.0, %v368_v45  ;;  %v401_v49 = vsel %vm305_vm10, 1.0, %v369_v46  ;;  %vm311_vm14 = vcmp.gt.f32.partialorder %v272_v40, %v8205_v3  ;;  %vm342_vm15 = vcmp.lt.f32.partialorder %v271_v36, %v8205_v3 }
  0x1f   : > { %v427_v51 = vpack.c.bf16 %v401_v49, %v400_v48  ;;  %vm343_vm0 = vcmp.lt.f32.partialorder %v272_v40, %v8205_v3  ;;  %v374_v52 = vsel %vm342_vm15, -1.0, %v11911_v9  ;;  %vm312_vm3 = vcmp.gt.f32.partialorder %v273_v43, %v8205_v3 }
  0x20   : > { %7669 = vmatmul.mubr.msk.bf16.gmra.mxu0 %vm439_vm2, %v425_v37  ;;  %v375_v54 = vsel %vm343_vm0, -1.0, %v11911_v9  ;;  %v406_v55 = vsel %vm310_vm13, 1.0, %v374_v52  ;;  %vm313_vm4 = vcmp.gt.f32.partialorder %v274_v47, %v8205_v3  ;;  %vm344_vm5 = vcmp.lt.f32.partialorder %v273_v43, %v8205_v3 }
  0x21   : > { %7672 = vmatprep.mubr.msk.bf16.mxu0 %vm439_vm2, %v426_v44  ;;  %v407_v57 = vsel %vm311_vm14, 1.0, %v375_v54  ;;  %vm345_vm6 = vcmp.lt.f32.partialorder %v274_v47, %v8205_v3  ;;  %v376_v58 = vsel %vm344_vm5, -1.0, %v11911_v9  ;;  %vm306_vm7 = vcmp.gt.f32.partialorder %v267_v50, %v8205_v3  ;;  %v286_v44 = vld [vmem:[%s8212_s8 + $0xf8] sm:$0xff] }
  0x22   : > { %v430_v60 = vpack.c.bf16 %v407_v57, %v406_v55  ;;  %v377_v61 = vsel %vm345_vm6, -1.0, %v11911_v9  ;;  %v408_v62 = vsel %vm312_vm3, 1.0, %v376_v58  ;;  %vm307_vm8 = vcmp.gt.f32.partialorder %v268_v53, %v8205_v3 }
  0x23   : > { %v409_v63 = vsel %vm313_vm4, 1.0, %v377_v61  ;;  %vm338_vm9 = vcmp.lt.f32.partialorder %v267_v50, %v8205_v3  ;;  %vm339_vm10 = vcmp.lt.f32.partialorder %v268_v53, %v8205_v3  ;;  %vm308_vm11 = vcmp.gt.f32.partialorder %v269_v56, %v8205_v3 }
  0x24   : > { %7680 = vmatprep.mubr.msk.bf16.mxu1 %vm439_vm2, %v430_v60  ;;  %v431_v1 = vpack.c.bf16 %v409_v63, %v408_v62  ;;  %v370_v4 = vsel %vm338_vm9, -1.0, %v11911_v9  ;;  %v371_v5 = vsel %vm339_vm10, -1.0, %v11911_v9  ;;  %vm309_vm12 = vcmp.gt.f32.partialorder %v270_v59, %v8205_v3 }
  0x25   : > { %v402_v7 = vsel %vm306_vm7, 1.0, %v370_v4  ;;  %v403_v8 = vsel %vm307_vm8, 1.0, %v371_v5  ;;  %vm340_vm13 = vcmp.lt.f32.partialorder %v269_v56, %v8205_v3  ;;  %vm341_vm14 = vcmp.lt.f32.partialorder %v270_v59, %v8205_v3  ;;  %v8400_v5 = vld [vmem:[%s11886_s5 + $0x4] sm:$0x3] }
  0x26   : > { %7681 = vmatmul.mubr.msk.bf16.vlgmr.msra.gmra.mxu1 %vm439_vm2, %v431_v1  ;;  %v428_v11 = vpack.c.bf16 %v403_v8, %v402_v7  ;;  %v372_v12 = vsel %vm340_vm13, -1.0, %v11911_v9  ;;  %v373_v13 = vsel %vm341_vm14, -1.0, %v11911_v9  ;;  %vm314_vm15 = vcmp.gt.f32.partialorder %v275_v0, %v8205_v3 }
  0x27   : > { %v404_v15 = vsel %vm308_vm11, 1.0, %v372_v12  ;;  %v405_v16 = vsel %vm309_vm12, 1.0, %v373_v13  ;;  %vm315_vm0 = vcmp.gt.f32.partialorder %v276_v6, %v8205_v3  ;;  %vm346_vm3 = vcmp.lt.f32.partialorder %v275_v0, %v8205_v3 }
  0x28   : > { %7673 = vmatmul.mubr.msk.bf16.gmra.mxu0 %vm439_vm2, %v427_v51  ;;  %v429_v18 = vpack.c.bf16 %v405_v16, %v404_v15  ;;  %vm347_vm4 = vcmp.lt.f32.partialorder %v276_v6, %v8205_v3  ;;  %v378_v19 = vsel %vm346_vm3, -1.0, %v11911_v9  ;;  %vm316_vm5 = vcmp.gt.f32.partialorder %v277_v10, %v8205_v3 }
  0x29   : > { %7676 = vmatprep.mubr.msk.bf16.mxu0 %vm439_vm2, %v428_v11  ;;  %v379_v21 = vsel %vm347_vm4, -1.0, %v11911_v9  ;;  %v410_v22 = vsel %vm314_vm15, 1.0, %v378_v19  ;;  %vm317_vm6 = vcmp.gt.f32.partialorder %v278_v14, %v8205_v3  ;;  %vm348_vm7 = vcmp.lt.f32.partialorder %v277_v10, %v8205_v3 }
  0x2a   : > { %v411_v24 = vsel %vm315_vm0, 1.0, %v379_v21  ;;  %vm349_vm8 = vcmp.lt.f32.partialorder %v278_v14, %v8205_v3  ;;  %v380_v25 = vsel %vm348_vm7, -1.0, %v11911_v9  ;;  %vm318_vm9 = vcmp.gt.f32.partialorder %v279_v17, %v8205_v3 }
  0x2b   : > { %v432_v27 = vpack.c.bf16 %v411_v24, %v410_v22  ;;  %v381_v28 = vsel %vm349_vm8, -1.0, %v11911_v9  ;;  %v412_v29 = vsel %vm316_vm5, 1.0, %v380_v25  ;;  %vm319_vm10 = vcmp.gt.f32.partialorder %v280_v20, %v8205_v3 }
  0x2c   : > { %v413_v30 = vsel %vm317_vm6, 1.0, %v381_v28  ;;  %vm350_vm11 = vcmp.lt.f32.partialorder %v279_v17, %v8205_v3  ;;  %vm351_vm12 = vcmp.lt.f32.partialorder %v280_v20, %v8205_v3  ;;  %vm320_vm13 = vcmp.gt.f32.partialorder %v281_v23, %v8205_v3  ;;  %v8417_v17 = vld [vmem:[%s11886_s5 + $0x6] sm:$0x3] }
  0x2d   : > { %7684 = vmatprep.mubr.msk.bf16.mxu1 %vm439_vm2, %v432_v27  ;;  %v433_v32 = vpack.c.bf16 %v413_v30, %v412_v29  ;;  %v382_v33 = vsel %vm350_vm11, -1.0, %v11911_v9  ;;  %v383_v34 = vsel %vm351_vm12, -1.0, %v11911_v9  ;;  %vm321_vm14 = vcmp.gt.f32.partialorder %v282_v26, %v8205_v3 }
  0x2e   : > { %v414_v36 = vsel %vm318_vm9, 1.0, %v382_v33  ;;  %v415_v37 = vsel %vm319_vm10, 1.0, %v383_v34  ;;  %vm352_vm15 = vcmp.lt.f32.partialorder %v281_v23, %v8205_v3  ;;  %vm353_vm0 = vcmp.lt.f32.partialorder %v282_v26, %v8205_v3 }
  0x2f   : > { %7685 = vmatmul.mubr.msk.bf16.gmra.mxu1 %vm439_vm2, %v433_v32  ;;  %v434_v38 = vpack.c.bf16 %v415_v37, %v414_v36  ;;  %v384_v39 = vsel %vm352_vm15, -1.0, %v11911_v9  ;;  %v385_v40 = vsel %vm353_vm0, -1.0, %v11911_v9  ;;  %vm322_vm3 = vcmp.gt.f32.partialorder %v283_v31, %v8205_v3 }
  0x30   : > { %7677 = vmatmul.mubr.msk.bf16.gmra.mxu0 %vm439_vm2, %v429_v18  ;;  %v416_v42 = vsel %vm320_vm13, 1.0, %v384_v39  ;;  %v417_v43 = vsel %vm321_vm14, 1.0, %v385_v40  ;;  %vm323_vm4 = vcmp.gt.f32.partialorder %v284_v35, %v8205_v3  ;;  %vm354_vm5 = vcmp.lt.f32.partialorder %v283_v31, %v8205_v3 }
  0x31   : > { %7688 = vmatprep.mubr.msk.bf16.mxu1 %vm439_vm2, %v434_v38  ;;  %vm355_vm6 = vcmp.lt.f32.partialorder %v284_v35, %v8205_v3  ;;  %v386_v45 = vsel %vm354_vm5, -1.0, %v11911_v9  ;;  %vm356_vm7 = vcmp.lt.f32.partialorder %v285_v41, %v8205_v3  ;;  %v435_v48 = vpack.c.bf16 %v417_v43, %v416_v42 }
  0x32   : > { %v387_v46 = vsel %vm355_vm6, -1.0, %v11911_v9  ;;  %v418_v47 = vsel %vm322_vm3, 1.0, %v386_v45  ;;  %vm357_vm8 = vcmp.lt.f32.partialorder %v286_v44, %v8205_v3  ;;  %vm324_vm9 = vcmp.gt.f32.partialorder %v285_v41, %v8205_v3 }
  0x33   : > { %v419_v49 = vsel %vm323_vm4, 1.0, %v387_v46  ;;  %vm325_vm10 = vcmp.gt.f32.partialorder %v286_v44, %v8205_v3  ;;  %v388_v51 = vsel %vm356_vm7, -1.0, %v11911_v9  ;;  %v389_v52 = vsel %vm357_vm8, -1.0, %v11911_v9  ;;  %v836_v3 = vld [vmem:[%s11886_s5] sm:$0x3] }
  0x34   : > { %v436_v50 = vpack.c.bf16 %v419_v49, %v418_v47  ;;  %v420_v53 = vsel %vm324_vm9, 1.0, %v388_v51  ;;  %v421_v54 = vsel %vm325_vm10, 1.0, %v389_v52  ;;  %v2460_v56 = vsel %vm11901_vm1, %v8195_v2, 0  ;;  %8041 = vmatprep.subr.msk.bf16.mxu0 %vm11901_vm1, %v836_v3 }
  0x35   : > { %v437_v55 = vpack.c.bf16 %v421_v54, %v420_v53  ;;  %7697 = vmatpush3.bf16.msra.mxu1 %v2460_v56  ;;  %v2672_v57 = vsel %vm11901_vm1, %v836_v3, 0  ;;  %vm11930_vm11 = vcmask 27648   ;;  %v11888_v58 = vmov 0  }
  0x36   : > { %7731 = vmatpush3.bf16.msra.mxu0 %v2672_v57  ;;  %990 = vst.msk [vmem:[#allocation2 + $0x4] sm:$0xf] %vm11930_vm11, %v11888_v58  ;;  %991 = vst.msk [vmem:[#allocation2 + $0x8] sm:$0xf] %vm11930_vm11, %v11888_v58  ;;  %v1141_v2 = vlaneseq  ;;  %vm8145_vm14 = vmmov 1   ;;  %8042 = vmatprep.subr.msk.bf16.mxu1 %vm11901_vm1, %v8400_v5  ;;  %v12145_v42 = vmov 0 }
  0x37   : > { %7689 = vmatmul.mubr.msk.bf16.gmra.mxu1 %vm439_vm2, %v435_v48  ;;  %992 = vst.msk [vmem:[#allocation2 + $0xc] sm:$0xf] %vm11930_vm11, %v11888_v58  ;;  %993 = vst.msk [vmem:[#allocation2 + $0x90] sm:$0xf] %vm11930_vm11, %v11888_v58  ;;  %vm1783_vm5 = vsmask.f32 3328  ;;  %8043 = vmatprep.subr.msk.bf16.mxu0 %vm11901_vm1, %v8417_v17 }
  0x38   : > { %7692 = vmatprep.mubr.msk.bf16.mxu1 %vm439_vm2, %v436_v50  ;;  %994 = vst.msk [vmem:[#allocation2 + $0x94] sm:$0xf] %vm11930_vm11, %v11888_v58  ;;  %995 = vst.msk [vmem:[#allocation2 + $0x98] sm:$0xf] %vm11930_vm11, %v11888_v58  ;;  %v8391_v59 = vshrl.u32 %v1141_v2, 7 }
  0x39   : > { %vm1720_vm15 = vmpackc.low %vm8145_vm14, %vm8145_vm14  ;;  %vm1784_vm6 = vsmask.f32 7440 }
  0x3a   : > { %12134 = vst [vmem:[#allocation3_spill] sm:$0xff] %v8391_v59  ;;  %v1178_v60 = vand.u32 15, %v8391_v59  ;;  %v1144_v61 = vadd.s32 16, %v8391_v59  ;;  %v1146_v0 = vadd.s32 32, %v8391_v59  ;;  %v1752_v10 = vsel %vm1720_vm15, 65537, %v11888_v58  ;;  %vm8428_vm7 = vmor %vm1783_vm5, %vm1784_vm6 }
  0x3b   : > { %v1148_v11 = vadd.s32 48, %v8391_v59  ;;  %v1800_v15 = vshrl.u32 %v1752_v10, 16  ;;  %v1796_v16 = vshll.u32 %v1752_v10, 16  ;;  %v1150_v18 = vadd.s32 64, %v8391_v59 }
  0x3c   : > { %v1192_v63 = vand.u32 15, %v1144_v61  ;;  %v1206_v6 = vand.u32 15, %v1146_v0  ;;  %v1152_v36 = vadd.s32 80, %v8391_v59  ;;  %v1143_v41 = vadd.s32 8, %v8391_v59 }
  0x3d   : > { %v1220_v19 = vand.u32 15, %v1148_v11  ;;  %v8425_v23 = vrot.slane %v1800_v15, 7  ;;  %v8432_v26 = vrot.slane %v1796_v16, 5  ;;  %v1802_v27 = vrot.slane %v1800_v15, 4  ;;  %v1622_v37 = vld [vmem:[#allocation2 + $0x4] sm:$0x8] }
  0x3e   : > { %vm1560_vm13 = vcmp.ge.s32.totalorder %v1192_v63, 1  ;;  %vm8408_vm3 = vcmp.ge.s32.totalorder %v1206_v6, 1  ;;  %v1234_v28 = vand.u32 15, %v1150_v18  ;;  %v1623_v38 = vld [vmem:[#allocation2 + $0x8] sm:$0xf]  ;;  %v1248_v46 = vand.u32 15, %v1152_v36 }
  0x3f   : > { %7693 = vmatmul.mubr.msk.bf16.gmra.mxu1 %vm439_vm2, %v437_v55  ;;  %vm1558_vm2 = vcmp.ge.s32.totalorder %v1178_v60, 1  ;;  %vm1721_vm0 = vmpackc.low %vm1560_vm13, %vm1560_vm13  ;;  %vm8434_vm8 = vcmp.ge.s32.totalorder %v1220_v19, 1  ;;  %v8439_v32 = vor.u32 %v8425_v23, %v1796_v16  ;;  %v1803_v39 = vor.u32 %v1802_v27, %v8432_v26 }
  0x40   : > { %vm1719_vm12 = vmpackc.low %vm1558_vm2, %vm1558_vm2  ;;  %v1753_v13 = vsel %vm1721_vm0, 65537, %v11888_v58  ;;  %vm8450_vm2 = vcmp.ge.s32.totalorder %v1234_v28, 1  ;;  %v1185_v51 = vand.u32 15, %v1143_v41  ;;  %vm8472_vm14 = vcmp.ge.s32.totalorder %v1248_v46, 1 }
  0x41   : > { %v1751_v62 = vsel %vm1719_vm12, 65537, %v11888_v58  ;;  %vm1723_vm4 = vmpackc.low %vm8408_vm3, %vm8408_vm3  ;;  %v1806_v20 = vshll.u32 %v1753_v13, 16  ;;  %v1810_v21 = vshrl.u32 %v1753_v13, 16  ;;  %12142 = vst [vmem:[#allocation5_spill] sm:$0xff] %v8439_v32  ;;  %v8467_v47 = vrot.slane %v1803_v39, 4 }
  0x42   : > { %v1787_v1 = vshll.u32 %v1751_v62, 16  ;;  %v1790_v4 = vshrl.u32 %v1751_v62, 16  ;;  %v1755_v24 = vsel %vm1723_vm4, 65537, %v11888_v58  ;;  %vm1725_vm10 = vmpackc.low %vm8434_vm8, %vm8434_vm8  ;;  %v1154_v3 = vadd.s32 96, %v8391_v59 }
  0x43   : > { %v1808_v30 = vrot.slane %v1806_v20, 5  ;;  %v1812_v31 = vrot.slane %v1810_v21, 4  ;;  %v1826_v34 = vshll.u32 %v1755_v24, 16  ;;  %v1830_v35 = vshrl.u32 %v1755_v24, 16  ;;  %vm1727_vm13 = vmpackc.low %vm8450_vm2, %vm8450_vm2  ;;  %12148 = vst [vmem:[#allocation7_spill] sm:$0xff] %v8467_v47 }
  0x44   : > { %v8404_v7 = vrot.slane %v1787_v1, 5  ;;  %v1792_v8 = vrot.slane %v1790_v4, 4  ;;  %v1757_v45 = vsel %vm1725_vm10, 65537, %v11888_v58  ;;  %v1759_v55 = vsel %vm1727_vm13, 65537, %v11888_v58  ;;  %vm1729_vm0 = vmpackc.low %vm8472_vm14, %vm8472_vm14  ;;  %v8513_v21 = vld [vmem:[#allocation2 + $0xc] sm:$0xf] }
  0x45   : > { %v1813_v48 = vor.u32 %v1812_v31, %v1808_v30  ;;  %v8469_v49 = vrot.slane %v1826_v34, 5  ;;  %v1832_v50 = vrot.slane %v1830_v35, 4  ;;  %v1846_v53 = vshll.u32 %v1757_v45, 16 }
  0x46   : > { %12135 = vst [vmem:[#allocation4_spill] sm:$0xff] %v8404_v7  ;;  %v1793_v14 = vor.u32 %v1792_v8, %v8404_v7  ;;  %vm11900_vm9 = vcmp.ne.s16.totalorder %v8404_v7, 0  ;;  %v1850_v54 = vshrl.u32 %v1757_v45, 16  ;;  %v1809_v57 = vsel %vm8428_vm7, %v8467_v47, %v1808_v30 }
  0x47   : > { %v2138_v43 = vsel %vm11900_vm9, %v1622_v37, 0  ;;  %v8480_v2 = vrot.slane %v1813_v48, 4  ;;  %v1833_v60 = vor.u32 %v1832_v50, %v8469_v49  ;;  %v1866_v61 = vshll.u32 %v1759_v55, 16 }
  0x48   : > { %v1794_v22 = vrot.slane %v1793_v14, 4  ;;  %v1870_v62 = vshrl.u32 %v1759_v55, 16  ;;  %v1145_v63 = vadd.s32 24, %v8391_v59  ;;  %vm8484_vm15 = vcmp.le.s32.totalorder %v1185_v51, 14 }
  0x49   : > { %v8488_v6 = vrot.slane %v1846_v53, 5  ;;  %v1852_v8 = vrot.slane %v1850_v54, 4  ;;  %v1262_v10 = vand.u32 15, %v1154_v3  ;;  %v1156_v11 = vadd.s32 112, %v8391_v59  ;;  %vm3259_vm4 = vmpackc.low %vm8484_vm15, %vm8484_vm15 }
  0x4a   : > { %v1799_v33 = vsel %vm8428_vm7, %v1794_v22, %v8432_v26  ;;  %vm8502_vm3 = vcmp.ne.s16.totalorder %v1809_v57, 0  ;;  %v12153_v14 = vmov 0  ;;  %v1158_v15 = vadd.s32 128, %v8391_v59 }
  0x4b   : > { %vm8455_vm12 = vcmp.ne.s16.totalorder %v1799_v33, 0  ;;  %v12154_v14 = vsel %vm8502_vm3, 4294967295, %v12153_v14  ;;  %v8510_v16 = vrot.slane %v1866_v61, 5  ;;  %v1872_v18 = vrot.slane %v1870_v62, 4 }
  0x4c   : > { %v12146_v42 = vsel %vm8455_vm12, 4294967295, %v12145_v42  ;;  %v2139_v44 = vsel %vm8455_vm12, %v1623_v38, 0  ;;  %12155 = vst [vmem:[#allocation8_spill] sm:$0xff] %v12154_v14  ;;  %v1761_v19 = vsel %vm1729_vm0, 65537, %v11888_v58  ;;  %v1199_v20 = vand.u32 15, %v1145_v63 }
  0x4d   : > { %12147 = vst [vmem:[#allocation6_spill] sm:$0xff] %v12146_v42  ;;  %v7121_v52 = vcombine.low %v2138_v43, %v2139_v44  ;;  %v8519_v27 = vrot.slane %v1833_v60, 4  ;;  %v1853_v28 = vor.u32 %v1852_v8, %v8488_v6  ;;  %vm8522_vm5 = vcmp.ge.s32.totalorder %v1262_v10, 1 }
  0x4e   : > { %v1276_v30 = vand.u32 15, %v1156_v11  ;;  %v1160_v31 = vadd.s32 144, %v8391_v59  ;;  %v3291_v33 = vsel %vm3259_vm4, 65537, %v11888_v58  ;;  %v1886_v34 = vshll.u32 %v1761_v19, 16  ;;  %vm1731_vm8 = vmpackc.low %vm8522_vm5, %vm8522_vm5 }
  0x4f   : > { %v2258_v1 = vshrl.u32 %v7121_v52, 16  ;;  %v2261_v4 = vshll.u32 %v7121_v52, 16  ;;  %v1890_v35 = vshrl.u32 %v1761_v19, 16  ;;  %v1290_v36 = vand.u32 15, %v1158_v15 }
  0x50   : > { %v1162_v37 = vadd.s32 160, %v8391_v59  ;;  %v1873_v39 = vor.u32 %v1872_v18, %v8510_v16  ;;  %v1164_v40 = vadd.s32 176, %v8391_v59  ;;  %vm8534_vm6 = vcmp.le.s32.totalorder %v1199_v20, 14 }
  0x51   : > { %v8515_v22 = vrot.slane %v2258_v1, 3  ;;  %v8517_v24 = vrot.slane %v2261_v4, 4  ;;  %v8544_v45 = vrot.slane %v1853_v28, 4  ;;  %v1166_v46 = vadd.s32 192, %v8391_v59  ;;  %vm3261_vm13 = vmpackc.low %vm8534_vm6, %vm8534_vm6 }
  0x52   : > { %vm8554_vm10 = vcmp.ge.s32.totalorder %v1276_v30, 1  ;;  %v1304_v51 = vand.u32 15, %v1160_v31  ;;  %v3334_v52 = vshrl.u32 %v3291_v33, 16  ;;  %v8558_v53 = vrot.slane %v1886_v34, 5 }
  0x53   : > { %v1892_v54 = vrot.slane %v1890_v35, 4  ;;  %vm8560_vm2 = vcmp.ge.s32.totalorder %v1290_v36, 1  ;;  %v1318_v56 = vand.u32 15, %v1162_v37  ;;  %v8567_v3 = vrot.slane %v1873_v39, 4  ;;  %vm1733_vm14 = vmpackc.low %vm8554_vm10, %vm8554_vm10 }
  0x54   : > { %v1763_v57 = vsel %vm1731_vm8, 65537, %v11888_v58  ;;  %v1332_v60 = vand.u32 15, %v1164_v40  ;;  %v3337_v61 = vshll.u32 %v3291_v33, 16  ;;  %v1346_v63 = vand.u32 15, %v1166_v46  ;;  %vm1735_vm4 = vmpackc.low %vm8560_vm2, %vm8560_vm2 }
  0x55   : > { %vm3322_vm15 = vsmask.f32 256  ;;  %vm3323_vm0 = vsmask.f32 4368  ;;  %vm8580_vm5 = vcmp.ge.s32.totalorder %v1304_v51, 1  ;;  %v8585_v1 = vsel %vm3261_vm13, 65537, %v11888_v58 }
  0x56   : > { %v8587_v4 = vrot.slane %v3334_v52, 7  ;;  %v1147_v8 = vadd.s32 40, %v8391_v59  ;;  %v1893_v10 = vor.u32 %v1892_v54, %v8558_v53  ;;  %v1906_v11 = vshll.u32 %v1763_v57, 16  ;;  %vm8600_vm10 = vmor %vm3322_vm15, %vm3323_vm0 }
  0x57   : > { %v1910_v15 = vshrl.u32 %v1763_v57, 16  ;;  %vm8591_vm6 = vcmp.ge.s32.totalorder %v1318_v56, 1  ;;  %v1765_v19 = vsel %vm1733_vm14, 65537, %v11888_v58  ;;  %vm8596_vm8 = vcmp.ge.s32.totalorder %v1332_v60, 1  ;;  %vm1737_vm2 = vmpackc.low %vm8580_vm5, %vm8580_vm5 }
  0x58   : > { %v8605_v29 = vrot.slane %v8425_v23, 4  ;;  %v3339_v30 = vor.u32 %v3337_v61, %v8587_v4  ;;  %v1767_v33 = vsel %vm1735_vm4, 65537, %v11888_v58  ;;  %vm8616_vm13 = vcmp.ge.s32.totalorder %v1346_v63, 1  ;;  %vm1739_vm14 = vmpackc.low %vm8591_vm6, %vm8591_vm6 }
  0x59   : > { %v3352_v23 = vshrl.u32 %v8585_v1, 16  ;;  %v8623_v35 = vsel %vm11901_vm1, %v8400_v5, 0  ;;  %v3341_v37 = vrot.slane %v8587_v4, 4  ;;  %v1213_v39 = vand.u32 15, %v1147_v8  ;;  %vm1741_vm15 = vmpackc.low %vm8596_vm8, %vm8596_vm8 }
  0x5a   : > { %v8633_v40 = vrot.slane %v1906_v11, 5  ;;  %v1912_v41 = vrot.slane %v1910_v15, 4  ;;  %v1926_v46 = vshll.u32 %v1765_v19, 16  ;;  %v1930_v50 = vshrl.u32 %v1765_v19, 16  ;;  %vm1743_vm0 = vmpackc.low %vm8616_vm13, %vm8616_vm13 }
  0x5b   : > { %v8638_v5 = vrot.slane %v1893_v10, 4  ;;  %v1946_v51 = vshll.u32 %v1767_v33, 16  ;;  %v1950_v52 = vshrl.u32 %v1767_v33, 16  ;;  %v3340_v54 = vsel %vm8600_vm10, %v8605_v29, %v3339_v30  ;;  %v3161_v10 = vld [vmem:[#allocation2 + $0x8] sm:$0xf] }
  0x5c   : > { %v1769_v55 = vsel %vm1737_vm2, 65537, %v11888_v58  ;;  %v8652_v56 = vrot.slane %v3352_v23, 7  ;;  %v3355_v57 = vshll.u32 %v8585_v1, 16  ;;  %vm11896_vm4 = vcmp.ne.s16.totalorder %v8439_v32, 0  ;;  %v3162_v30 = vld [vmem:[#allocation2 + $0xc] sm:$0xf] }
  0x5d   : > { %v1771_v60 = vsel %vm1739_vm14, 65537, %v11888_v58  ;;  %v1773_v61 = vsel %vm1741_vm15, 65537, %v11888_v58  ;;  %vm8663_vm8 = vcmp.le.s32.totalorder %v1213_v39, 14  ;;  %v1149_v0 = vadd.s32 56, %v8391_v59 }
  0x5e   : > { %v8668_v4 = vrot.slane %v1926_v46, 5  ;;  %v1932_v1 = vrot.slane %v1930_v50, 4  ;;  %v1775_v8 = vsel %vm1743_vm0, 65537, %v11888_v58  ;;  %vm8671_vm5 = vcmp.ne.s16.totalorder %v3340_v54, 0  ;;  %vm3263_vm6 = vmpackc.low %vm8663_vm8, %vm8663_vm8 }
  0x5f   : > { %v12176_v11 = vmov 0  ;;  %v8675_v15 = vrot.slane %v1946_v51, 5  ;;  %v1952_v18 = vrot.slane %v1950_v52, 4  ;;  %v1966_v19 = vshll.u32 %v1769_v55, 16 }
  0x60   : > { %v12177_v11 = vsel %vm8671_vm5, 4294967295, %v12176_v11  ;;  %v1970_v20 = vshrl.u32 %v1769_v55, 16  ;;  %v1986_v33 = vshll.u32 %v1771_v60, 16  ;;  %v1990_v34 = vshrl.u32 %v1771_v60, 16 }
  0x61   : > { %12178 = vst [vmem:[#allocation9_spill] sm:$0xff] %v12177_v11  ;;  %v2006_v23 = vshll.u32 %v1773_v61, 16  ;;  %v1227_v39 = vand.u32 15, %v1149_v0  ;;  %v2010_v46 = vshrl.u32 %v1773_v61, 16  ;;  %v2026_v50 = vshll.u32 %v1775_v8, 16 }
  0x62   : > { %v2030_v54 = vshrl.u32 %v1775_v8, 16  ;;  %v1151_v36 = vadd.s32 72, %v8391_v59  ;;  %v1913_v51 = vor.u32 %v1912_v41, %v8633_v40  ;;  %v1933_v52 = vor.u32 %v1932_v1, %v8668_v4 }
  0x63   : > { %v3645_v55 = vsel %vm11896_vm4, %v3161_v10, 0  ;;  %v3646_v60 = vsel %vm8671_vm5, %v3162_v30, 0  ;;  %v1953_v63 = vor.u32 %v1952_v18, %v8675_v15  ;;  %v8688_v31 = vrot.slane %v1966_v19, 5 }
  0x64   : > { %v1972_v0 = vrot.slane %v1970_v20, 4  ;;  %v3295_v61 = vsel %vm3263_vm6, 65537, %v11888_v58  ;;  %v8691_v8 = vrot.slane %v1986_v33, 5  ;;  %v1992_v43 = vrot.slane %v1990_v34, 4 }
  0x65   : > { %v8693_v62 = vrot.slane %v2006_v23, 5  ;;  %vm8695_vm2 = vcmp.le.s32.totalorder %v1227_v39, 14  ;;  %v2012_v1 = vrot.slane %v2010_v46, 4  ;;  %v8699_v10 = vrot.slane %v2026_v50, 5 }
  0x66   : > { %v2032_v30 = vrot.slane %v2030_v54, 4  ;;  %v1241_v48 = vand.u32 15, %v1151_v36  ;;  %v8703_v18 = vsel %vm11901_vm1, %v8417_v17, 0  ;;  %v7204_v20 = vcombine.low %v3645_v55, %v3646_v60  ;;  %vm3265_vm13 = vmpackc.low %vm8695_vm2, %vm8695_vm2 }
  0x67   : > { %12179 = vst [vmem:[#allocation10_spill] sm:$0xff] %v8693_v62  ;;  %12182 = vst [vmem:[#allocation11_spill] sm:$0xff] %v8699_v10  ;;  %v3370_v33 = vshrl.u32 %v3295_v61, 16  ;;  %v8709_v34 = vrot.slane %v1913_v51, 4  ;;  %v1973_v23 = vor.u32 %v1972_v0, %v8688_v31  ;;  %v8715_v39 = vsel %vm8600_vm10, %v3341_v37, %v8439_v32 }
  0x68   : > { %12183 = vst [vmem:[#allocation12_spill] sm:$0xff] %v8715_v39  ;;  %v8718_v36 = vor.u32 %v3355_v57, %v8652_v56  ;;  %v8727_v46 = vrot.slane %v1933_v52, 4  ;;  %v1993_v50 = vor.u32 %v1992_v43, %v8691_v8  ;;  %v3359_v54 = vrot.slane %v8652_v56, 4 }
  0x69   : > { %v8731_v37 = vrot.slane %v1953_v63, 4  ;;  %v2013_v57 = vor.u32 %v2012_v1, %v8693_v62  ;;  %v2033_v51 = vor.u32 %v2032_v30, %v8699_v10  ;;  %vm8735_vm14 = vcmp.le.s32.totalorder %v1241_v48, 14 }
  0x6a   : > { %12184 = vst [vmem:[#allocation13_spill] sm:$0xff] %v8718_v36  ;;  %v3767_v60 = vshll.u32 %v7204_v20, 16  ;;  %v8739_v0 = vrot.slane %v3370_v33, 7  ;;  %v3373_v41 = vshll.u32 %v3295_v61, 16  ;;  %v8742_v52 = vsel %vm3265_vm13, 65537, %v11888_v58  ;;  %vm3267_vm15 = vmpackc.low %vm8735_vm14, %vm8735_vm14 }
  0x6b   : > { %v8748_v56 = vrot.slane %v1973_v23, 4  ;;  %v1153_v63 = vadd.s32 88, %v8391_v59  ;;  %v8767_v33 = vrot.slane %v1993_v50, 4  ;;  %v8780_v1 = vrot.slane %v2013_v57, 4 }
  0x6c   : > { %v3388_v30 = vshrl.u32 %v8742_v52, 16  ;;  %v8783_v50 = vrot.slane %v2033_v51, 4  ;;  %v3765_v61 = vshrl.u32 %v7204_v20, 16  ;;  %v3769_v55 = vrot.slane %v3767_v60, 1  ;;  %v8802_v20 = vld [vmem:[%s11884_s3] ss:$0 sm:$0xff] }
  0x6d   : > { %12187 = vst [vmem:[#allocation14_spill] sm:$0xff] %v8767_v33  ;;  %12188 = vst [vmem:[#allocation15_spill] sm:$0xff] %v8780_v1  ;;  %v8786_v43 = vor.u32 %v3373_v41, %v8739_v0  ;;  %v8797_v48 = vsel %vm3267_vm15, 65537, %v11888_v58  ;;  %v1255_v51 = vand.u32 15, %v1153_v63  ;;  %v8823_v60 = vld [vmem:[%s11883_s2] ss:$0 sm:$0xff]  ;;  %v8832_v63 = vsel %vm8600_vm10, %v3359_v54, %v8439_v32 }
  0x6e   : > { %12189 = vst [vmem:[#allocation16_spill] sm:$0xff] %v8783_v50  ;;  %12191 = vst [vmem:[#allocation18_spill] sm:$0xff] %v8832_v63  ;;  %v8834_v19 = vrot.slane %v3388_v30, 7  ;;  %v8840_v57 = vor.u32 %v3769_v55, %v3765_v61  ;;  %v3406_v44 = vshrl.u32 %v8797_v48, 16  ;;  %v1168_v41 = vadd.s32 208, %v8391_v59 }
  0x6f   : > { %12190 = vst [vmem:[#allocation17_spill] sm:$0xff] %v8786_v43  ;;  %vm8850_vm6 = vcmp.le.s32.totalorder %v1255_v51, 14  ;;  %v3391_v58 = vshll.u32 %v8742_v52, 16  ;;  %v12196_v63 = vmov 0  }
  0x70   : > { %12192 = vst [vmem:[#allocation19_spill] sm:$0xff] %v8840_v57  ;;  %v8865_v42 = vrot.slane %v3406_v44, 7 }
  0x71   : > { %v8885_v54 = vor.u32 %v3391_v58, %v8834_v19 }
  0x72   : > { %12195 = vst [vmem:[#allocation20_spill] sm:$0xff] %v8865_v42 }
  0xd8   : > { %v7666_v17 = vpop.f32.mrf.mxu0 }
  0xd9   : > { %v655_v23 = vmax.f32 %v7666_v17, 0.0 }
  0xda   : > { %v526_v38 = vpop.f32.mrf.mxu0 }
  0xdb   : > { %vm846_vm0 = vcmp.gt.f32.partialorder %v655_v23, %v8802_v20  ;;  %vm878_vm8 = vcmp.lt.f32.partialorder %v655_v23, %v8802_v20  ;;  %vm726_vm2 = vcmp.lt.f32.partialorder %v655_v23, %v8823_v60  ;;  %v8856_v55 = vmax.f32 %v526_v38, 0.0 }
  0xdc   : > { %v910_v61 = vsel %vm878_vm8, -1.0, %v11911_v9  ;;  %v7667_v17 = vpop.f32.mrf.mxu0  ;;  %vm694_vm14 = vcmp.gt.f32.partialorder %v655_v23, %v8823_v60  ;;  %v758_v7 = vsel %vm726_vm2, -1.0, %v11911_v9  ;;  %vm3269_vm8 = vmpackc.low %vm8850_vm6, %vm8850_vm6  ;;  %v1360_v23 = vand.u32 15, %v1168_v41 }
  0xdd   : > { %v942_v13 = vsel %vm846_vm0, 1.0, %v910_v61  ;;  %v8859_v12 = vmax.f32 %v7667_v17, 0.0  ;;  %vm844_vm13 = vcmp.gt.f32.partialorder %v8856_v55, %v8802_v20  ;;  %vm876_vm15 = vcmp.lt.f32.partialorder %v8856_v55, %v8802_v20 }
  0xde   : > { %v7445_v51 = vpack.c.bf16 %v942_v13, %v942_v13  ;;  %v529_v11 = vpop.f32.mrf.mxu0  ;;  %v908_v13 = vsel %vm876_vm15, -1.0, %v11911_v9  ;;  %v8887_v30 = vsel %vm694_vm14, 1.0, %v758_v7  ;;  %v8890_v36 = vsel %vm3269_vm8, 65537, %v12196_v63 }
  0xdf   : > { %vm847_vm0 = vcmp.gt.f32.partialorder %v8859_v12, %v8802_v20  ;;  %vm879_vm4 = vcmp.lt.f32.partialorder %v8859_v12, %v8802_v20  ;;  %v654_v44 = vmax.f32 %v529_v11, 0.0  ;;  %v940_v17 = vsel %vm844_vm13, 1.0, %v908_v13  ;;  %12197 = vst [vmem:[#allocation21_spill] sm:$0xff] %v8890_v36 }
  0xe0   : > { %1111 = vst.msk [vmem:[#allocation2 + $0x18] sm:$0xf] %vm11930_vm11, %v7445_v51  ;;  %v7670_v52 = vpop.f32.mrf.mxu0  ;;  %v911_v61 = vsel %vm879_vm4, -1.0, %v11911_v9  ;;  %v7443_v57 = vpack.c.bf16 %v940_v17, %v940_v17  ;;  %vm724_vm6 = vcmp.lt.f32.partialorder %v8856_v55, %v8823_v60  ;;  %vm727_vm14 = vcmp.lt.f32.partialorder %v8859_v12, %v8823_v60 }
  0xe1   : > { %v8882_v38 = vmax.f32 %v7670_v52, 0.0  ;;  %v943_v51 = vsel %vm847_vm0, 1.0, %v911_v61  ;;  %vm845_vm2 = vcmp.gt.f32.partialorder %v654_v44, %v8802_v20  ;;  %vm877_vm4 = vcmp.lt.f32.partialorder %v654_v44, %v8802_v20 }
  0xe2   : > { %v542_v43 = vpop.f32.mrf.mxu0  ;;  %v7446_v11 = vpack.c.bf16 %v943_v51, %v943_v51  ;;  %1109 = vst.msk [vmem:[#allocation2 + $0x10] sm:$0xf] %vm11930_vm11, %v7443_v57  ;;  %v909_v58 = vsel %vm877_vm4, -1.0, %v11911_v9  ;;  %vm8904_vm8 = vcmp.ge.s32.totalorder %v1360_v23, 1  ;;  %vm695_vm4 = vcmp.gt.f32.partialorder %v8859_v12, %v8823_v60 }
  0xe3   : > { %vm850_vm15 = vcmp.gt.f32.partialorder %v8882_v38, %v8802_v20  ;;  %vm882_vm0 = vcmp.lt.f32.partialorder %v8882_v38, %v8802_v20  ;;  %v941_v13 = vsel %vm845_vm2, 1.0, %v909_v58  ;;  %v8910_v52 = vmax.f32 %v542_v43, 0.0 }
  0xe4   : > { %v7671_v7 = vpop.f32.mrf.mxu0  ;;  %1112 = vst.msk [vmem:[#allocation2 + $0x1c] sm:$0xf] %vm11930_vm11, %v7446_v11  ;;  %v914_v57 = vsel %vm882_vm0, -1.0, %v11911_v9  ;;  %vm725_vm9 = vcmp.lt.f32.partialorder %v654_v44, %v8823_v60  ;;  %v7444_v61 = vpack.c.bf16 %v941_v13, %v941_v13  ;;  %v759_v11 = vsel %vm727_vm14, -1.0, %v11911_v9 }
  0xe5   : > { %v8912_v17 = vmax.f32 %v7671_v7, 0.0  ;;  %v946_v51 = vsel %vm850_vm15, 1.0, %v914_v57  ;;  %vm848_vm2 = vcmp.gt.f32.partialorder %v8910_v52, %v8802_v20  ;;  %vm693_vm0 = vcmp.gt.f32.partialorder %v654_v44, %v8823_v60 }
  0xe6   : > { %v545_v23 = vpop.f32.mrf.mxu0  ;;  %v7449_v58 = vpack.c.bf16 %v946_v51, %v946_v51  ;;  %vm692_vm1 = vcmp.gt.f32.partialorder %v8856_v55, %v8823_v60  ;;  %1110 = vst.msk [vmem:[#allocation2 + $0x14] sm:$0xf] %vm11930_vm11, %v7444_v61  ;;  %vm880_vm15 = vcmp.lt.f32.partialorder %v8910_v52, %v8802_v20  ;;  %v756_v43 = vsel %vm724_vm6, -1.0, %v11911_v9 }
  0xe7   : > { %vm851_vm13 = vcmp.gt.f32.partialorder %v8912_v17, %v8802_v20  ;;  %v912_v13 = vsel %vm880_vm15, -1.0, %v11911_v9  ;;  %vm883_vm14 = vcmp.lt.f32.partialorder %v8912_v17, %v8802_v20  ;;  %v8939_v57 = vmax.f32 %v545_v23, 0.0 }
  0xe8   : > { %v7674_v7 = vpop.f32.mrf.mxu0  ;;  %1115 = vst.msk [vmem:[#allocation2 + $0x28] sm:$0xf] %vm11930_vm11, %v7449_v58  ;;  %v757_v61 = vsel %vm725_vm9, -1.0, %v11911_v9  ;;  %v791_v51 = vsel %vm695_vm4, 1.0, %v759_v11  ;;  %v944_v39 = vsel %vm848_vm2, 1.0, %v912_v13  ;;  %v915_v50 = vsel %vm883_vm14, -1.0, %v11911_v9  ;;  %v7682_v58 = vpop.f32.mrf.mxu1 }
  0xe9   : > { %v789_v10 = vsel %vm693_vm0, 1.0, %v757_v61  ;;  %v7447_v62 = vpack.c.bf16 %v944_v39, %v944_v39  ;;  %v947_v33 = vsel %vm851_vm13, 1.0, %v915_v50  ;;  %vm849_vm6 = vcmp.gt.f32.partialorder %v8939_v57, %v8802_v20  ;;  %vm1745_vm0 = vmpackc.low %vm8904_vm8, %vm8904_vm8 }
  0xea   : > { %v558_v1 = vpop.f32.mrf.mxu0  ;;  %v788_v44 = vsel %vm692_vm1, 1.0, %v756_v43  ;;  %v7450_v23 = vpack.c.bf16 %v947_v33, %v947_v33  ;;  %vm881_vm9 = vcmp.lt.f32.partialorder %v8939_v57, %v8802_v20  ;;  %v8955_v11 = vmax.f32 %v7674_v7, 0.0 }
  0xeb   : > { %v820_v12 = vpack.c.bf16 %v789_v10, %v788_v44  ;;  %v821_v13 = vpack.c.bf16 %v791_v51, %v8887_v30  ;;  %1113 = vst.msk [vmem:[#allocation2 + $0x20] sm:$0xf] %vm11930_vm11, %v7447_v62  ;;  %v913_v39 = vsel %vm881_vm9, -1.0, %v11911_v9  ;;  %v8960_v50 = vmax.f32 %v7682_v58, 0.0  ;;  %v590_v10 = vpop.f32.mrf.mxu1 }
  0xec   : > { %v8962_v61 = vmax.f32 %v558_v1, 0.0  ;;  %1116 = vst.msk [vmem:[#allocation2 + $0x2c] sm:$0xf] %vm11930_vm11, %v7450_v23  ;;  %v945_v55 = vsel %vm849_vm6, 1.0, %v913_v39  ;;  %vm12200_vm1 = vcmask 31744   ;;  %vm854_vm13 = vcmp.gt.f32.partialorder %v8955_v11, %v8802_v20  ;;  %v7675_v33 = vpop.f32.mrf.mxu0 }
  0xed   : > { %7732 = vmatprep.mubr.msk.bf16.mxu0 %vm12200_vm1, %v820_v12  ;;  %v12201_v30 = vrot.slane %v8739_v0, 4  ;;  %v12203_v1 = vrot.slane %v8834_v19, 4  ;;  %v7448_v7 = vpack.c.bf16 %v945_v55, %v945_v55  ;;  %vm12205_vm4 = vmmov %vm12200_vm1  ;;  %vm886_vm2 = vcmp.lt.f32.partialorder %v8955_v11, %v8802_v20 }
  0xee   : > { %7733 = vmatmul.mubr.msk.bf16.vlgmr.msra.gmra.mxu0 %vm12205_vm4, %v821_v13  ;;  %v8985_v51 = vmax.f32 %v590_v10, 0.0  ;;  %v12206_v0 = vshll.u32 %v8797_v48, 16  ;;  %v918_v58 = vsel %vm886_vm2, -1.0, %v11911_v9  ;;  %vm862_vm15 = vcmp.gt.f32.partialorder %v8960_v50, %v8802_v20  ;;  %v561_v39 = vpop.f32.mrf.mxu0 }
  0xef   : > { %v8973_v62 = vsel %vm8600_vm10, %v12201_v30, %v8439_v32  ;;  %v8980_v43 = vsel %vm8600_vm10, %v12203_v1, %v8439_v32  ;;  %vm894_vm14 = vcmp.lt.f32.partialorder %v8960_v50, %v8802_v20  ;;  %7799 = vmatpush3.bf16.msra.mxu0 %v8703_v18  ;;  %1114 = vst.msk [vmem:[#allocation2 + $0x24] sm:$0xf] %vm11930_vm11, %v7448_v7  ;;  %v950_v48 = vsel %vm854_vm13, 1.0, %v918_v58  ;;  %v7683_v1 = vpop.f32.mrf.mxu1 }
  0xf0   : > { %12202 = vst [vmem:[#allocation22_spill] sm:$0xff] %v8973_v62  ;;  %12204 = vst [vmem:[#allocation23_spill] sm:$0xff] %v8980_v43  ;;  %v8993_v19 = vor.u32 %v12206_v0, %v8865_v42  ;;  %v926_v23 = vsel %vm894_vm14, -1.0, %v11911_v9  ;;  %vm852_vm6 = vcmp.gt.f32.partialorder %v8962_v61, %v8802_v20  ;;  %v7453_v13 = vpack.c.bf16 %v950_v48, %v950_v48 }
  0xf1   : > { %v958_v18 = vsel %vm862_vm15, 1.0, %v926_v23  ;;  %vm884_vm9 = vcmp.lt.f32.partialorder %v8962_v61, %v8802_v20  ;;  %v9021_v55 = vsel %vm1745_vm0, 65537, %v12196_v63  ;;  %vm730_vm13 = vcmp.lt.f32.partialorder %v8882_v38, %v8823_v60 }
  0xf2   : > { %12207 = vst [vmem:[#allocation24_spill] sm:$0xff] %v8993_v19  ;;  %v7461_v10 = vpack.c.bf16 %v958_v18, %v958_v18  ;;  %v916_v30 = vsel %vm884_vm9, -1.0, %v11911_v9  ;;  %vm860_vm4 = vcmp.gt.f32.partialorder %v8985_v51, %v8802_v20  ;;  %1119 = vst.msk [vmem:[#allocation2 + $0x38] sm:$0xf] %vm11930_vm11, %v7453_v13  ;;  %vm892_vm8 = vcmp.lt.f32.partialorder %v8985_v51, %v8802_v20  ;;  %v1627_v19 = vld [vmem:[#allocation2 + $0x18] sm:$0xf] }
  0xf3   : > { %v948_v7 = vsel %vm852_vm6, 1.0, %v916_v30  ;;  %v9033_v41 = vmax.f32 %v7675_v33, 0.0  ;;  %v9035_v0 = vmax.f32 %v7683_v1, 0.0  ;;  %vm696_vm2 = vcmp.gt.f32.partialorder %v8910_v52, %v8823_v60 }
  0xf4   : > { %1127 = vst.msk [vmem:[#allocation2 + $0x58] sm:$0xf] %vm11930_vm11, %v7461_v10  ;;  %v7451_v58 = vpack.c.bf16 %v948_v7, %v948_v7  ;;  %v924_v48 = vsel %vm892_vm8, -1.0, %v11911_v9  ;;  %v9041_v23 = vmax.f32 %v561_v39, 0.0  ;;  %vm728_vm0 = vcmp.lt.f32.partialorder %v8910_v52, %v8823_v60  ;;  %v593_v39 = vpop.f32.mrf.mxu1 }
  0xf5   : > { %v956_v33 = vsel %vm860_vm4, 1.0, %v924_v48  ;;  %vm855_vm14 = vcmp.gt.f32.partialorder %v9033_v41, %v8802_v20  ;;  %vm729_vm9 = vcmp.lt.f32.partialorder %v8939_v57, %v8823_v60  ;;  %vm887_vm8 = vcmp.lt.f32.partialorder %v9033_v41, %v8802_v20 }
  0xf6   : > { %1117 = vst.msk [vmem:[#allocation2 + $0x30] sm:$0xf] %vm11930_vm11, %v7451_v58  ;;  %v7459_v13 = vpack.c.bf16 %v956_v33, %v956_v33  ;;  %v919_v18 = vsel %vm887_vm8, -1.0, %v11911_v9  ;;  %vm863_vm4 = vcmp.gt.f32.partialorder %v9035_v0, %v8802_v20  ;;  %vm895_vm15 = vcmp.lt.f32.partialorder %v9035_v0, %v8802_v20  ;;  %v7678_v33 = vpop.f32.mrf.mxu0 }
  0xf7   : > { %vm697_vm1 = vcmp.gt.f32.partialorder %v8939_v57, %v8823_v60  ;;  %v951_v10 = vsel %vm855_vm14, 1.0, %v919_v18  ;;  %v927_v30 = vsel %vm895_vm15, -1.0, %v11911_v9  ;;  %vm853_vm6 = vcmp.gt.f32.partialorder %v9041_v23, %v8802_v20 }
  0xf8   : > { %1125 = vst.msk [vmem:[#allocation2 + $0x50] sm:$0xf] %vm11930_vm11, %v7459_v13  ;;  %vm885_vm8 = vcmp.lt.f32.partialorder %v9041_v23, %v8802_v20  ;;  %v7454_v1 = vpack.c.bf16 %v951_v10, %v951_v10  ;;  %v959_v7 = vsel %vm863_vm4, 1.0, %v927_v30  ;;  %v760_v48 = vsel %vm728_vm0, -1.0, %v11911_v9 }
  0xf9   : > { %v917_v58 = vsel %vm885_vm8, -1.0, %v11911_v9  ;;  %v7462_v13 = vpack.c.bf16 %v959_v7, %v959_v7  ;;  %v761_v12 = vsel %vm729_vm9, -1.0, %v11911_v9  ;;  %v792_v10 = vsel %vm696_vm2, 1.0, %v760_v48 }
  0xfa   : > { %v949_v18 = vsel %vm853_vm6, 1.0, %v917_v58  ;;  %1120 = vst.msk [vmem:[#allocation2 + $0x3c] sm:$0xf] %vm11930_vm11, %v7454_v1  ;;  %v793_v44 = vsel %vm697_vm1, 1.0, %v761_v12  ;;  %v9085_v63 = vmax.f32 %v593_v39, 0.0  ;;  %v762_v7 = vsel %vm730_vm13, -1.0, %v11911_v9  ;;  %v7686_v58 = vpop.f32.mrf.mxu1  ;;  %v574_v39 = vpop.f32.mrf.mxu0 }
  0xfb   : > { %v7452_v30 = vpack.c.bf16 %v949_v18, %v949_v18  ;;  %1128 = vst.msk [vmem:[#allocation2 + $0x5c] sm:$0xf] %vm11930_vm11, %v7462_v13  ;;  %v822_v32 = vpack.c.bf16 %v793_v44, %v792_v10  ;;  %vm12208_vm2 = vcmp.lt.f32.partialorder %v8912_v17, %v8823_v60  ;;  %v9096_v1 = vmax.f32 %v7678_v33, 0.0  ;;  %v7271_v10 = vld [vmem:[%s11886_s5 + $0xa] sm:$0x3] }
  0xfc   : > { %v763_v52 = vsel %vm12208_vm2, -1.0, %v11911_v9  ;;  %v9099_v57 = vadd.s32 104, %v8391_v59  ;;  %vm861_vm1 = vcmp.gt.f32.partialorder %v9085_v63, %v8802_v20  ;;  %vm893_vm13 = vcmp.lt.f32.partialorder %v9085_v63, %v8802_v20 }
  0xfd   : > { %1118 = vst.msk [vmem:[#allocation2 + $0x34] sm:$0xf] %vm11930_vm11, %v7452_v30  ;;  %vm12210_vm0 = vcmp.gt.f32.partialorder %v8882_v38, %v8823_v60  ;;  %vm12211_vm15 = vcmp.gt.f32.partialorder %v8912_v17, %v8823_v60  ;;  %v12212_v48 = vsel %vm8428_vm7, %v8480_v2, %v8432_v26  ;;  %v12213_v33 = vmov 0  ;;  %v606_v2 = vpop.f32.mrf.mxu1 }
  0xfe   : > { %12209 = vst [vmem:[#allocation25_spill] sm:$0xff] %v9099_v57  ;;  %v794_v44 = vsel %vm12210_vm0, 1.0, %v762_v7  ;;  %v795_v12 = vsel %vm12211_vm15, 1.0, %v763_v52  ;;  %vm9117_vm14 = vcmp.ne.s16.totalorder %v12212_v48, 0  ;;  %vm12216_vm6 = vcmask 31744  }
  0xff   : > { %v12214_v33 = vsel %vm9117_vm14, 4294967295, %v12213_v33  ;;  %7736 = vmatprep.mubr.msk.bf16.mxu0 %vm12216_vm6, %v822_v32  ;;  %v925_v13 = vsel %vm893_vm13, -1.0, %v11911_v9  ;;  %v823_v38 = vpack.c.bf16 %v795_v12, %v794_v44  ;;  %v2046_v18 = vshll.u32 %v9021_v55, 16  ;;  %vm12219_vm2 = vmmov %vm12216_vm6 }
 0x100   : > { %12215 = vst [vmem:[#allocation26_spill] sm:$0xff] %v12214_v33  ;;  %v9125_v17 = vadd.s32 224, %v8391_v59  ;;  %v957_v30 = vsel %vm861_vm1, 1.0, %v925_v13  ;;  %vm858_vm9 = vcmp.gt.f32.partialorder %v9096_v1, %v8802_v20  ;;  %vm890_vm4 = vcmp.lt.f32.partialorder %v9096_v1, %v8802_v20 }
 0x101   : > { %v9134_v32 = vmax.f32 %v7686_v58, 0.0  ;;  %vm12218_vm8 = vcmask 1041408   ;;  %v7460_v7 = vpack.c.bf16 %v957_v30, %v957_v30  ;;  %7737 = vmatmul.mubr.msk.bf16.gmra.mxu0 %vm12219_vm2, %v823_v38  ;;  %v922_v52 = vsel %vm890_vm4, -1.0, %v11911_v9 }
 0x102   : > { %12217 = vst [vmem:[#allocation27_spill] sm:$0xff] %v9125_v17  ;;  %8045 = vmatprep.subr.msk.bf16.mxu0 %vm12218_vm8, %v7271_v10  ;;  %v9139_v44 = vmax.f32 %v574_v39, 0.0  ;;  %v9141_v12 = vmax.f32 %v606_v2, 0.0  ;;  %v954_v48 = vsel %vm858_vm9, 1.0, %v922_v52  ;;  %v12220_v13 = vshrl.u32 %v8890_v36, 16  ;;  %v7679_v39 = vpop.f32.mrf.mxu0 }
 0x103   : > { %vm866_vm1 = vcmp.gt.f32.partialorder %v9134_v32, %v8802_v20  ;;  %1126 = vst.msk [vmem:[#allocation2 + $0x54] sm:$0xf] %vm11930_vm11, %v7460_v7  ;;  %v7457_v38 = vpack.c.bf16 %v954_v48, %v954_v48  ;;  %vm898_vm13 = vcmp.lt.f32.partialorder %v9134_v32, %v8802_v20  ;;  %v12222_v30 = vsel %vm8428_vm7, %v8467_v47, %v8469_v49  ;;  %v9172_v48 = vld [vmem:[#allocation2 + $0x10] sm:$0xf]  ;;  %v9190_v49 = vld [vmem:[#allocation2 + $0x14] sm:$0xf] }
 0x104   : > { %v9151_v10 = vrot.slane %v12220_v13, 7  ;;  %vm9161_vm0 = vcmp.ne.s16.totalorder %v12222_v30, 0  ;;  %v12223_v2 = vmov 0  ;;  %v930_v7 = vsel %vm898_vm13, -1.0, %v11911_v9  ;;  %12226 = vst [vmem:[#allocation30_spill] sm:$0xff] %v9172_v48  ;;  %12227 = vst [vmem:[#allocation31_spill] sm:$0xff] %v9190_v49 }
 0x105   : > { %v12224_v2 = vsel %vm9161_vm0, 4294967295, %v12223_v2  ;;  %vm856_vm15 = vcmp.gt.f32.partialorder %v9139_v44, %v8802_v20  ;;  %vm888_vm6 = vcmp.lt.f32.partialorder %v9139_v44, %v8802_v20  ;;  %1123 = vst.msk [vmem:[#allocation2 + $0x48] sm:$0xf] %vm11930_vm11, %v7457_v38  ;;  %v962_v30 = vsel %vm866_vm1, 1.0, %v930_v7  ;;  %v7687_v7 = vpop.f32.mrf.mxu1 }
 0x106   : > { %12221 = vst [vmem:[#allocation28_spill] sm:$0xff] %v9151_v10  ;;  %12225 = vst [vmem:[#allocation29_spill] sm:$0xff] %v12224_v2  ;;  %v920_v13 = vsel %vm888_vm6, -1.0, %v11911_v9  ;;  %vm864_vm9 = vcmp.gt.f32.partialorder %v9141_v12, %v8802_v20  ;;  %v9182_v58 = vrot.slane %v2046_v18, 5  ;;  %v7465_v52 = vpack.c.bf16 %v962_v30, %v962_v30 }
 0x107   : > { %v952_v57 = vsel %vm856_vm15, 1.0, %v920_v13  ;;  %vm896_vm8 = vcmp.lt.f32.partialorder %v9141_v12, %v8802_v20  ;;  %v9188_v38 = vmax.f32 %v7679_v39, 0.0  ;;  %v12228_v18 = vmov 0.0   ;;  %v577_v13 = vpop.f32.mrf.mxu0 }
 0x108   : > { %v7455_v9 = vpack.c.bf16 %v952_v57, %v952_v57  ;;  %v928_v10 = vsel %vm896_vm8, -1.0, %v12228_v18  ;;  %v2141_v30 = vsel %vm9117_vm14, %v9172_v48, 0  ;;  %vm732_vm15 = vcmp.lt.f32.partialorder %v8962_v61, %v8823_v60  ;;  %1131 = vst.msk [vmem:[#allocation2 + $0x68] sm:$0xf] %vm11930_vm11, %v7465_v52 }
 0x109   : > { %v960_v57 = vsel %vm864_vm9, 1.0, %v928_v10  ;;  %vm859_vm8 = vcmp.gt.f32.partialorder %v9188_v38, %v8802_v20  ;;  %v12229_v39 = vsel %vm8428_vm7, %v8519_v27, %v8432_v26  ;;  %v12230_v33 = vmov 0 }
 0x10a   : > { %vm9215_vm13 = vcmp.ne.s16.totalorder %v12229_v39, 0  ;;  %1121 = vst.msk [vmem:[#allocation2 + $0x40] sm:$0xf] %vm11930_vm11, %v7455_v9  ;;  %v7463_v36 = vpack.c.bf16 %v960_v57, %v960_v57  ;;  %vm891_vm6 = vcmp.lt.f32.partialorder %v9188_v38, %v8802_v20  ;;  %v12232_v10 = vsel %vm8502_vm3, %v8513_v21, 0  ;;  %v609_v57 = vpop.f32.mrf.mxu1 }
 0x10b   : > { %v12231_v33 = vsel %vm9215_vm13, 4294967295, %v12230_v33  ;;  %v7122_v52 = vcombine.low %v12232_v10, %v2141_v30  ;;  %v923_v27 = vsel %vm891_vm6, -1.0, %v12228_v18  ;;  %v9231_v39 = vmax.f32 %v7687_v7, 0.0 }
 0x10c   : > { %v9233_v9 = vmax.f32 %v577_v13, 0.0  ;;  %1129 = vst.msk [vmem:[#allocation2 + $0x60] sm:$0xf] %vm11930_vm11, %v7463_v36  ;;  %v955_v21 = vsel %vm859_vm8, 1.0, %v923_v27  ;;  %v2142_v59 = vsel %vm9161_vm0, %v9190_v49, 0  ;;  %v764_v7 = vsel %vm732_vm15, -1.0, %v12228_v18 }
 0x10d   : > { %v2266_v30 = vshrl.u32 %v7122_v52, 16  ;;  %v2269_v10 = vshll.u32 %v7122_v52, 16  ;;  %v7458_v14 = vpack.c.bf16 %v955_v21, %v955_v21  ;;  %vm867_vm6 = vcmp.gt.f32.partialorder %v9231_v39, %v8802_v20 }
 0x10e   : > { %v12233_v36 = vsel %vm8428_vm7, %v8467_v47, %v8488_v6  ;;  %v12234_v13 = vmov 0  ;;  %vm899_vm9 = vcmp.lt.f32.partialorder %v9231_v39, %v8802_v20  ;;  %vm701_vm2 = vcmp.gt.f32.partialorder %v9041_v23, %v8823_v60 }
 0x10f   : > { %vm9252_vm8 = vcmp.ne.s16.totalorder %v12233_v36, 0  ;;  %v2268_v52 = vrot.slane %v2266_v30, 3  ;;  %v2271_v27 = vrot.slane %v2269_v10, 4  ;;  %v12236_v21 = vsel %vm8428_vm7, %v8544_v45, %v8432_v26  ;;  %1124 = vst.msk [vmem:[#allocation2 + $0x4c] sm:$0xf] %vm11930_vm11, %v7458_v14  ;;  %v7690_v45 = vpop.f32.mrf.mxu1 }
 0x110   : > { %v12235_v13 = vsel %vm9252_vm8, 4294967295, %v12234_v13  ;;  %vm9265_vm15 = vcmp.ne.s16.totalorder %v12236_v21, 0  ;;  %v12237_v2 = vmov 0  ;;  %v931_v6 = vsel %vm899_vm9, -1.0, %v12228_v18 }
 0x111   : > { %v12238_v2 = vsel %vm9265_vm15, 4294967295, %v12237_v2  ;;  %vm857_vm1 = vcmp.gt.f32.partialorder %v9233_v9, %v8802_v20  ;;  %vm889_vm4 = vcmp.lt.f32.partialorder %v9233_v9, %v8802_v20  ;;  %vm12239_vm5 = vcmp.lt.f32.partialorder %v9041_v23, %v8823_v60 }
 0x112   : > { %v765_v30 = vsel %vm12239_vm5, -1.0, %v12228_v18  ;;  %v9279_v10 = vor.u32 %v2271_v27, %v2268_v52  ;;  %v963_v36 = vsel %vm867_vm6, 1.0, %v931_v6  ;;  %v921_v21 = vsel %vm889_vm4, -1.0, %v12228_v18 }
 0x113   : > { %vm12240_vm9 = vcmp.gt.f32.partialorder %v8962_v61, %v8823_v60  ;;  %v7466_v49 = vpack.c.bf16 %v963_v36, %v963_v36  ;;  %v953_v48 = vsel %vm857_vm1, 1.0, %v921_v21  ;;  %v797_v42 = vsel %vm701_vm2, 1.0, %v765_v30 }
 0x114   : > { %v796_v14 = vsel %vm12240_vm9, 1.0, %v764_v7  ;;  %v9285_v17 = vmax.f32 %v609_v57, 0.0  ;;  %v12241_v23 = vor.u32 %v8517_v24, %v8515_v22  ;;  %vm12242_vm5 = vsmask.f32 4352  ;;  %v622_v22 = vpop.f32.mrf.mxu1 }
 0x115   : > { %v7456_v27 = vpack.c.bf16 %v953_v48, %v953_v48  ;;  %v824_v6 = vpack.c.bf16 %v797_v42, %v796_v14  ;;  %vm12243_vm4 = vcmp.lt.f32.partialorder %v8955_v11, %v8823_v60  ;;  %vm12244_vm6 = vcmask 31744   ;;  %1132 = vst.msk [vmem:[#allocation2 + $0x6c] sm:$0xf] %vm11930_vm11, %v7466_v49 }
 0x116   : > { %v2273_v52 = vsel %vm12242_vm5, %v12241_v23, %v9279_v10  ;;  %v766_v61 = vsel %vm12243_vm4, -1.0, %v12228_v18  ;;  %vm865_vm2 = vcmp.gt.f32.partialorder %v9285_v17, %v8802_v20  ;;  %vm897_vm1 = vcmp.lt.f32.partialorder %v9285_v17, %v8802_v20  ;;  %vm12247_vm5 = vmmov %vm12244_vm6 }
 0x117   : > { %7698 = vmatprep.mubr.msk.bf16.mxu1 %vm12244_vm6, %v2273_v52  ;;  %vm12245_vm9 = vcmp.lt.f32.partialorder %v9033_v41, %v8823_v60  ;;  %v12246_v24 = vshrl.u32 %v9021_v55, 16  ;;  %1122 = vst.msk [vmem:[#allocation2 + $0x44] sm:$0xf] %vm11930_vm11, %v7456_v27  ;;  %7740 = vmatprep.mubr.msk.bf16.mxu0 %vm12247_vm5, %v824_v6  ;;  %v929_v49 = vsel %vm897_vm1, -1.0, %v12228_v18  ;;  %vm12248_vm4 = vcmp.gt.f32.partialorder %v8955_v11, %v8823_v60  ;;  %v1629_v55 = vld [vmem:[#allocation2 + $0x20] sm:$0xf]  ;;  %v7691_v27 = vpop.f32.mrf.mxu1 }
 0x118   : > { %v767_v42 = vsel %vm12245_vm9, -1.0, %v12228_v18  ;;  %v798_v57 = vsel %vm12248_vm4, 1.0, %v766_v61  ;;  %vm12249_vm6 = vcmp.gt.f32.partialorder %v9033_v41, %v8823_v60  ;;  %v2143_v30 = vsel %vm9215_vm13, %v1627_v19, 0  ;;  %v9323_v52 = vld [vmem:[#allocation2 + $0x1c] sm:$0xf]  ;;  %vm12250_vm4 = vmmov %vm12247_vm5 }
 0x119   : > { %v9308_v48 = vrot.slane %v12246_v24, 4  ;;  %v799_v7 = vsel %vm12249_vm6, 1.0, %v767_v42  ;;  %v961_v36 = vsel %vm865_vm2, 1.0, %v929_v49  ;;  %v7123_v14 = vcombine.low %v2142_v59, %v2143_v30 }
 0x11a   : > { %v825_v21 = vpack.c.bf16 %v799_v7, %v798_v57  ;;  %v9321_v23 = vmax.f32 %v7690_v45, 0.0  ;;  %v7464_v11 = vpack.c.bf16 %v961_v36, %v961_v36  ;;  %v9329_v41 = vmax.f32 %v622_v22, 0.0 }
 0x11b   : > { %v2275_v59 = vshrl.u32 %v7123_v14, 16  ;;  %v2278_v19 = vshll.u32 %v7123_v14, 16  ;;  %v2145_v45 = vsel %vm9265_vm15, %v1629_v55, 0  ;;  %v2144_v6 = vsel %vm9252_vm8, %v9323_v52, 0 }
 0x11c   : > { %7741 = vmatmul.mubr.msk.bf16.gmra.mxu0 %vm12250_vm4, %v825_v21  ;;  %1130 = vst.msk [vmem:[#allocation2 + $0x64] sm:$0xf] %vm11930_vm11, %v7464_v11  ;;  %vm870_vm1 = vcmp.gt.f32.partialorder %v9321_v23, %v8802_v20  ;;  %vm902_vm5 = vcmp.lt.f32.partialorder %v9321_v23, %v8802_v20  ;;  %v12251_v61 = vsel %vm8428_vm7, %v8567_v3, %v8432_v26  ;;  %v12252_v42 = vmov 0  ;;  %v625_v11 = vpop.f32.mrf.mxu1 }
 0x11d   : > { %vm9353_vm4 = vcmp.ne.s16.totalorder %v12251_v61, 0  ;;  %v2277_v22 = vrot.slane %v2275_v59, 3  ;;  %v2280_v24 = vrot.slane %v2278_v19, 4  ;;  %v934_v49 = vsel %vm902_vm5, -1.0, %v12228_v18 }
 0x11e   : > { %v12253_v42 = vsel %vm9353_vm4, 4294967295, %v12252_v42  ;;  %vm868_vm6 = vcmp.gt.f32.partialorder %v9329_v41, %v8802_v20  ;;  %v966_v57 = vsel %vm870_vm1, 1.0, %v934_v49  ;;  %vm900_vm2 = vcmp.lt.f32.partialorder %v9329_v41, %v8802_v20 }
 0x11f   : > { %v7124_v7 = vcombine.low %v2144_v6, %v2145_v45  ;;  %v9364_v3 = vmax.f32 %v7691_v27, 0.0  ;;  %v12254_v30 = vsel %vm8428_vm7, %v8467_v47, %v8510_v16  ;;  %v12255_v55 = vmov 0  ;;  %v9392_v6 = vld [vmem:[%s11886_s5 + $0x8] sm:$0x3] }
 0x120   : > { %vm9371_vm11 = vcmp.ne.s16.totalorder %v12254_v30, 0  ;;  %v2281_v36 = vor.u32 %v2280_v24, %v2277_v22  ;;  %v7469_v21 = vpack.c.bf16 %v966_v57, %v966_v57  ;;  %v932_v14 = vsel %vm900_vm2, -1.0, %v12228_v18  ;;  %v9413_v30 = vld [vmem:[#allocation2 + $0x28] sm:$0xf] }
 0x121   : > { %v12256_v55 = vsel %vm9371_vm11, 4294967295, %v12255_v55  ;;  %vm737_vm9 = vcmp.lt.f32.partialorder %v9233_v9, %v8823_v60  ;;  %v964_v59 = vsel %vm868_vm6, 1.0, %v932_v14  ;;  %v2284_v16 = vshrl.u32 %v7124_v7, 16 }
 0x122   : > { %v2287_v19 = vshll.u32 %v7124_v7, 16  ;;  %vm12257_vm15 = vsmask.f32 4352  ;;  %vm12258_vm8 = vcmask 27648   ;;  %v7467_v27 = vpack.c.bf16 %v964_v59, %v964_v59 }
 0x123   : > { %v2282_v45 = vsel %vm12257_vm15, %v9279_v10, %v2281_v36  ;;  %1135 = vst.msk [vmem:[#allocation2 + $0x78] sm:$0xf] %vm12258_vm8, %v7469_v21  ;;  %vm871_vm5 = vcmp.gt.f32.partialorder %v9364_v3, %v8802_v20  ;;  %vm705_vm1 = vcmp.gt.f32.partialorder %v9233_v9, %v8823_v60  ;;  %vm12259_vm2 = vcmask 31744   ;;  %v7694_v21 = vpop.f32.mrf.mxu1 }
 0x124   : > { %7699 = vmatmul.mubr.msk.bf16.vlgmr.msra.gmra.mxu1 %vm12259_vm2, %v2282_v45  ;;  %v2286_v61 = vrot.slane %v2284_v16, 3  ;;  %v2289_v22 = vrot.slane %v2287_v19, 4  ;;  %vm903_vm15 = vcmp.lt.f32.partialorder %v9364_v3, %v8802_v20  ;;  %vm12260_vm8 = vcmp.lt.f32.partialorder %v9139_v44, %v8823_v60 }
 0x125   : > { %v768_v10 = vsel %vm12260_vm8, -1.0, %v12228_v18  ;;  %7765 = vmatpush3.bf16.msra.mxu1 %v8623_v35  ;;  %vm12261_vm6 = vcmask 27648   ;;  %v935_v24 = vsel %vm903_vm15, -1.0, %v12228_v18  ;;  %v769_v49 = vsel %vm737_vm9, -1.0, %v12228_v18 }
 0x126   : > { %1133 = vst.msk [vmem:[#allocation2 + $0x70] sm:$0xf] %vm12261_vm6, %v7467_v27  ;;  %vm12262_vm2 = vcmp.gt.f32.partialorder %v9139_v44, %v8823_v60  ;;  %v9411_v7 = vmax.f32 %v625_v11, 0.0  ;;  %v12263_v35 = vsel %vm8428_vm7, %v8467_v47, %v8558_v53  ;;  %v12264_v14 = vmov 0  ;;  %v9436_v53 = vld [vmem:[#allocation2 + $0x24] sm:$0xf] }
 0x127   : > { %v800_v57 = vsel %vm12262_vm2, 1.0, %v768_v10  ;;  %vm9420_vm15 = vcmp.ne.s16.totalorder %v12263_v35, 0  ;;  %v9424_v59 = vor.u32 %v2289_v22, %v2286_v61  ;;  %v967_v44 = vsel %vm871_vm5, 1.0, %v935_v24 }
 0x128   : > { %v12265_v14 = vsel %vm9420_vm15, 4294967295, %v12264_v14  ;;  %v801_v11 = vsel %vm705_vm1, 1.0, %v769_v49  ;;  %vm12266_vm9 = vcmp.lt.f32.partialorder %v9096_v1, %v8823_v60  ;;  %v12267_v19 = vsel %vm8428_vm7, %v8638_v5, %v8432_v26  ;;  %v638_v49 = vpop.f32.mrf.mxu1 }
 0x129   : > { %v770_v16 = vsel %vm12266_vm9, -1.0, %v12228_v18  ;;  %vm9443_vm8 = vcmp.ne.s16.totalorder %v12267_v19, 0  ;;  %v12268_v45 = vmov 0  ;;  %vm12271_vm5 = vcmask 1041408  }
 0x12a   : > { %v12269_v45 = vsel %vm9443_vm8, 4294967295, %v12268_v45  ;;  %8044 = vmatprep.subr.msk.bf16.mxu1 %vm12271_vm5, %v9392_v6  ;;  %v7470_v9 = vpack.c.bf16 %v967_v44, %v967_v44  ;;  %v826_v27 = vpack.c.bf16 %v801_v11, %v800_v57  ;;  %vm869_vm6 = vcmp.gt.f32.partialorder %v9411_v7, %v8802_v20 }
 0x12b   : > { %12270 = vst [vmem:[#allocation32_spill] sm:$0xff] %v12269_v45  ;;  %vm12272_vm2 = vsmask.f32 4352  ;;  %vm901_vm9 = vcmp.lt.f32.partialorder %v9411_v7, %v8802_v20  ;;  %vm12273_vm0 = vcmp.lt.f32.partialorder %v9188_v38, %v8823_v60  ;;  %vm12274_vm5 = vcmp.gt.f32.partialorder %v9096_v1, %v8823_v60 }
 0x12c   : > { %v2291_v61 = vsel %vm12272_vm2, %v2281_v36, %v9424_v59  ;;  %v771_v5 = vsel %vm12273_vm0, -1.0, %v12228_v18  ;;  %v802_v22 = vsel %vm12274_vm5, 1.0, %v770_v16  ;;  %vm12275_vm1 = vcmask 31744  }
 0x12d   : > { %7702 = vmatprep.mubr.msk.bf16.mxu1 %vm12275_vm1, %v2291_v61  ;;  %vm12276_vm13 = vcmask 27648   ;;  %vm12277_vm14 = vmmov %vm12275_vm1  ;;  %v933_v36 = vsel %vm901_vm9, -1.0, %v12228_v18  ;;  %vm12278_vm2 = vcmp.gt.f32.partialorder %v9188_v38, %v8823_v60  ;;  %v2146_v24 = vsel %vm9371_vm11, %v9436_v53, 0 }
 0x12e   : > { %1136 = vst.msk [vmem:[#allocation2 + $0x7c] sm:$0xf] %vm12276_vm13, %v7470_v9  ;;  %7744 = vmatprep.mubr.msk.bf16.mxu0 %vm12277_vm14, %v826_v27  ;;  %v803_v10 = vsel %vm12278_vm2, 1.0, %v771_v5  ;;  %v2147_v1 = vsel %vm9353_vm4, %v9413_v30, 0  ;;  %v965_v57 = vsel %vm869_vm6, 1.0, %v933_v36  ;;  %vm709_vm14 = vcmp.gt.f32.partialorder %v9085_v63, %v8823_v60  ;;  %vm12281_vm6 = vmmov %vm12275_vm1  ;;  %v7695_v36 = vpop.f32.mrf.mxu1 }
 0x12f   : > { %v827_v35 = vpack.c.bf16 %v803_v10, %v802_v22  ;;  %v7125_v44 = vcombine.low %v2146_v24, %v2147_v1  ;;  %v7468_v11 = vpack.c.bf16 %v965_v57, %v965_v57  ;;  %vm12279_vm0 = vcmp.lt.f32.partialorder %v8985_v51, %v8823_v60  ;;  %v1633_v22 = vld [vmem:[#allocation2 + $0x30] sm:$0xf] }
 0x130   : > { %v772_v38 = vsel %vm12279_vm0, -1.0, %v12228_v18  ;;  %vm12280_vm13 = vcmp.lt.f32.partialorder %v9085_v63, %v8823_v60  ;;  %v9487_v19 = vmax.f32 %v7694_v21, 0.0  ;;  %vm12282_vm9 = vcmp.gt.f32.partialorder %v8985_v51, %v8823_v60  ;;  %v9502_v21 = vld [vmem:[#allocation2 + $0x2c] sm:$0xf] }
 0x131   : > { %v773_v16 = vsel %vm12280_vm13, -1.0, %v12228_v18  ;;  %7745 = vmatmul.mubr.msk.bf16.gmra.mxu0 %vm12281_vm6, %v827_v35  ;;  %v2293_v9 = vshrl.u32 %v7125_v44, 16  ;;  %v2296_v27 = vshll.u32 %v7125_v44, 16  ;;  %v804_v61 = vsel %vm12282_vm9, 1.0, %v772_v38 }
 0x132   : > { %v805_v5 = vsel %vm709_vm14, 1.0, %v773_v16  ;;  %vm12283_vm0 = vcmask 27648   ;;  %vm874_vm13 = vcmp.gt.f32.partialorder %v9487_v19, %v8802_v20  ;;  %v12284_v51 = vsel %vm8428_vm7, %v8709_v34, %v8432_v26 }
 0x133   : > { %1134 = vst.msk [vmem:[#allocation2 + $0x74] sm:$0xf] %vm12283_vm0, %v7468_v11  ;;  %v828_v63 = vpack.c.bf16 %v805_v5, %v804_v61  ;;  %vm9509_vm14 = vcmp.ne.s16.totalorder %v12284_v51, 0  ;;  %v12285_v10 = vmov 0  ;;  %v2295_v24 = vrot.slane %v2293_v9, 3  ;;  %vm12288_vm0 = vmmov %vm12275_vm1  ;;  %v641_v5 = vpop.f32.mrf.mxu1 }
 0x134   : > { %v12286_v10 = vsel %vm9509_vm14, 4294967295, %v12285_v10  ;;  %v2298_v1 = vrot.slane %v2296_v27, 4  ;;  %vm906_vm6 = vcmp.lt.f32.partialorder %v9487_v19, %v8802_v20  ;;  %v9515_v57 = vmax.f32 %v638_v49, 0.0 }
 0x135   : > { %12287 = vst [vmem:[#allocation33_spill] sm:$0xff] %v12286_v10  ;;  %7748 = vmatprep.mubr.msk.bf16.mxu0 %vm12288_vm0, %v828_v63  ;;  %v938_v35 = vsel %vm906_vm6, -1.0, %v12228_v18  ;;  %v2149_v34 = vsel %vm9443_vm8, %v1633_v22, 0  ;;  %v9523_v44 = vmax.f32 %v7695_v36, 0.0  ;;  %v12289_v11 = vsel %vm8428_vm7, %v8467_v47, %v8633_v40 }
 0x136   : > { %vm9530_vm2 = vcmp.ne.s16.totalorder %v12289_v11, 0  ;;  %v12290_v49 = vmov 0  ;;  %v12293_v38 = vsel %vm8428_vm7, %v8467_v47, %v8668_v4  ;;  %v12294_v16 = vmov 0 }
 0x137   : > { %v12291_v49 = vsel %vm9530_vm2, 4294967295, %v12290_v49  ;;  %vm9539_vm6 = vcmp.ne.s16.totalorder %v12293_v38, 0  ;;  %v2299_v40 = vor.u32 %v2298_v1, %v2295_v24  ;;  %v970_v9 = vsel %vm874_vm13, 1.0, %v938_v35 }
 0x138   : > { %12292 = vst [vmem:[#allocation34_spill] sm:$0xff] %v12291_v49  ;;  %v12295_v16 = vsel %vm9539_vm6, 4294967295, %v12294_v16  ;;  %v2148_v27 = vsel %vm9420_vm15, %v9502_v21, 0  ;;  %v7473_v4 = vpack.c.bf16 %v970_v9, %v970_v9  ;;  %vm872_vm5 = vcmp.gt.f32.partialorder %v9515_v57, %v8802_v20  ;;  %vm12298_vm15 = vmmov %vm12275_vm1  ;;  %v9600_v9 = vld [vmem:[#allocation2 + $0x38] sm:$0xf] }
 0x139   : > { %12296 = vst [vmem:[#allocation35_spill] sm:$0xff] %v12295_v16  ;;  %vm904_vm0 = vcmp.lt.f32.partialorder %v9515_v57, %v8802_v20  ;;  %v7126_v61 = vcombine.low %v2148_v27, %v2149_v34  ;;  %vm12297_vm9 = vsmask.f32 4352  ;;  %vm12299_vm4 = vcmask 27648  }
 0x13a   : > { %v2300_v22 = vsel %vm12297_vm9, %v9424_v59, %v2299_v40  ;;  %v936_v63 = vsel %vm904_vm0, -1.0, %v12228_v18  ;;  %1139 = vst.msk [vmem:[#allocation2 + $0x88] sm:$0xf] %vm12299_vm4, %v7473_v4  ;;  %vm875_vm1 = vcmp.gt.f32.partialorder %v9523_v44, %v8802_v20  ;;  %v12300_v59 = vsel %vm8428_vm7, %v8727_v46, %v8432_v26 }
 0x13b   : > { %7703 = vmatmul.mubr.msk.bf16.gmra.mxu1 %vm12298_vm15, %v2300_v22  ;;  %v968_v36 = vsel %vm872_vm5, 1.0, %v936_v63  ;;  %v2302_v51 = vshrl.u32 %v7126_v61, 16  ;;  %v2305_v24 = vshll.u32 %v7126_v61, 16  ;;  %vm9579_vm9 = vcmp.ne.s16.totalorder %v12300_v59, 0 }
 0x13c   : > { %v12301_v1 = vmov 0  ;;  %v12304_v35 = vsel %vm8428_vm7, %v8731_v37, %v8432_v26  ;;  %v12305_v34 = vmov 0  ;;  %v7471_v11 = vpack.c.bf16 %v968_v36, %v968_v36 }
 0x13d   : > { %v12302_v1 = vsel %vm9579_vm9, 4294967295, %v12301_v1  ;;  %vm9588_vm4 = vcmp.ne.s16.totalorder %v12304_v35, 0  ;;  %vm907_vm15 = vcmp.lt.f32.partialorder %v9523_v44, %v8802_v20  ;;  %v9594_v38 = vmax.f32 %v641_v5, 0.0  ;;  %v9609_v5 = vld [vmem:[#allocation2 + $0x34] sm:$0xf] }
 0x13e   : > { %12303 = vst [vmem:[#allocation36_spill] sm:$0xff] %v12302_v1  ;;  %v12306_v34 = vsel %vm9588_vm4, 4294967295, %v12305_v34  ;;  %vm12308_vm5 = vcmp.lt.f32.partialorder %v8960_v50, %v8823_v60  ;;  %v2304_v37 = vrot.slane %v2302_v51, 3  ;;  %v2307_v27 = vrot.slane %v2305_v24, 4  ;;  %v12344_v1 = vld [vmem:[#allocation10_spill] sm:$0xff] }
 0x13f   : > { %12307 = vst [vmem:[#allocation37_spill] sm:$0xff] %v12306_v34  ;;  %v774_v46 = vsel %vm12308_vm5, -1.0, %v12228_v18  ;;  %v939_v4 = vsel %vm907_vm15, -1.0, %v12228_v18  ;;  %vm12309_vm11 = vcmp.lt.f32.partialorder %v9035_v0, %v8823_v60  ;;  %v12310_v22 = vsel %vm8428_vm7, %v8467_v47, %v8675_v15 }
 0x140   : > { %v775_v61 = vsel %vm12309_vm11, -1.0, %v12228_v18  ;;  %vm9616_vm5 = vcmp.ne.s16.totalorder %v12310_v22, 0  ;;  %v12311_v63 = vmov 0  ;;  %v12314_v36 = vsel %vm8428_vm7, %v8467_v47, %v8688_v31 }
 0x141   : > { %v12312_v63 = vsel %vm9616_vm5, 4294967295, %v12311_v63  ;;  %vm9625_vm15 = vcmp.ne.s16.totalorder %v12314_v36, 0  ;;  %v12315_v51 = vmov 0  ;;  %vm12318_vm13 = vcmask 27648   ;;  %v9676_v36 = vld [vmem:[#allocation2 + $0x40] sm:$0xf] }
 0x142   : > { %12313 = vst [vmem:[#allocation38_spill] sm:$0xff] %v12312_v63  ;;  %v12316_v51 = vsel %vm9625_vm15, 4294967295, %v12315_v51  ;;  %1137 = vst.msk [vmem:[#allocation2 + $0x80] sm:$0xf] %vm12318_vm13, %v7471_v11  ;;  %v971_v15 = vsel %vm875_vm1, 1.0, %v939_v4  ;;  %vm873_vm8 = vcmp.gt.f32.partialorder %v9594_v38, %v8802_v20  ;;  %vm905_vm3 = vcmp.lt.f32.partialorder %v9594_v38, %v8802_v20 }
 0x143   : > { %12317 = vst [vmem:[#allocation39_spill] sm:$0xff] %v12316_v51  ;;  %v9641_v31 = vor.u32 %v2307_v27, %v2304_v37  ;;  %v7474_v24 = vpack.c.bf16 %v971_v15, %v971_v15  ;;  %v937_v59 = vsel %vm905_vm3, -1.0, %v12228_v18  ;;  %vm12319_vm11 = vcmp.gt.f32.partialorder %v8960_v50, %v8823_v60  ;;  %v9647_v11 = vld [vmem:[#allocation2 + $0x3c] sm:$0xf] }
 0x144   : > { %v806_v35 = vsel %vm12319_vm11, 1.0, %v774_v46  ;;  %v12320_v4 = vsel %vm8428_vm7, %v8748_v56, %v8432_v26  ;;  %v12321_v22 = vmov 0  ;;  %v969_v20 = vsel %vm873_vm8, 1.0, %v937_v59  ;;  %v9694_v59 = vld [vmem:[#allocation2 + $0x48] sm:$0xf] }
 0x145   : > { %vm9654_vm1 = vcmp.ne.s16.totalorder %v12320_v4, 0  ;;  %vm12324_vm3 = vcmp.gt.f32.partialorder %v9035_v0, %v8823_v60  ;;  %v2150_v46 = vsel %vm9530_vm2, %v9609_v5, 0  ;;  %v2151_v56 = vsel %vm9509_vm14, %v9600_v9, 0  ;;  %1140 = vst.msk [vmem:[#allocation2 + $0x8c] sm:$0xf] %vm12318_vm13, %v7474_v24 }
 0x146   : > { %v12322_v22 = vsel %vm9654_vm1, 4294967295, %v12321_v22  ;;  %v807_v50 = vsel %vm12324_vm3, 1.0, %v775_v61  ;;  %vm12325_vm8 = vsmask.f32 4352  ;;  %v7472_v0 = vpack.c.bf16 %v969_v20, %v969_v20 }
 0x147   : > { %12323 = vst [vmem:[#allocation40_spill] sm:$0xff] %v12322_v22  ;;  %v2309_v37 = vsel %vm12325_vm8, %v2299_v40, %v9641_v31  ;;  %v829_v27 = vpack.c.bf16 %v807_v50, %v806_v35  ;;  %v7127_v61 = vcombine.low %v2150_v46, %v2151_v56  ;;  %vm12326_vm2 = vcmask 31744   ;;  %v9701_v46 = vld [vmem:[#allocation2 + $0x44] sm:$0xf] }
 0x148   : > { %7706 = vmatprep.mubr.msk.bf16.mxu1 %vm12326_vm2, %v2309_v37  ;;  %vm713_vm11 = vcmp.gt.f32.partialorder %v9285_v17, %v8823_v60  ;;  %vm12327_vm0 = vcmp.lt.f32.partialorder %v9141_v12, %v8823_v60  ;;  %vm12328_vm13 = vcmp.lt.f32.partialorder %v9285_v17, %v8823_v60  ;;  %v2152_v24 = vsel %vm9539_vm6, %v9647_v11, 0  ;;  %v12336_v37 = vld [vmem:[#allocation14_spill] sm:$0xff] }
 0x149   : > { %v776_v40 = vsel %vm12327_vm0, -1.0, %v12228_v18  ;;  %v777_v15 = vsel %vm12328_vm13, -1.0, %v12228_v18  ;;  %vm12329_vm2 = vcmask 27648   ;;  %vm12330_vm8 = vcmask 31744  }
 0x14a   : > { %1138 = vst.msk [vmem:[#allocation2 + $0x84] sm:$0xf] %vm12329_vm2, %v7472_v0  ;;  %7749 = vmatmul.mubr.msk.bf16.gmra.mxu0 %vm12330_vm8, %v829_v27  ;;  %v2311_v35 = vshrl.u32 %v7127_v61, 16  ;;  %v2314_v4 = vshll.u32 %v7127_v61, 16  ;;  %vm12331_vm0 = vcmp.gt.f32.partialorder %v9141_v12, %v8823_v60  ;;  %v809_v50 = vsel %vm713_vm11, 1.0, %v777_v15 }
 0x14b   : > { %v808_v20 = vsel %vm12331_vm0, 1.0, %v776_v40  ;;  %v12332_v17 = vsel %vm8428_vm7, %v8467_v47, %v8691_v8  ;;  %v12333_v56 = vmov 0  ;;  %v12337_v0 = vsel %vm8428_vm7, %v12336_v37, %v8432_v26  ;;  %v9735_v15 = vld [vmem:[%s11883_s2] ss:$0 sm:$0xff] }
 0x14c   : > { %vm9708_vm13 = vcmp.ne.s16.totalorder %v12332_v17, 0  ;;  %vm9717_vm2 = vcmp.ne.s16.totalorder %v12337_v0, 0  ;;  %v12338_v12 = vmov 0  ;;  %v830_v27 = vpack.c.bf16 %v809_v50, %v808_v20  ;;  %v9744_v0 = vld [vmem:[#allocation2 + $0x4c] sm:$0xf] }
 0x14d   : > { %v12334_v56 = vsel %vm9708_vm13, 4294967295, %v12333_v56  ;;  %v12339_v12 = vsel %vm9717_vm2, 4294967295, %v12338_v12  ;;  %v2153_v61 = vsel %vm9579_vm9, %v9676_v36, 0  ;;  %vm12341_vm11 = vcmp.lt.f32.partialorder %v9134_v32, %v8823_v60 }
 0x14e   : > { %12335 = vst [vmem:[#allocation41_spill] sm:$0xff] %v12334_v56  ;;  %12340 = vst [vmem:[#allocation14_spill] sm:$0xff] %v12339_v12  ;;  %v778_v8 = vsel %vm12341_vm11, -1.0, %v12228_v18  ;;  %vm12342_vm8 = vcmp.lt.f32.partialorder %v9231_v39, %v8823_v60  ;;  %v2313_v20 = vrot.slane %v2311_v35, 3  ;;  %v2316_v50 = vrot.slane %v2314_v4, 4 }
 0x14f   : > { %v779_v40 = vsel %vm12342_vm8, -1.0, %v12228_v18  ;;  %v7128_v17 = vcombine.low %v2152_v24, %v2153_v61  ;;  %vm12343_vm11 = vcmp.gt.f32.partialorder %v9134_v32, %v8823_v60  ;;  %v12345_v16 = vsel %vm8428_vm7, %v8467_v47, %v12344_v1  ;;  %v12351_v61 = vld [vmem:[#allocation15_spill] sm:$0xff] }
 0x150   : > { %v810_v37 = vsel %vm12343_vm11, 1.0, %v778_v8  ;;  %vm9751_vm8 = vcmp.ne.s16.totalorder %v12345_v16, 0  ;;  %v12346_v49 = vmov 0  ;;  %vm12349_vm0 = vcmask 31744   ;;  %v9898_v12 = vld [vmem:[#allocation2 + $0x64] sm:$0xf] }
 0x151   : > { %v12347_v49 = vsel %vm9751_vm8, 4294967295, %v12346_v49  ;;  %7752 = vmatprep.mubr.msk.bf16.mxu0 %vm12349_vm0, %v830_v27  ;;  %vm12350_vm9 = vcmp.gt.f32.partialorder %v9231_v39, %v8823_v60  ;;  %v2154_v24 = vsel %vm9616_vm5, %v9701_v46, 0  ;;  %v2155_v16 = vsel %vm9588_vm4, %v9694_v59, 0  ;;  %v9773_v27 = vld [vmem:[#allocation2 + $0x50] sm:$0xf] }
 0x152   : > { %12348 = vst [vmem:[#allocation10_spill] sm:$0xff] %v12347_v49  ;;  %v811_v32 = vsel %vm12350_vm9, 1.0, %v779_v40  ;;  %v2317_v1 = vor.u32 %v2316_v50, %v2313_v20  ;;  %v2320_v39 = vshrl.u32 %v7128_v17, 16  ;;  %v2323_v35 = vshll.u32 %v7128_v17, 16 }
 0x153   : > { %v831_v4 = vpack.c.bf16 %v811_v32, %v810_v37  ;;  %v12352_v8 = vsel %vm8428_vm7, %v12351_v61, %v8432_v26  ;;  %v12353_v40 = vmov 0  ;;  %v7129_v34 = vcombine.low %v2154_v24, %v2155_v16  ;;  %v12360_v61 = vld [vmem:[#allocation11_spill] sm:$0xff] }
 0x154   : > { %vm9780_vm9 = vcmp.ne.s16.totalorder %v12352_v8, 0  ;;  %vm12356_vm0 = vcmp.lt.f32.partialorder %v9329_v41, %v8823_v60  ;;  %vm12357_vm3 = vcmp.lt.f32.partialorder %v9411_v7, %v8823_v60  ;;  %v2156_v17 = vsel %vm9625_vm15, %v9744_v0, 0 }
 0x155   : > { %v12354_v40 = vsel %vm9780_vm9, 4294967295, %v12353_v40  ;;  %v780_v20 = vsel %vm12356_vm0, -1.0, %v12228_v18  ;;  %v781_v50 = vsel %vm12357_vm3, -1.0, %v12228_v18  ;;  %vm12358_vm5 = vsmask.f32 4352 }
 0x156   : > { %12355 = vst [vmem:[#allocation15_spill] sm:$0xff] %v12354_v40  ;;  %v2318_v37 = vsel %vm12358_vm5, %v9641_v31, %v2317_v1  ;;  %v2322_v32 = vrot.slane %v2320_v39, 3  ;;  %v2325_v24 = vrot.slane %v2323_v35, 4  ;;  %vm12359_vm0 = vcmp.gt.f32.partialorder %v9329_v41, %v8823_v60  ;;  %v12367_v39 = vld [vmem:[#allocation16_spill] sm:$0xff] }
 0x157   : > { %v812_v16 = vsel %vm12359_vm0, 1.0, %v780_v20  ;;  %v12361_v8 = vsel %vm8428_vm7, %v8467_v47, %v12360_v61  ;;  %v12362_v51 = vmov 0  ;;  %vm12365_vm11 = vcmask 31744  }
 0x158   : > { %vm9809_vm3 = vcmp.ne.s16.totalorder %v12361_v8, 0  ;;  %7707 = vmatmul.mubr.msk.bf16.gmra.mxu1 %vm12365_vm11, %v2318_v37  ;;  %v2329_v63 = vshrl.u32 %v7129_v34, 16  ;;  %v2332_v10 = vshll.u32 %v7129_v34, 16  ;;  %vm12366_vm5 = vcmp.gt.f32.partialorder %v9411_v7, %v9735_v15  ;;  %7753 = vmatmul.mubr.msk.bf16.gmra.mxu0 %vm12365_vm11, %v831_v4  ;;  %v9836_v8 = vld [vmem:[#allocation2 + $0x58] sm:$0xf] }
 0x159   : > { %v12363_v51 = vsel %vm9809_vm3, 4294967295, %v12362_v51  ;;  %v813_v31 = vsel %vm12366_vm5, 1.0, %v781_v50  ;;  %v2157_v41 = vsel %vm9654_vm1, %v9773_v27, 0  ;;  %v12368_v35 = vsel %vm8428_vm7, %v12367_v39, %v8432_v26  ;;  %v9834_v50 = vld [vmem:[#allocation2 + $0x54] sm:$0xf] }
 0x15a   : > { %12364 = vst [vmem:[#allocation11_spill] sm:$0xff] %v12363_v51  ;;  %vm9825_vm0 = vcmp.ne.s16.totalorder %v12368_v35, 0  ;;  %v12369_v20 = vmov 0  ;;  %v2326_v37 = vor.u32 %v2325_v24, %v2322_v32  ;;  %v832_v34 = vpack.c.bf16 %v813_v31, %v812_v16 }
 0x15b   : > { %v12370_v20 = vsel %vm9825_vm0, 4294967295, %v12369_v20  ;;  %v7130_v61 = vcombine.low %v2156_v17, %v2157_v41  ;;  %vm12372_vm5 = vcmp.lt.f32.partialorder %v9321_v23, %v8823_v60  ;;  %v2331_v22 = vrot.slane %v2329_v63, 3  ;;  %v12375_v17 = vld [vmem:[#allocation12_spill] sm:$0xff]  ;;  %v9851_v63 = vld [vmem:[#allocation2 + $0x5c] sm:$0xf]  ;;  %v12379_v41 = vld [vmem:[#allocation13_spill] sm:$0xff] }
 0x15c   : > { %12371 = vst [vmem:[#allocation16_spill] sm:$0xff] %v12370_v20  ;;  %v782_v7 = vsel %vm12372_vm5, -1.0, %v12228_v18  ;;  %v2334_v39 = vrot.slane %v2332_v10, 4  ;;  %vm12373_vm4 = vcmp.lt.f32.partialorder %v9364_v3, %v8823_v60  ;;  %vm12374_vm11 = vcmp.gt.f32.partialorder %v9321_v23, %v8823_v60 }
 0x15d   : > { %v783_v32 = vsel %vm12373_vm4, -1.0, %v12228_v18  ;;  %v814_v4 = vsel %vm12374_vm11, 1.0, %v782_v7  ;;  %vm12376_vm15 = vsmask.f32 4352  ;;  %vm12377_vm5 = vcmask 31744  }
 0x15e   : > { %v2327_v24 = vsel %vm12376_vm15, %v2317_v1, %v2326_v37  ;;  %7756 = vmatprep.mubr.msk.bf16.mxu0 %vm12377_vm5, %v832_v34  ;;  %v2338_v16 = vshrl.u32 %v7130_v61, 16  ;;  %v2341_v31 = vshll.u32 %v7130_v61, 16  ;;  %vm12378_vm6 = vcmp.gt.f32.partialorder %v9364_v3, %v8823_v60  ;;  %vm12384_vm15 = vmmov %vm12377_vm5 }
 0x15f   : > { %v815_v10 = vsel %vm12378_vm6, 1.0, %v783_v32  ;;  %v12380_v23 = vsel %vm8600_vm10, %v8605_v29, %v12379_v41  ;;  %v12381_v35 = vmov 0  ;;  %7710 = vmatprep.mubr.msk.bf16.mxu1 %vm12384_vm15, %v2327_v24  ;;  %v2335_v1 = vor.u32 %v2334_v39, %v2331_v22  ;;  %v9871_v41 = vld [vmem:[#allocation2 + $0x60] sm:$0xf] }
 0x160   : > { %vm9858_vm4 = vcmp.ne.s16.totalorder %v12380_v23, 0  ;;  %v833_v34 = vpack.c.bf16 %v815_v10, %v814_v4  ;;  %v2158_v60 = vsel %vm9708_vm13, %v9834_v50, 0  ;;  %v2159_v3 = vsel %vm9717_vm2, %v9836_v8, 0 }
 0x161   : > { %v12382_v35 = vsel %vm9858_vm4, 4294967295, %v12381_v35  ;;  %v2340_v61 = vrot.slane %v2338_v16, 3  ;;  %v2343_v7 = vrot.slane %v2341_v31, 4  ;;  %v7131_v32 = vcombine.low %v2158_v60, %v2159_v3  ;;  %v3163_v16 = vld [vmem:[#allocation2 + $0x10] sm:$0xf]  ;;  %v12388_v31 = vld [vmem:[#allocation18_spill] sm:$0xff] }
 0x162   : > { %12383 = vst [vmem:[#allocation13_spill] sm:$0xff] %v12382_v35  ;;  %vm721_vm6 = vcmp.gt.f32.partialorder %v9594_v38, %v9735_v15  ;;  %vm12385_vm11 = vsmask.f32 4352  ;;  %vm12386_vm5 = vcmp.lt.f32.partialorder %v9515_v57, %v9735_v15  ;;  %vm12387_vm15 = vcmp.lt.f32.partialorder %v9594_v38, %v9735_v15 }
 0x163   : > { %v2336_v24 = vsel %vm12385_vm11, %v2326_v37, %v2335_v1  ;;  %v784_v22 = vsel %vm12386_vm5, -1.0, %v12228_v18  ;;  %v785_v39 = vsel %vm12387_vm15, -1.0, %v12228_v18  ;;  %v2160_v4 = vsel %vm9751_vm8, %v9851_v63, 0  ;;  %v12389_v37 = vld [vmem:[#allocation17_spill] sm:$0xff] }
 0x164   : > { %v12390_v10 = vsel %vm8600_vm10, %v8605_v29, %v12389_v37  ;;  %v12391_v23 = vmov 0  ;;  %v2344_v60 = vor.u32 %v2343_v7, %v2340_v61  ;;  %v2347_v3 = vshrl.u32 %v7131_v32, 16  ;;  %v9912_v7 = vld [vmem:[#allocation2 + $0x68] sm:$0xf] }
 0x165   : > { %vm9891_vm11 = vcmp.ne.s16.totalorder %v12390_v10, 0  ;;  %v2350_v38 = vshll.u32 %v7131_v32, 16  ;;  %vm12394_vm5 = vcmp.gt.f32.partialorder %v9515_v57, %v9735_v15  ;;  %vm12395_vm15 = vcmask 31744   ;;  %v3164_v10 = vld [vmem:[#allocation2 + $0x14] sm:$0xf] }
 0x166   : > { %v12392_v23 = vsel %vm9891_vm11, 4294967295, %v12391_v23  ;;  %v816_v49 = vsel %vm12394_vm5, 1.0, %v784_v22  ;;  %7711 = vmatmul.mubr.msk.bf16.gmra.mxu1 %vm12395_vm15, %v2336_v24  ;;  %v817_v56 = vsel %vm721_vm6, 1.0, %v785_v39  ;;  %v2161_v37 = vsel %vm9780_vm9, %v9871_v41, 0  ;;  %vm12399_vm6 = vmmov %vm12395_vm15 }
 0x167   : > { %12393 = vst [vmem:[#allocation17_spill] sm:$0xff] %v12392_v23  ;;  %vm12396_vm1 = vcmp.lt.f32.partialorder %v9487_v19, %v9735_v15  ;;  %vm12397_vm8 = vcmp.lt.f32.partialorder %v9523_v44, %v9735_v15  ;;  %vm12398_vm2 = vsmask.f32 4352  ;;  %7757 = vmatmul.mubr.msk.bf16.gmra.mxu0 %vm12399_vm6, %v833_v34  ;;  %v2349_v24 = vrot.slane %v2347_v3, 3  ;;  %vm12400_vm15 = vmmov %vm12399_vm6 }
 0x168   : > { %v786_v61 = vsel %vm12396_vm1, -1.0, %v12228_v18  ;;  %v787_v57 = vsel %vm12397_vm8, -1.0, %v12228_v18  ;;  %v2345_v32 = vsel %vm12398_vm2, %v2335_v1, %v2344_v60  ;;  %v2352_v22 = vrot.slane %v2350_v38, 4  ;;  %vm12403_vm2 = vmmov %vm12399_vm6 }
 0x169   : > { %v834_v39 = vpack.c.bf16 %v817_v56, %v816_v49  ;;  %7714 = vmatprep.mubr.msk.bf16.mxu1 %vm12400_vm15, %v2345_v32  ;;  %v7132_v40 = vcombine.low %v2160_v4, %v2161_v37  ;;  %vm12401_vm1 = vcmp.gt.f32.partialorder %v9487_v19, %v9735_v15  ;;  %vm12402_vm8 = vcmp.gt.f32.partialorder %v9523_v44, %v9735_v15  ;;  %v3165_v32 = vld [vmem:[#allocation2 + $0x18] sm:$0xf]  ;;  %vm12418_vm15 = vmmov %vm12403_vm2 }
 0x16a   : > { %v818_v45 = vsel %vm12401_vm1, 1.0, %v786_v61  ;;  %v819_v18 = vsel %vm12402_vm8, 1.0, %v787_v57  ;;  %v2162_v1 = vsel %vm9809_vm3, %v9898_v12, 0  ;;  %v2353_v34 = vor.u32 %v2352_v22, %v2349_v24  ;;  %v9945_v61 = vld [vmem:[#allocation2 + $0x6c] sm:$0xf] }
 0x16b   : > { %7760 = vmatprep.mubr.msk.bf16.mxu0 %vm12403_vm2, %v834_v39  ;;  %v835_v49 = vpack.c.bf16 %v819_v18, %v818_v45  ;;  %v2163_v56 = vsel %vm9825_vm0, %v9912_v7, 0  ;;  %vm12404_vm6 = vcmp.ne.s16.totalorder %v12375_v17, 0  ;;  %v2356_v4 = vshrl.u32 %v7132_v40, 16 }
 0x16c   : > { %v3647_v19 = vsel %vm12404_vm6, %v3163_v16, 0  ;;  %v2359_v3 = vshll.u32 %v7132_v40, 16  ;;  %v7133_v38 = vcombine.low %v2162_v1, %v2163_v56  ;;  %v3648_v44 = vsel %vm9858_vm4, %v3164_v10, 0  ;;  %v3166_v10 = vld [vmem:[#allocation2 + $0x1c] sm:$0xf] }
 0x16d   : > { %v12405_v45 = vsel %vm8600_vm10, %v8605_v29, %v8885_v54  ;;  %v12406_v15 = vmov 0  ;;  %vm12409_vm8 = vsmask.f32 4352  ;;  %v7205_v16 = vcombine.low %v3647_v19, %v3648_v44  ;;  %v12413_v19 = vld [vmem:[#allocation24_spill] sm:$0xff]  ;;  %v9968_v44 = vld [vmem:[#allocation2 + $0x70] sm:$0xf] }
 0x16e   : > { %vm9940_vm1 = vcmp.ne.s16.totalorder %v12405_v45, 0  ;;  %v2354_v37 = vsel %vm12409_vm8, %v2344_v60, %v2353_v34  ;;  %v2049_v40 = vsel %vm8428_vm7, %v8467_v47, %v9182_v58  ;;  %v2053_v57 = vor.u32 %v9308_v48, %v9182_v58 }
 0x16f   : > { %v12407_v15 = vsel %vm9940_vm1, 4294967295, %v12406_v15  ;;  %v2358_v24 = vrot.slane %v2356_v4, 3  ;;  %v2361_v54 = vrot.slane %v2359_v3, 4  ;;  %v2365_v22 = vshrl.u32 %v7133_v38, 16  ;;  %7715 = vmatmul.mubr.msk.bf16.gmra.mxu1 %vm12418_vm15, %v2354_v37  ;;  %7761 = vmatmul.mubr.msk.bf16.gmra.mxu0 %vm12403_vm2, %v835_v49  ;;  %v3167_v49 = vld [vmem:[#allocation2 + $0x20] sm:$0xf] }
 0x170   : > { %12408 = vst [vmem:[#allocation42_spill] sm:$0xff] %v12407_v15  ;;  %v2368_v39 = vshll.u32 %v7133_v38, 16  ;;  %v3772_v60 = vshll.u32 %v7205_v16, 16  ;;  %v3776_v18 = vshrl.u32 %v7205_v16, 16  ;;  %v2054_v1 = vrot.slane %v2053_v57, 4 }
 0x171   : > { %vm9954_vm6 = vcmp.ne.s16.totalorder %v2049_v40, 0  ;;  %v12410_v56 = vmov 0  ;;  %v12414_v58 = vsel %vm8600_vm10, %v8605_v29, %v12413_v19  ;;  %v12415_v48 = vmov 0  ;;  %v12424_v19 = vld [vmem:[#allocation19_spill] sm:$0xff] }
 0x172   : > { %v12411_v56 = vsel %vm9954_vm6, 4294967295, %v12410_v56  ;;  %vm9963_vm8 = vcmp.ne.s16.totalorder %v12414_v58, 0  ;;  %v2362_v4 = vor.u32 %v2361_v54, %v2358_v24  ;;  %v2367_v3 = vrot.slane %v2365_v22, 3 }
 0x173   : > { %12412 = vst [vmem:[#allocation43_spill] sm:$0xff] %v12411_v56  ;;  %v12416_v48 = vsel %vm9963_vm8, 4294967295, %v12415_v48  ;;  %v2370_v38 = vrot.slane %v2368_v39, 4  ;;  %v2164_v45 = vsel %vm9954_vm6, %v9945_v61, 0  ;;  %v3774_v16 = vrot.slane %v3772_v60, 1 }
 0x174   : > { %12417 = vst [vmem:[#allocation24_spill] sm:$0xff] %v12416_v48  ;;  %v2059_v40 = vsel %vm8428_vm7, %v2054_v1, %v8432_v26  ;;  %vm12419_vm5 = vcmp.ne.s16.totalorder %v12388_v31, 0  ;;  %v3650_v37 = vsel %vm9891_vm11, %v3166_v10, 0  ;;  %vm12420_vm15 = vsmask.f32 4352  ;;  %v12426_v10 = vld [vmem:[#allocation27_spill] sm:$0xff] }
 0x175   : > { %v3649_v57 = vsel %vm12419_vm5, %v3165_v32, 0  ;;  %v2363_v24 = vsel %vm12420_vm15, %v2353_v34, %v2362_v4  ;;  %v2371_v54 = vor.u32 %v2370_v38, %v2367_v3  ;;  %vm9982_vm4 = vcmp.ne.s16.totalorder %v2059_v40, 0  ;;  %v3168_v60 = vld [vmem:[#allocation2 + $0x24] sm:$0xf]  ;;  %v12428_v34 = vld [vmem:[#allocation5_spill] sm:$0xff]  ;;  %v12429_v3 = vld [vmem:[#allocation20_spill] sm:$0xff] }
 0x176   : > { %v12421_v22 = vmov 0  ;;  %v7206_v39 = vcombine.low %v3649_v57, %v3650_v37  ;;  %7718 = vmatprep.mubr.msk.bf16.mxu1 %vm12403_vm2, %v2363_v24  ;;  %vm12425_vm6 = vsmask.f32 7424  ;;  %v2165_v32 = vsel %vm9982_vm4, %v9968_v44, 0  ;;  %v3170_v56 = vld [vmem:[#allocation2 + $0x2c] sm:$0xf] }
 0x177   : > { %v12422_v22 = vsel %vm9982_vm4, 4294967295, %v12421_v22  ;;  %v3775_v1 = vsel %vm12425_vm6, %v12424_v19, %v3774_v16  ;;  %v12427_v58 = vand.u32 15, %v12426_v10  ;;  %v12430_v38 = vrot.slane %v12429_v3, 4  ;;  %v12434_v3 = vld [vmem:[#allocation3_spill] sm:$0xff] }
 0x178   : > { %12423 = vst [vmem:[#allocation44_spill] sm:$0xff] %v12422_v22  ;;  %v2372_v57 = vsel %vm12420_vm15, %v2362_v4, %v2371_v54  ;;  %v3778_v37 = vor.u32 %v3776_v18, %v3774_v16  ;;  %7800 = vmatprep.mubr.msk.bf16.mxu0 %vm12403_vm2, %v3775_v1  ;;  %v7134_v24 = vcombine.low %v2164_v45, %v2165_v32  ;;  %v3780_v19 = vshll.u32 %v7206_v39, 16  ;;  %v3169_v18 = vld [vmem:[#allocation2 + $0x28] sm:$0xf]  ;;  %vm12437_vm15 = vmmov %vm12403_vm2 }
 0x179   : > { %vm1586_vm5 = vcmp.ge.s32.totalorder %v12427_v58, 1  ;;  %v9999_v40 = vsel %vm8600_vm10, %v12430_v38, %v12428_v34  ;;  %v12432_v31 = vmov 0   ;;  %vm12433_vm11 = vcmp.ne.s16.totalorder %v8973_v62, 0 }
 0x17a   : > { %12431 = vst [vmem:[#allocation19_spill] sm:$0xff] %v9999_v40  ;;  %vm1747_vm6 = vmpackc.low %vm1586_vm5, %vm1586_vm5  ;;  %v3651_v10 = vsel %vm12433_vm11, %v3167_v49, 0  ;;  %v3652_v58 = vsel %vm9940_vm1, %v3168_v60, 0  ;;  %v1172_v17 = vadd.s32 240, %v12434_v3  ;;  %v2374_v38 = vshrl.u32 %v7134_v24, 16 }
 0x17b   : > { %v1779_v23 = vsel %vm1747_vm6, 65537, %v12432_v31  ;;  %v2377_v35 = vshll.u32 %v7134_v24, 16  ;;  %v3782_v22 = vrot.slane %v3780_v19, 1  ;;  %v7207_v1 = vcombine.low %v3651_v10, %v3652_v58  ;;  %vm12435_vm5 = vmmov %vm12403_vm2 }
 0x17c   : > { %v2066_v4 = vshll.u32 %v1779_v23, 16  ;;  %v2070_v16 = vshrl.u32 %v1779_v23, 16  ;;  %v3784_v45 = vshrl.u32 %v7206_v39, 16  ;;  %v1388_v32 = vand.u32 15, %v1172_v17  ;;  %7719 = vmatmul.mubr.msk.bf16.gmra.mxu1 %vm12435_vm5, %v2372_v57  ;;  %v10016_v39 = vld [vmem:[#allocation2 + $0x74] sm:$0xf] }
 0x17d   : > { %v2376_v20 = vrot.slane %v2374_v38, 3  ;;  %v2379_v62 = vrot.slane %v2377_v35, 4  ;;  %vm12436_vm11 = vsmask.f32 7424  ;;  %v3788_v51 = vshll.u32 %v7207_v1, 16 }
 0x17e   : > { %v3783_v49 = vsel %vm12436_vm11, %v3778_v37, %v3782_v22  ;;  %v2068_v15 = vrot.slane %v2066_v4, 5  ;;  %v2072_v60 = vrot.slane %v2070_v16, 4  ;;  %vm1588_vm2 = vcmp.ge.s32.totalorder %v1388_v32, 1  ;;  %v10037_v16 = vld [vmem:[#allocation2 + $0x78] sm:$0xf] }
 0x17f   : > { %7801 = vmatmul.mubr.msk.bf16.vlgmr.msra.gmra.mxu0 %vm12437_vm15, %v3783_v49  ;;  %vm12438_vm6 = vcmp.ne.s16.totalorder %v8980_v43, 0  ;;  %v10014_v23 = vor.u32 %v2379_v62, %v2376_v20  ;;  %v3786_v35 = vor.u32 %v3784_v45, %v3782_v22  ;;  %vm1749_vm5 = vmpackc.low %vm1588_vm2, %vm1588_vm2  ;;  %v3654_v57 = vsel %vm9963_vm8, %v3170_v56, 0  ;;  %v12454_v43 = vld [vmem:[#allocation25_spill] sm:$0xff] }
 0x180   : > { %v3653_v24 = vsel %vm12438_vm6, %v3169_v18, 0  ;;  %v2069_v17 = vsel %vm8428_vm7, %v8467_v47, %v2068_v15  ;;  %v2073_v37 = vor.u32 %v2072_v60, %v2068_v15  ;;  %v12439_v19 = vmov 0  ;;  %v10030_v18 = vld [vmem:[#allocation2 + $0x84] sm:$0xf] }
 0x181   : > { %vm10023_vm11 = vcmp.ne.s16.totalorder %v2069_v17, 0  ;;  %v3790_v10 = vrot.slane %v3788_v51, 1  ;;  %v1781_v62 = vsel %vm1749_vm5, 65537, %v12432_v31  ;;  %vm12442_vm15 = vsmask.f32 4352 }
 0x182   : > { %v12440_v19 = vsel %vm10023_vm11, 4294967295, %v12439_v19  ;;  %v2381_v20 = vsel %vm12442_vm15, %v2371_v54, %v10014_v23  ;;  %v2086_v58 = vshll.u32 %v1781_v62, 16  ;;  %v2090_v38 = vshrl.u32 %v1781_v62, 16 }
 0x183   : > { %12441 = vst [vmem:[#allocation27_spill] sm:$0xff] %v12440_v19  ;;  %v3792_v4 = vshrl.u32 %v7207_v1, 16  ;;  %vm12443_vm2 = vcmask 31744   ;;  %v2074_v22 = vrot.slane %v2073_v37, 4  ;;  %v2166_v15 = vsel %vm10023_vm11, %v10016_v39, 0  ;;  %v12446_v1 = vld [vmem:[#allocation21_spill] sm:$0xff] }
 0x184   : > { %7722 = vmatprep.mubr.msk.bf16.mxu1 %vm12443_vm2, %v2381_v20  ;;  %vm12444_vm6 = vsmask.f32 7424  ;;  %v7208_v51 = vcombine.low %v3653_v24, %v3654_v57  ;;  %vm12445_vm5 = vmmov %vm12443_vm2  ;;  %v2088_v54 = vrot.slane %v2086_v58, 5  ;;  %v2092_v45 = vrot.slane %v2090_v38, 4  ;;  %v10052_v57 = vld [vmem:[#allocation2 + $0x7c] sm:$0xf] }
 0x185   : > { %v3791_v56 = vsel %vm12444_vm6, %v3786_v35, %v3790_v10  ;;  %vm12023_vm15 = vcmp.ne.s16.totalorder %v8467_v47, 0  ;;  %v3427_v32 = vshll.u32 %v12446_v1, 16  ;;  %v2079_v49 = vsel %vm8428_vm7, %v2074_v22, %v8432_v26 }
 0x186   : > { %7804 = vmatprep.mubr.msk.bf16.mxu0 %vm12445_vm5, %v3791_v56  ;;  %v3794_v60 = vor.u32 %v3792_v4, %v3790_v10  ;;  %v3796_v17 = vshll.u32 %v7208_v51, 16  ;;  %v2170_v24 = vsel %vm12023_vm15, %v10030_v18, 0  ;;  %vm10048_vm2 = vcmp.ne.s16.totalorder %v2079_v49, 0  ;;  %v12453_v4 = vld [vmem:[#allocation28_spill] sm:$0xff]  ;;  %v3171_v49 = vld [vmem:[#allocation2 + $0x30] sm:$0xf] }
 0x187   : > { %v12447_v35 = vmov 0  ;;  %v2089_v37 = vsel %vm8428_vm7, %v8467_v47, %v2088_v54  ;;  %v2093_v62 = vor.u32 %v2092_v45, %v2088_v54  ;;  %v7137_v20 = vcombine.low %v2170_v24, %v2170_v24  ;;  %v10067_v54 = vld [vmem:[#allocation2 + $0x80] sm:$0xf]  ;;  %v3172_v47 = vld [vmem:[#allocation2 + $0x34] sm:$0xf] }
 0x188   : > { %v12448_v35 = vsel %vm10048_vm2, 4294967295, %v12447_v35  ;;  %v2167_v10 = vsel %vm10048_vm2, %v10037_v16, 0  ;;  %vm10060_vm6 = vcmp.ne.s16.totalorder %v2089_v37, 0  ;;  %v12450_v58 = vmov 0 }
 0x189   : > { %12449 = vst [vmem:[#allocation5_spill] sm:$0xff] %v12448_v35  ;;  %v12451_v58 = vsel %vm10060_vm6, 4294967295, %v12450_v58  ;;  %v3798_v38 = vrot.slane %v3796_v17, 1  ;;  %v3429_v22 = vor.u32 %v3427_v32, %v12453_v4  ;;  %v7135_v56 = vcombine.low %v2166_v15, %v2167_v10 }
 0x18a   : > { %12452 = vst [vmem:[#allocation20_spill] sm:$0xff] %v12451_v58  ;;  %v2094_v1 = vrot.slane %v2093_v62, 4  ;;  %v1269_v48 = vand.u32 15, %v12454_v43  ;;  %v2168_v45 = vsel %vm10060_vm6, %v10052_v57, 0  ;;  %vm12455_vm15 = vsmask.f32 7424 }
 0x18b   : > { %v3799_v24 = vsel %vm12455_vm15, %v3794_v60, %v3798_v38  ;;  %v2401_v37 = vshrl.u32 %v7137_v20, 16  ;;  %v3430_v15 = vsel %vm8600_vm10, %v8605_v29, %v3429_v22  ;;  %v2383_v32 = vshrl.u32 %v7135_v56, 16 }
 0x18c   : > { %v2386_v17 = vshll.u32 %v7135_v56, 16  ;;  %v2099_v43 = vsel %vm8428_vm7, %v2094_v1, %v8432_v26  ;;  %7805 = vmatmul.mubr.msk.bf16.gmra.mxu0 %vm12445_vm5, %v3799_v24  ;;  %v2404_v62 = vshll.u32 %v7137_v20, 16  ;;  %v12456_v10 = vmov 0 }
 0x18d   : > { %vm10080_vm8 = vcmp.ne.s16.totalorder %v2099_v43, 0  ;;  %vm10084_vm15 = vcmp.ne.s16.totalorder %v3430_v15, 0  ;;  %v12459_v60 = vmov 0  ;;  %vm12462_vm1 = vcmp.ne.s16.totalorder %v9999_v40, 0 }
 0x18e   : > { %v12457_v10 = vsel %vm10080_vm8, 4294967295, %v12456_v10  ;;  %v12460_v60 = vsel %vm10084_vm15, 4294967295, %v12459_v60  ;;  %v3655_v22 = vsel %vm12462_vm1, %v3171_v49, 0  ;;  %v2385_v58 = vrot.slane %v2383_v32, 3 }
 0x18f   : > { %12458 = vst [vmem:[#allocation3_spill] sm:$0xff] %v12457_v10  ;;  %12461 = vst [vmem:[#allocation21_spill] sm:$0xff] %v12460_v60  ;;  %v2388_v56 = vrot.slane %v2386_v17, 4  ;;  %v2169_v25 = vsel %vm10080_vm8, %v10067_v54, 0  ;;  %v3656_v26 = vsel %vm10084_vm15, %v3172_v47, 0  ;;  %v2403_v1 = vrot.slane %v2401_v37, 3 }
 0x190   : > { %v7136_v20 = vcombine.low %v2168_v45, %v2169_v25  ;;  %v7209_v24 = vcombine.low %v3655_v22, %v3656_v26  ;;  %v3800_v43 = vshrl.u32 %v7208_v51, 16  ;;  %v2406_v35 = vrot.slane %v2404_v62, 4  ;;  %v3173_v37 = vld [vmem:[#allocation2 + $0x38] sm:$0xf]  ;;  %v8105_v25 = vld [vmem:[#allocation2 + $0x8] sm:$0xf] }
 0x191   : > { %v2389_v15 = vor.u32 %v2388_v56, %v2385_v58  ;;  %vm1603_vm7 = vcmp.le.s32.totalorder %v1269_v48, 14  ;;  %v3431_v19 = vrot.slane %v12453_v4, 4  ;;  %vm12463_vm5 = vsmask.f32 4352 }
 0x192   : > { %v2392_v40 = vshrl.u32 %v7136_v20, 16  ;;  %v2395_v49 = vshll.u32 %v7136_v20, 16  ;;  %v3802_v32 = vor.u32 %v3800_v43, %v3798_v38  ;;  %v3804_v17 = vshll.u32 %v7209_v24, 16  ;;  %vm3271_vm1 = vmpackc.low %vm1603_vm7, %vm1603_vm7 }
 0x193   : > { %v2390_v10 = vsel %vm12463_vm5, %v10014_v23, %v2389_v15  ;;  %v3303_v60 = vsel %vm3271_vm1, 65537, %v12432_v31  ;;  %v10102_v47 = vsel %vm8600_vm10, %v3431_v19, %v12428_v34  ;;  %v1157_v51 = vadd.s32 120, %v12434_v3  ;;  %v8106_v19 = vld [vmem:[#allocation2 + $0xc] sm:$0xf] }
 0x194   : > { %12464 = vst [vmem:[#allocation28_spill] sm:$0xff] %v10102_v47  ;;  %vm12465_vm15 = vcmask 31744   ;;  %v2394_v48 = vrot.slane %v2392_v40, 3  ;;  %v2397_v58 = vrot.slane %v2395_v49, 4  ;;  %v3806_v4 = vrot.slane %v3804_v17, 1 }
 0x195   : > { %7723 = vmatmul.mubr.msk.bf16.gmra.mxu1 %vm12465_vm15, %v2390_v10  ;;  %v3442_v38 = vshrl.u32 %v3303_v60, 16  ;;  %v2407_v45 = vor.u32 %v2406_v35, %v2403_v1  ;;  %v3445_v62 = vshll.u32 %v3303_v60, 16  ;;  %v1283_v23 = vand.u32 15, %v1157_v51  ;;  %v10111_v40 = vld [vmem:[%s11886_s5 + $0xe] sm:$0x3] }
 0x196   : > { %v2398_v22 = vor.u32 %v2397_v58, %v2394_v48  ;;  %vm12466_vm1 = vsmask.f32 7424  ;;  %v7171_v26 = vcombine.low %v8105_v25, %v8106_v19  ;;  %v3808_v35 = vshrl.u32 %v7209_v24, 16  ;;  %v8107_v60 = vld [vmem:[%s11886_s5 + $0xa] sm:$0x3] }
 0x197   : > { %v3807_v56 = vsel %vm12466_vm1, %v3802_v32, %v3806_v4  ;;  %v3444_v20 = vrot.slane %v3442_v38, 7  ;;  %vm1605_vm5 = vcmp.le.s32.totalorder %v1283_v23, 14  ;;  %vm12467_vm8 = vcmask 1041408   ;;  %v3174_v24 = vld [vmem:[#allocation2 + $0x3c] sm:$0xf] }
 0x198   : > { %7808 = vmatprep.mubr.msk.bf16.mxu0 %vm12465_vm15, %v3807_v56  ;;  %v10116_v10 = vsel %vm12467_vm8, %v9392_v6, 0  ;;  %vm12468_vm1 = vmmov %vm12467_vm8  ;;  %vm12469_vm7 = vsmask.f32 4352  ;;  %vm12470_vm6 = vcmp.ne.s16.totalorder %v10102_v47, 0  ;;  %v3810_v6 = vor.u32 %v3808_v35, %v3806_v4  ;;  %v3175_v56 = vld [vmem:[#allocation2 + $0x40] sm:$0xf] }
 0x199   : > { %v4818_v1 = vsel %vm12468_vm1, %v8107_v60, 0  ;;  %v2399_v43 = vsel %vm12469_vm7, %v2389_v15, %v2398_v22  ;;  %v3447_v49 = vor.u32 %v3445_v62, %v3444_v20  ;;  %v3657_v32 = vsel %vm12470_vm6, %v3173_v37, 0  ;;  %vm3273_vm2 = vmpackc.low %vm1605_vm5, %vm1605_vm5  ;;  %v8108_v60 = vld [vmem:[#allocation2 + $0x18] sm:$0xf] }
 0x19a   : > { %v3449_v17 = vrot.slane %v3444_v20, 4  ;;  %7867 = vmatpush3.bf16.msra.mxu0 %v4818_v1  ;;  %7726 = vmatprep.mubr.msk.bf16.mxu1 %vm12465_vm15, %v2399_v43  ;;  %v3305_v51 = vsel %vm3273_vm2, 65537, %v12432_v31  ;;  %v1159_v48 = vadd.s32 136, %v12434_v3  ;;  %v1161_v58 = vadd.s32 152, %v12434_v3  ;;  %vm12471_vm8 = vmmov %vm12468_vm1 }
 0x19b   : > { %8047 = vmatprep.subr.msk.bf16.mxu0 %vm12471_vm8, %v10111_v40  ;;  %v3448_v15 = vsel %vm8600_vm10, %v8605_v29, %v3447_v49  ;;  %v3460_v37 = vshrl.u32 %v3305_v51, 16  ;;  %v3463_v4 = vshll.u32 %v3305_v51, 16  ;;  %vm12473_vm6 = vmmov %vm12469_vm7  ;;  %v12474_v23 = vmov 0  ;;  %v10157_v51 = vld [vmem:[#allocation2 + $0x20] sm:$0xf] }
 0x19c   : > { %v10137_v38 = vsel %vm8600_vm10, %v3449_v17, %v12428_v34  ;;  %v2408_v62 = vsel %vm12473_vm6, %v2398_v22, %v2407_v45  ;;  %vm10140_vm2 = vcmp.ne.s16.totalorder %v3448_v15, 0  ;;  %v1297_v25 = vand.u32 15, %v1159_v48  ;;  %vm12477_vm7 = vmmov %vm12465_vm15  ;;  %v3177_v22 = vld [vmem:[#allocation2 + $0x48] sm:$0xf] }
 0x19d   : > { %12472 = vst [vmem:[#allocation25_spill] sm:$0xff] %v10137_v38  ;;  %v12475_v23 = vsel %vm10140_vm2, 4294967295, %v12474_v23  ;;  %v1311_v19 = vand.u32 15, %v1161_v58  ;;  %7727 = vmatmul.mubr.msk.bf16.gmra.mxu1 %vm12477_vm7, %v2408_v62  ;;  %v3658_v20 = vsel %vm10140_vm2, %v3174_v24, 0  ;;  %v3462_v35 = vrot.slane %v3460_v37, 7  ;;  %vm12478_vm1 = vmmov %vm12477_vm7 }
 0x19e   : > { %12476 = vst [vmem:[#allocation45_spill] sm:$0xff] %v12475_v23  ;;  %vm12058_vm5 = vcmp.ne.s16.totalorder %v10137_v38, 0  ;;  %v7173_v1 = vcombine.low %v8108_v60, %v9323_v52  ;;  %7766 = vmatprep.mubr.msk.bf16.mxu1 %vm12478_vm1, %v7171_v26  ;;  %v7210_v45 = vcombine.low %v3657_v32, %v3658_v20  ;;  %vm1607_vm15 = vcmp.le.s32.totalorder %v1297_v25, 14  ;;  %v3176_v32 = vld [vmem:[#allocation2 + $0x44] sm:$0xf]  ;;  %v12487_v52 = vld [vmem:[#allocation30_spill] sm:$0xff] }
 0x19f   : > { %vm10150_vm8 = vcmp.le.s32.totalorder %v1311_v19, 14  ;;  %v1163_v43 = vadd.s32 168, %v12434_v3  ;;  %v3465_v49 = vor.u32 %v3463_v4, %v3462_v35  ;;  %v3659_v17 = vsel %vm12058_vm5, %v3175_v56, 0  ;;  %vm3275_vm6 = vmpackc.low %vm1607_vm15, %vm1607_vm15  ;;  %v10188_v58 = vld [vmem:[%s11886_s5 + $0xc] sm:$0x3]  ;;  %v12488_v38 = vld [vmem:[#allocation31_spill] sm:$0xff] }
 0x1a0   : > { %v3467_v24 = vrot.slane %v3462_v35, 4  ;;  %v3812_v26 = vshll.u32 %v7210_v45, 16  ;;  %v3307_v48 = vsel %vm3275_vm6, 65537, %v12432_v31  ;;  %vm3277_vm7 = vmpackc.low %vm10150_vm8, %vm10150_vm8  ;;  %v12482_v19 = vmov 0 }
 0x1a1   : > { %v1325_v15 = vand.u32 15, %v1163_v43  ;;  %v3466_v37 = vsel %vm8600_vm10, %v8605_v29, %v3465_v49  ;;  %v3478_v62 = vshrl.u32 %v3307_v48, 16  ;;  %v3481_v56 = vshll.u32 %v3307_v48, 16 }
 0x1a2   : > { %v10173_v4 = vsel %vm8600_vm10, %v3467_v24, %v12428_v34  ;;  %v3814_v25 = vrot.slane %v3812_v26, 1  ;;  %vm10175_vm1 = vcmp.ne.s16.totalorder %v3466_v37, 0  ;;  %v3309_v20 = vsel %vm3277_vm7, 65537, %v12432_v31 }
 0x1a3   : > { %12481 = vst [vmem:[#allocation46_spill] sm:$0xff] %v10173_v4  ;;  %v12483_v19 = vsel %vm10175_vm1, 4294967295, %v12482_v19  ;;  %v1165_v35 = vadd.s32 184, %v12434_v3  ;;  %v3660_v60 = vsel %vm10175_vm1, %v3176_v32, 0  ;;  %v3480_v43 = vrot.slane %v3478_v62, 7 }
 0x1a4   : > { %12484 = vst [vmem:[#allocation47_spill] sm:$0xff] %v12483_v19  ;;  %vm12059_vm15 = vcmp.ne.s16.totalorder %v10173_v4, 0  ;;  %v3496_v49 = vshrl.u32 %v3309_v20, 16  ;;  %vm12485_vm8 = vsmask.f32 7424  ;;  %v7211_v48 = vcombine.low %v3659_v17, %v3660_v60 }
 0x1a5   : > { %v3815_v24 = vsel %vm12485_vm8, %v3810_v6, %v3814_v25  ;;  %v3816_v26 = vshrl.u32 %v7210_v45, 16  ;;  %v3499_v37 = vshll.u32 %v3309_v20, 16  ;;  %vm12486_vm6 = vcmask 31744   ;;  %v3179_v19 = vld [vmem:[#allocation2 + $0x50] sm:$0xf] }
 0x1a6   : > { %7809 = vmatmul.mubr.msk.bf16.gmra.mxu0 %vm12486_vm6, %v3815_v24  ;;  %v12489_v32 = vcombine.low %v12487_v52, %v12488_v38  ;;  %vm12490_vm7 = vmmov %vm12486_vm6  ;;  %v3483_v62 = vor.u32 %v3481_v56, %v3480_v43  ;;  %v3485_v47 = vrot.slane %v3480_v43, 4  ;;  %v3498_v23 = vrot.slane %v3496_v49, 7  ;;  %v3178_v17 = vld [vmem:[#allocation2 + $0x4c] sm:$0xf]  ;;  %v5542_v4 = vld [vmem:[#allocation2 + $0x1c] sm:$0xf] }
 0x1a7   : > { %vm1611_vm8 = vcmp.le.s32.totalorder %v1325_v15, 14  ;;  %v3818_v6 = vor.u32 %v3816_v26, %v3814_v25  ;;  %v3820_v45 = vshll.u32 %v7211_v48, 16  ;;  %vm12491_vm5 = vmmov %vm12486_vm6  ;;  %v3661_v20 = vsel %vm12059_vm15, %v3177_v22, 0  ;;  %v3180_v25 = vld [vmem:[#allocation2 + $0x54] sm:$0xf] }
 0x1a8   : > { %7767 = vmatmul.mubr.msk.bf16.vlgmr.msra.gmra.mxu1 %vm12490_vm7, %v12489_v32  ;;  %vm3279_vm6 = vmpackc.low %vm1611_vm8, %vm1611_vm8  ;;  %v1339_v60 = vand.u32 15, %v1165_v35  ;;  %v3484_v38 = vsel %vm8600_vm10, %v8605_v29, %v3483_v62  ;;  %v10205_v52 = vsel %vm8600_vm10, %v3485_v47, %v12428_v34  ;;  %v3501_v15 = vor.u32 %v3499_v37, %v3498_v23  ;;  %v3181_v62 = vld [vmem:[#allocation2 + $0x58] sm:$0xf] }
 0x1a9   : > { %7833 = vmatpush3.bf16.msra.mxu1 %v10116_v10  ;;  %7770 = vmatprep.mubr.msk.bf16.mxu1 %vm12491_vm5, %v7173_v1  ;;  %12492 = vst [vmem:[#allocation30_spill] sm:$0xff] %v10205_v52  ;;  %v3311_v10 = vsel %vm3279_vm6, 65537, %v12432_v31  ;;  %vm12493_vm5 = vcmask 1041408   ;;  %v3822_v1 = vrot.slane %v3820_v45, 1  ;;  %vm10210_vm7 = vcmp.ne.s16.totalorder %v3484_v38, 0 }
 0x1aa   : > { %8046 = vmatprep.subr.msk.bf16.mxu1 %vm12493_vm5, %v10188_v58  ;;  %v12494_v56 = vmov 0  ;;  %vm12060_vm8 = vcmp.ne.s16.totalorder %v10205_v52, 0  ;;  %v3503_v35 = vrot.slane %v3498_v23, 4  ;;  %v3662_v22 = vsel %vm10210_vm7, %v3178_v17, 0 }
 0x1ab   : > { %v12495_v56 = vsel %vm10210_vm7, 4294967295, %v12494_v56  ;;  %v3502_v47 = vsel %vm8600_vm10, %v8605_v29, %v3501_v15  ;;  %v3663_v43 = vsel %vm12060_vm8, %v3179_v19, 0  ;;  %v3514_v49 = vshrl.u32 %v3311_v10, 16 }
 0x1ac   : > { %12496 = vst [vmem:[#allocation31_spill] sm:$0xff] %v12495_v56  ;;  %vm12497_vm6 = vsmask.f32 7424  ;;  %v7212_v26 = vcombine.low %v3661_v20, %v3662_v22  ;;  %v3824_v37 = vshrl.u32 %v7211_v48, 16  ;;  %vm10223_vm5 = vcmp.ne.s16.totalorder %v3502_v47, 0 }
 0x1ad   : > { %v3823_v24 = vsel %vm12497_vm6, %v3818_v6, %v3822_v1  ;;  %v12498_v32 = vmov 0  ;;  %vm12501_vm15 = vcmask 31744   ;;  %v3664_v23 = vsel %vm10223_vm5, %v3180_v25, 0  ;;  %v10594_v56 = vld [vmem:[#allocation2 + $0x20] sm:$0xf] }
 0x1ae   : > { %v12499_v32 = vsel %vm10223_vm5, 4294967295, %v12498_v32  ;;  %7812 = vmatprep.mubr.msk.bf16.mxu0 %vm12501_vm15, %v3823_v24  ;;  %v10233_v45 = vsel %vm8600_vm10, %v3503_v35, %v12428_v34  ;;  %v3516_v19 = vrot.slane %v3514_v49, 7  ;;  %v3517_v17 = vshll.u32 %v3311_v10, 16  ;;  %vm12505_vm5 = vmmov %vm12501_vm15  ;;  %v3182_v10 = vld [vmem:[#allocation2 + $0x5c] sm:$0xf] }
 0x1af   : > { %12500 = vst [vmem:[#allocation48_spill] sm:$0xff] %v12499_v32  ;;  %12502 = vst [vmem:[#allocation49_spill] sm:$0xff] %v10233_v45  ;;  %v3826_v6 = vor.u32 %v3824_v37, %v3822_v1  ;;  %v3828_v20 = vshll.u32 %v7212_v26, 16  ;;  %v7213_v48 = vcombine.low %v3663_v43, %v3664_v23  ;;  %vm12065_vm6 = vcmp.ne.s16.totalorder %v10233_v45, 0  ;;  %v10585_v32 = vld [vmem:[#allocation2 + $0x74] sm:$0xf] }
 0x1b0   : > { %v12503_v38 = vcombine.low %v10157_v51, %v9436_v53  ;;  %v3832_v15 = vshrl.u32 %v7212_v26, 16  ;;  %v3519_v25 = vor.u32 %v3517_v17, %v3516_v19  ;;  %vm1613_vm8 = vcmp.le.s32.totalorder %v1339_v60, 14 }
 0x1b1   : > { %v3521_v22 = vrot.slane %v3516_v19, 4  ;;  %v3830_v47 = vrot.slane %v3828_v20, 1  ;;  %v3836_v24 = vshll.u32 %v7213_v48, 16  ;;  %v12504_v35 = vcombine.low %v9413_v30, %v9502_v21  ;;  %vm3281_vm7 = vmpackc.low %vm1613_vm8, %vm1613_vm8 }
 0x1b2   : > { %7771 = vmatmul.mubr.msk.bf16.gmra.mxu1 %vm12501_vm15, %v12503_v38  ;;  %v3665_v1 = vsel %vm12065_vm6, %v3181_v62, 0  ;;  %v3840_v43 = vshrl.u32 %v7213_v48, 16  ;;  %v3520_v53 = vsel %vm8600_vm10, %v8605_v29, %v3519_v25  ;;  %v3313_v51 = vsel %vm3281_vm7, 65537, %v12432_v31  ;;  %v3183_v62 = vld [vmem:[#allocation2 + $0x60] sm:$0xf] }
 0x1b3   : > { %7774 = vmatprep.mubr.msk.bf16.mxu1 %vm12505_vm5, %v12504_v35  ;;  %v10253_v60 = vsel %vm8600_vm10, %v3521_v22, %v12428_v34  ;;  %v1167_v30 = vadd.s32 200, %v12434_v3  ;;  %vm12507_vm5 = vsmask.f32 7424  ;;  %v3834_v49 = vor.u32 %v3832_v15, %v3830_v47 }
 0x1b4   : > { %12506 = vst [vmem:[#allocation50_spill] sm:$0xff] %v10253_v60  ;;  %v3831_v21 = vsel %vm12507_vm5, %v3826_v6, %v3830_v47  ;;  %v3838_v26 = vrot.slane %v3836_v24, 1  ;;  %vm10257_vm15 = vcmp.ne.s16.totalorder %v3520_v53, 0  ;;  %v12508_v37 = vmov 0  ;;  %vm12512_vm6 = vmmov %vm12507_vm5  ;;  %v8110_v6 = vld [vmem:[#allocation2 + $0x30] sm:$0xf] }
 0x1b5   : > { %v12509_v37 = vsel %vm10257_vm15, 4294967295, %v12508_v37  ;;  %vm12511_vm8 = vcmask 31744   ;;  %v3666_v23 = vsel %vm10257_vm15, %v3182_v10, 0  ;;  %v3532_v19 = vshrl.u32 %v3313_v51, 16 }
 0x1b6   : > { %12510 = vst [vmem:[#allocation51_spill] sm:$0xff] %v12509_v37  ;;  %7813 = vmatmul.mubr.msk.bf16.gmra.mxu0 %vm12511_vm8, %v3831_v21  ;;  %v3535_v17 = vshll.u32 %v3313_v51, 16  ;;  %vm12068_vm7 = vcmp.ne.s16.totalorder %v10253_v60, 0  ;;  %v3839_v20 = vsel %vm12512_vm6, %v3834_v49, %v3838_v26  ;;  %v7214_v48 = vcombine.low %v3665_v1, %v3666_v23  ;;  %vm12513_vm5 = vmmov %vm12511_vm8 }
 0x1b7   : > { %v7176_v38 = vcombine.low %v8110_v6, %v9609_v5  ;;  %v7177_v15 = vcombine.low %v9600_v9, %v9647_v11  ;;  %7816 = vmatprep.mubr.msk.bf16.mxu0 %vm12513_vm5, %v3839_v20  ;;  %v3534_v25 = vrot.slane %v3532_v19, 7  ;;  %v1353_v22 = vand.u32 15, %v1167_v30  ;;  %vm12514_vm6 = vmmov %vm12513_vm5  ;;  %v3184_v30 = vld [vmem:[#allocation2 + $0x64] sm:$0xf]  ;;  %v3185_v20 = vld [vmem:[#allocation2 + $0x68] sm:$0xf] }
 0x1b8   : > { %v7178_v47 = vcombine.low %v9676_v36, %v9701_v46  ;;  %v1169_v24 = vadd.s32 216, %v12434_v3  ;;  %v3842_v35 = vor.u32 %v3840_v43, %v3838_v26  ;;  %v3844_v10 = vshll.u32 %v7214_v48, 16 }
 0x1b9   : > { %v3667_v1 = vsel %vm12068_vm7, %v3183_v62, 0  ;;  %v1171_v53 = vadd.s32 232, %v12434_v3  ;;  %v3537_v5 = vor.u32 %v3535_v17, %v3534_v25  ;;  %vm1615_vm8 = vcmp.le.s32.totalorder %v1353_v22, 14 }
 0x1ba   : > { %7775 = vmatmul.mubr.msk.bf16.gmra.mxu1 %vm12514_vm6, %v7176_v38  ;;  %v3539_v9 = vrot.slane %v3534_v25, 4  ;;  %v1367_v11 = vand.u32 15, %v1169_v24  ;;  %v3846_v51 = vrot.slane %v3844_v10, 1  ;;  %v3848_v21 = vshrl.u32 %v7214_v48, 16  ;;  %vm3283_vm15 = vmpackc.low %vm1615_vm8, %vm1615_vm8  ;;  %v3186_v10 = vld [vmem:[#allocation2 + $0x6c] sm:$0xf] }
 0x1bb   : > { %7778 = vmatprep.mubr.msk.bf16.mxu1 %vm12513_vm5, %v7177_v15  ;;  %v1381_v36 = vand.u32 15, %v1171_v53  ;;  %v1173_v46 = vadd.s32 248, %v12434_v3  ;;  %v3538_v43 = vsel %vm8600_vm10, %v8605_v29, %v3537_v5  ;;  %v3315_v49 = vsel %vm3283_vm15, 65537, %v12432_v31 }
 0x1bc   : > { %v10286_v26 = vsel %vm8600_vm10, %v3539_v9, %v12428_v34  ;;  %vm1617_vm6 = vcmp.le.s32.totalorder %v1367_v11, 14  ;;  %vm12516_vm7 = vsmask.f32 7424  ;;  %vm10289_vm1 = vcmp.ne.s16.totalorder %v3538_v43, 0 }
 0x1bd   : > { %12515 = vst [vmem:[#allocation52_spill] sm:$0xff] %v10286_v26  ;;  %v3847_v23 = vsel %vm12516_vm7, %v3842_v35, %v3846_v51  ;;  %v12517_v62 = vmov 0  ;;  %v3550_v19 = vshrl.u32 %v3315_v49, 16  ;;  %vm3285_vm8 = vmpackc.low %vm1617_vm6, %vm1617_vm6  ;;  %v7179_v3 = vcombine.low %v9694_v59, %v9744_v0 }
 0x1be   : > { %v12518_v62 = vsel %vm10289_vm1, 4294967295, %v12517_v62  ;;  %7817 = vmatmul.mubr.msk.bf16.gmra.mxu0 %vm12513_vm5, %v3847_v23  ;;  %v3668_v17 = vsel %vm10289_vm1, %v3184_v30, 0  ;;  %v3553_v48 = vshll.u32 %v3315_v49, 16  ;;  %vm12071_vm15 = vcmp.ne.s16.totalorder %v10286_v26, 0 }
 0x1bf   : > { %12519 = vst [vmem:[#allocation53_spill] sm:$0xff] %v12518_v62  ;;  %v3317_v6 = vsel %vm3285_vm8, 65537, %v12432_v31  ;;  %v7215_v38 = vcombine.low %v3667_v1, %v3668_v17  ;;  %v3552_v15 = vrot.slane %v3550_v19, 7  ;;  %v7180_v22 = vcombine.low %v9773_v27, %v9834_v50  ;;  %vm12520_vm8 = vmmov %vm12513_vm5  ;;  %v3187_v1 = vld [vmem:[#allocation2 + $0x70] sm:$0xf] }
 0x1c0   : > { %v3568_v25 = vshrl.u32 %v3317_v6, 16  ;;  %v3850_v24 = vor.u32 %v3848_v21, %v3846_v51  ;;  %v3571_v35 = vshll.u32 %v3317_v6, 16  ;;  %vm1619_vm7 = vcmp.le.s32.totalorder %v1381_v36, 14  ;;  %v3188_v17 = vld [vmem:[#allocation2 + $0x74] sm:$0xf] }
 0x1c1   : > { %v1395_v59 = vand.u32 15, %v1173_v46  ;;  %v3852_v0 = vshll.u32 %v7215_v38, 16  ;;  %v3555_v53 = vor.u32 %v3553_v48, %v3552_v15  ;;  %v3669_v5 = vsel %vm12071_vm15, %v3185_v20, 0  ;;  %vm3287_vm6 = vmpackc.low %vm1619_vm7, %vm1619_vm7  ;;  %v3190_v27 = vld [vmem:[#allocation2 + $0x7c] sm:$0xf] }
 0x1c2   : > { %v3557_v9 = vrot.slane %v3552_v15, 4  ;;  %v3856_v11 = vshrl.u32 %v7215_v38, 16  ;;  %7779 = vmatmul.mubr.msk.bf16.gmra.mxu1 %vm12520_vm8, %v7178_v47  ;;  %v3570_v30 = vrot.slane %v3568_v25, 7  ;;  %v3319_v43 = vsel %vm3287_vm6, 65537, %v12432_v31  ;;  %vm12524_vm7 = vmmov %vm12520_vm8 }
 0x1c3   : > { %vm10306_vm5 = vcmp.le.s32.totalorder %v1395_v59, 14  ;;  %v3854_v50 = vrot.slane %v3852_v0, 1  ;;  %v3556_v51 = vsel %vm8600_vm10, %v8605_v29, %v3555_v53  ;;  %7782 = vmatprep.mubr.msk.bf16.mxu1 %vm12524_vm7, %v7179_v3  ;;  %v3586_v47 = vshrl.u32 %v3319_v43, 16 }
 0x1c4   : > { %v10316_v21 = vsel %vm8600_vm10, %v3557_v9, %v12428_v34  ;;  %vm10319_vm8 = vcmp.ne.s16.totalorder %v3556_v51, 0  ;;  %v12525_v36 = vmov 0  ;;  %v3573_v46 = vor.u32 %v3571_v35, %v3570_v30  ;;  %vm3289_vm15 = vmpackc.low %vm10306_vm5, %vm10306_vm5 }
 0x1c5   : > { %12523 = vst [vmem:[#allocation54_spill] sm:$0xff] %v10316_v21  ;;  %v12526_v36 = vsel %vm10319_vm8, 4294967295, %v12525_v36  ;;  %vm12074_vm6 = vcmp.ne.s16.totalorder %v10316_v21, 0  ;;  %v3575_v49 = vrot.slane %v3570_v30, 4  ;;  %vm12528_vm1 = vsmask.f32 7424 }
 0x1c6   : > { %12527 = vst [vmem:[#allocation55_spill] sm:$0xff] %v12526_v36  ;;  %v3855_v23 = vsel %vm12528_vm1, %v3850_v24, %v3854_v50  ;;  %v3670_v19 = vsel %vm10319_vm8, %v3186_v10, 0  ;;  %v3671_v3 = vsel %vm12074_vm6, %v3187_v1, 0  ;;  %v7181_v20 = vcombine.low %v9836_v8, %v9851_v63  ;;  %v3189_v24 = vld [vmem:[#allocation2 + $0x78] sm:$0xf] }
 0x1c7   : > { %7820 = vmatprep.mubr.msk.bf16.mxu0 %vm12524_vm7, %v3855_v23  ;;  %v7216_v48 = vcombine.low %v3669_v5, %v3670_v19  ;;  %v3574_v6 = vsel %vm8600_vm10, %v8605_v29, %v3573_v46  ;;  %v10341_v38 = vsel %vm8600_vm10, %v3575_v49, %v12428_v34  ;;  %v3588_v15 = vrot.slane %v3586_v47, 7  ;;  %v10546_v21 = vld [vmem:[#allocation2 + $0x60] sm:$0xf] }
 0x1c8   : > { %12529 = vst [vmem:[#allocation56_spill] sm:$0xff] %v10341_v38  ;;  %vm10343_vm1 = vcmp.ne.s16.totalorder %v3574_v6, 0  ;;  %v12530_v25 = vmov 0  ;;  %v3589_v35 = vshll.u32 %v3319_v43, 16  ;;  %vm12075_vm5 = vcmp.ne.s16.totalorder %v10341_v38, 0 }
 0x1c9   : > { %v12531_v25 = vsel %vm10343_vm1, 4294967295, %v12530_v25  ;;  %v3321_v8 = vsel %vm3289_vm15, 65537, %v12432_v31  ;;  %v3858_v63 = vor.u32 %v3856_v11, %v3854_v50  ;;  %v3860_v59 = vshll.u32 %v7216_v48, 16  ;;  %vm12534_vm15 = vmmov %vm12524_vm7 }
 0x1ca   : > { %12532 = vst [vmem:[#allocation57_spill] sm:$0xff] %v12531_v25  ;;  %v3672_v0 = vsel %vm10343_vm1, %v3188_v17, 0  ;;  %v3864_v10 = vshrl.u32 %v7216_v48, 16  ;;  %v3591_v5 = vor.u32 %v3589_v35, %v3588_v15  ;;  %v3593_v9 = vrot.slane %v3588_v15, 4  ;;  %7783 = vmatmul.mubr.msk.bf16.gmra.mxu1 %vm12524_vm7, %v7180_v22  ;;  %v3191_v22 = vld [vmem:[#allocation2 + $0x80] sm:$0xf] }
 0x1cb   : > { %v7217_v53 = vcombine.low %v3671_v3, %v3672_v0  ;;  %v3604_v1 = vshrl.u32 %v3321_v8, 16  ;;  %v3862_v30 = vrot.slane %v3860_v59, 1  ;;  %v3673_v51 = vsel %vm12075_vm5, %v3189_v24, 0  ;;  %7786 = vmatprep.mubr.msk.bf16.mxu1 %vm12534_vm15, %v7181_v20  ;;  %v3193_v20 = vld [vmem:[#allocation2 + $0x88] sm:$0x1]  ;;  %vm12539_vm15 = vmmov %vm12524_vm7 }
 0x1cc   : > { %v3607_v43 = vshll.u32 %v3321_v8, 16  ;;  %v3592_v31 = vsel %vm8600_vm10, %v8605_v29, %v3591_v5  ;;  %v10360_v50 = vsel %vm8600_vm10, %v3593_v9, %v12428_v34  ;;  %vm12535_vm6 = vsmask.f32 7424  ;;  %v3192_v35 = vld [vmem:[#allocation2 + $0x84] sm:$0xf] }
 0x1cd   : > { %v3868_v47 = vshll.u32 %v7217_v53, 16  ;;  %v3872_v11 = vshrl.u32 %v7217_v53, 16  ;;  %12533 = vst [vmem:[#allocation58_spill] sm:$0xff] %v10360_v50  ;;  %v3863_v46 = vsel %vm12535_vm6, %v3858_v63, %v3862_v30  ;;  %v3866_v49 = vor.u32 %v3864_v10, %v3862_v30  ;;  %v4140_v5 = vld [vmem:[#allocation2 + $0xc] sm:$0x8] }
 0x1ce   : > { %vm10364_vm5 = vcmp.ne.s16.totalorder %v3592_v31, 0  ;;  %v12536_v23 = vmov 0  ;;  %v3606_v19 = vrot.slane %v3604_v1, 7  ;;  %7821 = vmatmul.mubr.msk.bf16.gmra.mxu0 %vm12524_vm7, %v3863_v46  ;;  %vm12078_vm1 = vcmp.ne.s16.totalorder %v10360_v50, 0  ;;  %v4141_v9 = vld [vmem:[#allocation2 + $0x10] sm:$0xf] }
 0x1cf   : > { %v12537_v23 = vsel %vm10364_vm5, 4294967295, %v12536_v23  ;;  %v3870_v17 = vrot.slane %v3868_v47, 1  ;;  %v3674_v3 = vsel %vm10364_vm5, %v3190_v27, 0  ;;  %v3675_v8 = vsel %vm12078_vm1, %v3191_v22, 0  ;;  %v10396_v47 = vld [vmem:[#allocation2 + $0x18] sm:$0xf] }
 0x1d0   : > { %12538 = vst [vmem:[#allocation59_spill] sm:$0xff] %v12537_v23  ;;  %v7218_v48 = vcombine.low %v3673_v51, %v3674_v3  ;;  %v3609_v6 = vor.u32 %v3607_v43, %v3606_v19  ;;  %v3611_v15 = vrot.slane %v3606_v19, 4  ;;  %v7182_v63 = vcombine.low %v9871_v41, %v9898_v12  ;;  %v4142_v41 = vld [vmem:[#allocation2 + $0x14] sm:$0xf]  ;;  %v12547_v31 = vld [vmem:[#allocation4_spill] sm:$0xff]  ;;  %v12549_v46 = vld [vmem:[#allocation6_spill] sm:$0xff] }
 0x1d1   : > { %v3871_v24 = vsel %vm12535_vm6, %v3866_v49, %v3870_v17  ;;  %v3874_v59 = vor.u32 %v3872_v11, %v3870_v17  ;;  %v12540_v53 = vmov 0  ;;  %v12543_v1 = vmov 0  ;;  %v10402_v22 = vld [vmem:[#allocation2 + $0x20] sm:$0xf]  ;;  %v12551_v3 = vld [vmem:[#allocation8_spill] sm:$0xff] }
 0x1d2   : > { %7824 = vmatprep.mubr.msk.bf16.mxu0 %vm12539_vm15, %v3871_v24  ;;  %v3876_v0 = vshll.u32 %v7218_v48, 16  ;;  %v3610_v10 = vsel %vm8600_vm10, %v8605_v29, %v3609_v6  ;;  %vm10381_vm7 = vcmp.ne.s16.totalorder %v3611_v15, 0  ;;  %v3880_v30 = vshrl.u32 %v7218_v48, 16  ;;  %vm12546_vm10 = vmmov %vm12539_vm15  ;;  %v10411_v15 = vld [vmem:[#allocation2 + $0x24] sm:$0xf]  ;;  %v12554_v24 = vld [vmem:[#allocation26_spill] sm:$0xff] }
 0x1d3   : > { %v12541_v53 = vsel %vm10381_vm7, 4294967295, %v12540_v53  ;;  %vm10385_vm6 = vcmp.ne.s16.totalorder %v3610_v10, 0  ;;  %v3677_v12 = vsel %vm10381_vm7, %v3193_v20, 0  ;;  %7787 = vmatmul.mubr.msk.bf16.gmra.mxu1 %vm12546_vm10, %v7182_v63  ;;  %v7183_v51 = vcombine.low %v9912_v7, %v9945_v61  ;;  %v10409_v20 = vld [vmem:[#allocation2 + $0x1c] sm:$0xf]  ;;  %v12599_v50 = vld [vmem:[#allocation40_spill] sm:$0xff] }
 0x1d4   : > { %12542 = vst [vmem:[#allocation60_spill] sm:$0xff] %v12541_v53  ;;  %v12544_v1 = vsel %vm10385_vm6, 4294967295, %v12543_v1  ;;  %v3878_v27 = vrot.slane %v3876_v0, 1  ;;  %v3676_v28 = vsel %vm10385_vm6, %v3192_v35, 0  ;;  %v7220_v29 = vcombine.low %v3677_v12, %v3677_v12  ;;  %vm12553_vm6 = vmmov %vm12546_vm10  ;;  %v10419_v10 = vld [vmem:[#allocation2 + $0x28] sm:$0xf] }
 0x1d5   : > { %12545 = vst [vmem:[#allocation61_spill] sm:$0xff] %v12544_v1  ;;  %v7219_v43 = vcombine.low %v3675_v8, %v3676_v28  ;;  %vm12548_vm15 = vcmp.ne.s16.totalorder %v12547_v31, 0  ;;  %v4174_v49 = vsel %vm8455_vm12, %v4141_v9, 0  ;;  %vm12550_vm1 = vsmask.f32 7424  ;;  %7790 = vmatprep.mubr.msk.bf16.mxu1 %vm12546_vm10, %v7183_v51  ;;  %v12557_v12 = vld [vmem:[#allocation29_spill] sm:$0xff]  ;;  %v10515_v1 = vpop.f32.mrf.mxu0 }
 0x1d6   : > { %v4173_v11 = vsel %vm12548_vm15, %v4140_v5, 0  ;;  %v3879_v19 = vsel %vm12550_vm1, %v3874_v59, %v3878_v27  ;;  %v3892_v17 = vshll.u32 %v7220_v29, 16  ;;  %vm12552_vm7 = vnez %v12551_v3  ;;  %12612 = vst [vmem:[#allocation8_spill] sm:$0xff] %v10594_v56 }
 0x1d7   : > { %v4175_v48 = vsel %vm12552_vm7, %v4142_v41, 0  ;;  %7825 = vmatmul.mubr.msk.bf16.gmra.mxu0 %vm12553_vm6, %v3879_v19  ;;  %v3882_v7 = vor.u32 %v3880_v30, %v3878_v27  ;;  %v3884_v61 = vshll.u32 %v7219_v43, 16  ;;  %v3888_v6 = vshrl.u32 %v7219_v43, 16  ;;  %v10542_v38 = vpop.f32.mrf.mxu0 }
 0x1d8   : > { %vm12555_vm15 = vnez %v12554_v24  ;;  %v7238_v8 = vcombine.low %v4173_v11, %v4174_v49  ;;  %vm12556_vm1 = vnez %v12231_v33  ;;  %v3894_v5 = vrot.slane %v3892_v17, 1  ;;  %v10438_v17 = vld [vmem:[#allocation2 + $0x30] sm:$0xf] }
 0x1d9   : > { %v4176_v35 = vsel %vm12555_vm15, %v10396_v47, 0  ;;  %v4178_v63 = vsel %vm12556_vm1, %v10402_v22, 0  ;;  %v3886_v59 = vrot.slane %v3884_v61, 1  ;;  %v7184_v30 = vcombine.low %v9968_v44, %v10016_v39 }
 0x1da   : > { %v7239_v0 = vcombine.low %v4175_v48, %v4176_v35  ;;  %vm12558_vm6 = vnez %v12557_v12  ;;  %vm12559_vm10 = vnez %v12235_v13  ;;  %vm12560_vm5 = vsmask.f32 7424 }
 0x1db   : > { %v4177_v27 = vsel %vm12558_vm6, %v10409_v20, 0  ;;  %v4179_v28 = vsel %vm12559_vm10, %v10411_v15, 0  ;;  %v3887_v29 = vsel %vm12560_vm5, %v3882_v7, %v3886_v59  ;;  %v3890_v51 = vor.u32 %v3888_v6, %v3886_v59 }
 0x1dc   : > { %v7240_v43 = vcombine.low %v4177_v27, %v4178_v63  ;;  %v7185_v11 = vcombine.low %v10037_v16, %v10052_v57  ;;  %vm12561_vm8 = vcmask 31744   ;;  %vm12563_vm1 = vnez %v12238_v2  ;;  %v10441_v57 = vld [vmem:[#allocation2 + $0x34] sm:$0xf] }
 0x1dd   : > { %7828 = vmatprep.mubr.msk.bf16.mxu0 %vm12561_vm8, %v3887_v29  ;;  %vm12562_vm2 = vmmov %vm12561_vm8  ;;  %v4180_v44 = vsel %vm12563_vm1, %v10419_v10, 0  ;;  %v4292_v39 = vshrl.u32 %v7238_v8, 16  ;;  %v4295_v49 = vshll.u32 %v7238_v8, 16  ;;  %v4300_v48 = vshrl.u32 %v7239_v0, 16 }
 0x1de   : > { %7791 = vmatmul.mubr.msk.bf16.gmra.mxu1 %vm12562_vm2, %v7184_v30  ;;  %vm12564_vm12 = vmmov %vm12562_vm2  ;;  %v7241_v19 = vcombine.low %v4179_v28, %v4180_v44  ;;  %v4303_v7 = vshll.u32 %v7239_v0, 16  ;;  %v3895_v61 = vsel %vm12560_vm5, %v3890_v51, %v3894_v5  ;;  %v7272_v16 = vcombine.low %v4141_v9, %v4142_v41  ;;  %v10444_v30 = vld [vmem:[#allocation2 + $0x2c] sm:$0xf]  ;;  %v10450_v5 = vld [vmem:[#allocation2 + $0x38] sm:$0xf] }
 0x1df   : > { %7794 = vmatprep.mubr.msk.bf16.mxu1 %vm12564_vm12, %v7185_v11  ;;  %v4294_v6 = vrot.slane %v4292_v39, 3  ;;  %v4297_v35 = vrot.slane %v4295_v49, 4  ;;  %7829 = vmatmul.mubr.msk.bf16.gmra.mxu0 %vm12562_vm2, %v3895_v61  ;;  %v4309_v63 = vshrl.u32 %v7240_v43, 16  ;;  %v4312_v59 = vshll.u32 %v7240_v43, 16  ;;  %vm12565_vm12 = vmmov %vm12562_vm2  ;;  %v10463_v61 = vld [vmem:[#allocation2 + $0x40] sm:$0xf] }
 0x1e0   : > { %v4302_v8 = vrot.slane %v4300_v48, 3  ;;  %v4305_v27 = vrot.slane %v4303_v7, 4  ;;  %7868 = vmatprep.mubr.msk.bf16.mxu0 %vm12565_vm12, %v7272_v16  ;;  %vm12566_vm8 = vnez %v12253_v42  ;;  %vm12567_vm5 = vnez %v12265_v14  ;;  %v12569_v48 = vld [vmem:[#allocation32_spill] sm:$0xff] }
 0x1e1   : > { %v4182_v0 = vsel %vm12566_vm8, %v10438_v17, 0  ;;  %v4183_v9 = vsel %vm12567_vm5, %v10441_v57, 0  ;;  %v4318_v28 = vshrl.u32 %v7241_v19, 16  ;;  %vm12568_vm2 = vnez %v12256_v55 }
 0x1e2   : > { %v4306_v41 = vor.u32 %v4305_v27, %v4302_v8  ;;  %v4181_v29 = vsel %vm12568_vm2, %v10444_v30, 0  ;;  %v7186_v51 = vcombine.low %v10067_v54, %v10030_v18  ;;  %v4298_v43 = vor.u32 %v4297_v35, %v4294_v6  ;;  %v10467_v8 = vld [vmem:[#allocation2 + $0x3c] sm:$0xf] }
 0x1e3   : > { %v4321_v11 = vshll.u32 %v7241_v19, 16  ;;  %v4311_v44 = vrot.slane %v4309_v63, 3  ;;  %v4314_v39 = vrot.slane %v4312_v59, 4  ;;  %v7242_v49 = vcombine.low %v4181_v29, %v4182_v0  ;;  %v10472_v19 = vld [vmem:[#allocation2 + $0x44] sm:$0xf]  ;;  %v12575_v63 = vld [vmem:[#allocation33_spill] sm:$0xff] }
 0x1e4   : > { %vm12570_vm12 = vnez %v12569_v48  ;;  %vm12571_vm5 = vcmask 31744   ;;  %vm12572_vm8 = vsmask.f32 4352  ;;  %v4320_v53 = vrot.slane %v4318_v28, 3  ;;  %v10484_v0 = vld [vmem:[%s11886_s5 + $0x12] sm:$0x3] }
 0x1e5   : > { %v4184_v7 = vsel %vm12570_vm12, %v10450_v5, 0  ;;  %v4307_v16 = vsel %vm12572_vm8, %v4298_v43, %v4306_v41  ;;  %v4323_v18 = vrot.slane %v4321_v11, 4  ;;  %v7273_v54 = vcombine.low %v10396_v47, %v10409_v20  ;;  %vm12573_vm2 = vmmov %vm12571_vm5  ;;  %12576 = vst [vmem:[#allocation4_spill] sm:$0xff] %v10484_v0  ;;  %v12578_v47 = vld [vmem:[#allocation34_spill] sm:$0xff] }
 0x1e6   : > { %7795 = vmatmul.mubr.msk.bf16.gmra.mxu1 %vm12571_vm5, %v7186_v51  ;;  %v7243_v27 = vcombine.low %v4183_v9, %v4184_v7  ;;  %vm12574_vm12 = vcmask 1041408   ;;  %v7274_v35 = vcombine.low %v10402_v22, %v10411_v15  ;;  %v4186_v59 = vsel %vm9509_vm14, %v10463_v61, 0  ;;  %vm12577_vm8 = vmmov %vm12573_vm2  ;;  %v12580_v15 = vld [vmem:[#allocation35_spill] sm:$0xff] }
 0x1e7   : > { %7834 = vmatprep.mubr.msk.bf16.mxu1 %vm12573_vm2, %v4307_v16  ;;  %v5892_v6 = vsel %vm12574_vm12, %v10111_v40, 0  ;;  %7869 = vmatmul.mubr.msk.bf16.vlgmr.msra.gmra.mxu0 %vm12577_vm8, %v7273_v54  ;;  %vm12579_vm5 = vnez %v12578_v47  ;;  %v4315_v9 = vor.u32 %v4314_v39, %v4311_v44  ;;  %v10490_v40 = vld [vmem:[#allocation2 + $0x48] sm:$0xf]  ;;  %v4327_v28 = vshrl.u32 %v7242_v49, 16  ;;  %v10504_v54 = vld [vmem:[#allocation2 + $0x4c] sm:$0xf] }
 0x1e8   : > { %v4185_v20 = vsel %vm12579_vm5, %v10467_v8, 0  ;;  %v4330_v22 = vshll.u32 %v7242_v49, 16  ;;  %7872 = vmatprep.mubr.msk.bf16.mxu0 %vm12573_vm2, %v7274_v35  ;;  %vm12581_vm12 = vnez %v12580_v15  ;;  %v4324_v51 = vor.u32 %v4323_v18, %v4320_v53  ;;  %7935 = vmatpush3.bf16.msra.mxu0 %v5892_v6  ;;  %v12584_v39 = vld [vmem:[#allocation36_spill] sm:$0xff]  ;;  %v10513_v6 = vld [vmem:[#allocation2 + $0x50] sm:$0xf] }
 0x1e9   : > { %v4187_v29 = vsel %vm12581_vm12, %v10472_v19, 0  ;;  %v4336_v43 = vshrl.u32 %v7243_v27, 16  ;;  %v4339_v11 = vshll.u32 %v7243_v27, 16  ;;  %v7244_v7 = vcombine.low %v4185_v20, %v4186_v59  ;;  %v10509_v27 = vld [vmem:[%s11886_s5 + $0x10] sm:$0x3] }
 0x1ea   : > { %vm12582_vm8 = vcmask 1041408   ;;  %vm12585_vm5 = vnez %v12584_v39  ;;  %vm12586_vm2 = vsmask.f32 4352  ;;  %v4329_v53 = vrot.slane %v4327_v28, 3  ;;  %12587 = vst [vmem:[#allocation6_spill] sm:$0xff] %v10509_v27 }
 0x1eb   : > { %8049 = vmatprep.subr.msk.bf16.mxu0 %vm12582_vm8, %v10484_v0  ;;  %vm12583_vm14 = vmmov %vm12582_vm8  ;;  %v4188_v49 = vsel %vm12585_vm5, %v10490_v40, 0  ;;  %v4316_v16 = vsel %vm12586_vm2, %v4306_v41, %v4315_v9  ;;  %v4332_v18 = vrot.slane %v4330_v22, 4  ;;  %vm12588_vm8 = vcmask 31744   ;;  %v10520_v28 = vld [vmem:[#allocation2 + $0x54] sm:$0xf] }
 0x1ec   : > { %v5345_v44 = vsel %vm12583_vm14, %v10188_v58, 0  ;;  %v7245_v35 = vcombine.low %v4187_v29, %v4188_v49  ;;  %vm12589_vm12 = vmmov %vm12586_vm2  ;;  %v4338_v59 = vrot.slane %v4336_v43, 3  ;;  %v4341_v20 = vrot.slane %v4339_v11, 4  ;;  %v10522_v22 = vld [vmem:[#allocation2 + $0x58] sm:$0xf] }
 0x1ed   : > { %v4325_v58 = vsel %vm12589_vm12, %v4315_v9, %v4324_v51  ;;  %v7275_v41 = vcombine.low %v10419_v10, %v10444_v30  ;;  %vm12590_vm14 = vmmov %vm12588_vm8  ;;  %v4345_v29 = vshrl.u32 %v7244_v7, 16  ;;  %v4348_v49 = vshll.u32 %v7244_v7, 16  ;;  %v12591_v43 = vld [vmem:[#allocation38_spill] sm:$0xff]  ;;  %v12594_v30 = vld [vmem:[#allocation37_spill] sm:$0xff] }
 0x1ee   : > { %7835 = vmatmul.mubr.msk.bf16.vlgmr.msra.gmra.mxu1 %vm12588_vm8, %v4316_v16  ;;  %v7276_v9 = vcombine.low %v10438_v17, %v10441_v57  ;;  %vm12592_vm12 = vnez %v12591_v43  ;;  %vm12593_vm2 = vcmask 1041408   ;;  %v4333_v10 = vor.u32 %v4332_v18, %v4329_v53  ;;  %vm12596_vm5 = vmmov %vm12588_vm8  ;;  %v12597_v17 = vld [vmem:[#allocation39_spill] sm:$0xff]  ;;  %v10544_v53 = vld [vmem:[#allocation2 + $0x5c] sm:$0xf] }
 0x1ef   : > { %7901 = vmatpush3.bf16.msra.mxu1 %v5345_v44  ;;  %7838 = vmatprep.mubr.msk.bf16.mxu1 %vm12590_vm14, %v4325_v58  ;;  %v4189_v11 = vsel %vm12592_vm12, %v10504_v54, 0  ;;  %vm12595_vm14 = vnez %v12594_v30  ;;  %v4354_v16 = vshrl.u32 %v7245_v35, 16  ;;  %v4357_v58 = vshll.u32 %v7245_v35, 16  ;;  %v10548_v35 = vld [vmem:[#allocation2 + $0x64] sm:$0xf] }
 0x1f0   : > { %8048 = vmatprep.subr.msk.bf16.mxu1 %vm12593_vm2, %v10509_v27  ;;  %7873 = vmatmul.mubr.msk.bf16.gmra.mxu0 %vm12588_vm8, %v7275_v41  ;;  %v4190_v44 = vsel %vm12595_vm14, %v10513_v6, 0  ;;  %vm12598_vm10 = vnez %v12597_v17  ;;  %v4342_v7 = vor.u32 %v4341_v20, %v4338_v59  ;;  %vm12600_vm12 = vnez %v12599_v50  ;;  %vm12602_vm2 = vmmov %vm12588_vm8  ;;  %v5541_v0 = vld [vmem:[#allocation2 + $0x18] sm:$0xf]  ;;  %v10640_v27 = vld [vmem:[#allocation2 + $0x80] sm:$0xf] }
 0x1f1   : > { %7876 = vmatprep.mubr.msk.bf16.mxu0 %vm12596_vm5, %v7276_v9  ;;  %v4191_v57 = vsel %vm12598_vm10, %v10520_v28, 0  ;;  %v4192_v23 = vsel %vm12600_vm12, %v10522_v22, 0  ;;  %v4347_v18 = vrot.slane %v4345_v29, 3  ;;  %v4350_v41 = vrot.slane %v4348_v49, 4  ;;  %v10550_v9 = vld [vmem:[#allocation2 + $0x68] sm:$0xf]  ;;  %vm12605_vm12 = vmmov %vm12602_vm2 }
 0x1f2   : > { %v7246_v25 = vcombine.low %v4189_v11, %v4190_v44  ;;  %vm12601_vm5 = vsmask.f32 4352  ;;  %v7247_v59 = vcombine.low %v4191_v57, %v4192_v23  ;;  %v4356_v20 = vrot.slane %v4354_v16, 3  ;;  %v10560_v44 = vpop.f32.mrf.mxu0  ;;  %v12606_v23 = vld [vmem:[#allocation14_spill] sm:$0xff]  ;;  %v10576_v57 = vld [vmem:[#allocation2 + $0x6c] sm:$0xf] }
 0x1f3   : > { %v4334_v36 = vsel %vm12601_vm5, %v4324_v51, %v4333_v10  ;;  %v4359_v26 = vrot.slane %v4357_v58, 4  ;;  %v7277_v62 = vcombine.low %v10450_v5, %v10467_v8  ;;  %vm12603_vm8 = vmmov %vm12601_vm5  ;;  %v4193_v11 = vsel %vm9708_vm13, %v10544_v53, 0  ;;  %v12608_v16 = vld [vmem:[#allocation10_spill] sm:$0xff] }
 0x1f4   : > { %v4343_v29 = vsel %vm12603_vm8, %v4333_v10, %v4342_v7  ;;  %v4351_v60 = vor.u32 %v4350_v41, %v4347_v18  ;;  %vm12607_vm5 = vnez %v12606_v23  ;;  %vm12609_vm10 = vnez %v12608_v16  ;;  %v10617_v16 = vld [vmem:[#allocation2 + $0x7c] sm:$0xf] }
 0x1f5   : > { %v4194_v51 = vsel %vm12607_vm5, %v10546_v21, 0  ;;  %v4195_v5 = vsel %vm12609_vm10, %v10548_v35, 0  ;;  %v4196_v8 = vsel %vm9780_vm9, %v10550_v9, 0  ;;  %v7278_v10 = vcombine.low %v10463_v61, %v10472_v19  ;;  %v10587_v19 = vld [vmem:[#allocation2 + $0x78] sm:$0xf] }
 0x1f6   : > { %7839 = vmatmul.mubr.msk.bf16.gmra.mxu1 %vm12602_vm2, %v4334_v36  ;;  %v7279_v58 = vcombine.low %v10490_v40, %v10504_v54  ;;  %v4363_v18 = vshrl.u32 %v7246_v25, 16  ;;  %v4366_v41 = vshll.u32 %v7246_v25, 16  ;;  %v7280_v37 = vcombine.low %v10513_v6, %v10520_v28  ;;  %v12617_v25 = vld [vmem:[#allocation43_spill] sm:$0xff] }
 0x1f7   : > { %7842 = vmatprep.mubr.msk.bf16.mxu1 %vm12605_vm12, %v4343_v29  ;;  %v10578_v29 = vld [vmem:[#allocation2 + $0x70] sm:$0xf]  ;;  %vm12611_vm12 = vmmov %vm12602_vm2  ;;  %v10583_v45 = vor.u32 %v4359_v26, %v4356_v20  ;;  %v4372_v52 = vshrl.u32 %v7247_v59, 16  ;;  %v4375_v61 = vshll.u32 %v7247_v59, 16  ;;  %v7248_v40 = vcombine.low %v4193_v11, %v4194_v51  ;;  %v10596_v26 = vpop.f32.mrf.mxu0  ;;  %v5540_v51 = vld [vmem:[#allocation2 + $0x14] sm:$0x8] }
 0x1f8   : > { %7877 = vmatmul.mubr.msk.bf16.gmra.mxu0 %vm12611_vm12, %v7277_v62  ;;  %v7249_v54 = vcombine.low %v4195_v5, %v4196_v8  ;;  %12613 = vst [vmem:[#allocation26_spill] sm:$0xff] %v10596_v26  ;;  %v4352_v6 = vsel %vm12603_vm8, %v4342_v7, %v4351_v60  ;;  %v4197_v59 = vsel %vm9809_vm3, %v10576_v57, 0  ;;  %v4198_v11 = vsel %vm9825_vm0, %v10578_v29, 0  ;;  %v10607_v62 = vld [vmem:[#allocation2 + $0x24] sm:$0xf] }
 0x1f9   : > { %7880 = vmatprep.mubr.msk.bf16.mxu0 %vm12602_vm2, %v7278_v10  ;;  %12616 = vst [vmem:[#allocation29_spill] sm:$0xff] %v10607_v62  ;;  %v4365_v5 = vrot.slane %v4363_v18, 3  ;;  %v4368_v8 = vrot.slane %v4366_v41, 4  ;;  %vm12618_vm12 = vnez %v12617_v25  ;;  %v4200_v28 = vsel %vm9982_vm4, %v10587_v19, 0  ;;  %vm12620_vm2 = vmmov %vm12603_vm8  ;;  %v10625_v49 = vpop.f32.mrf.mxu0 }
 0x1fa   : > { %v4199_v7 = vsel %vm12618_vm12, %v10585_v32, 0  ;;  %v4361_v20 = vsel %vm12620_vm2, %v4351_v60, %v10583_v45  ;;  %v4374_v36 = vrot.slane %v4372_v52, 3  ;;  %v4377_v10 = vrot.slane %v4375_v61, 4 }
 0x1fb   : > { %v5576_v18 = vsel %vm12555_vm15, %v10594_v56, 0  ;;  %vm12621_vm8 = vcmask 31744   ;;  %v4381_v41 = vshrl.u32 %v7248_v40, 16  ;;  %v4384_v25 = vshll.u32 %v7248_v40, 16  ;;  %v5545_v56 = vld [vmem:[#allocation2 + $0x28] sm:$0xf] }
 0x1fc   : > { %v4390_v23 = vshrl.u32 %v7249_v54, 16  ;;  %vm12622_vm4 = vmmov %vm12621_vm8  ;;  %v7250_v52 = vcombine.low %v4197_v59, %v4198_v11  ;;  %v4393_v61 = vshll.u32 %v7249_v54, 16  ;;  %v5575_v24 = vsel %vm12552_vm7, %v5542_v4, 0  ;;  %v10642_v4 = vld [vmem:[#allocation2 + $0x84] sm:$0xf] }
 0x1fd   : > { %v4201_v40 = vsel %vm10023_vm11, %v10617_v16, 0  ;;  %vm12624_vm15 = vcmp.ne.s16.totalorder %v12547_v31, 0  ;;  %v7340_v59 = vcombine.low %v5575_v24, %v5576_v18  ;;  %v4369_v11 = vor.u32 %v4368_v8, %v4365_v5  ;;  %vm12625_vm7 = vmmov %vm12622_vm4  ;;  %v10669_v24 = vld [vmem:[#allocation2 + $0x8c] sm:$0xf] }
 0x1fe   : > { %7843 = vmatmul.mubr.msk.bf16.gmra.mxu1 %vm12621_vm8, %v4352_v6  ;;  %v4378_v54 = vor.u32 %v4377_v10, %v4374_v36  ;;  %v7251_v60 = vcombine.low %v4199_v7, %v4200_v28  ;;  %v5577_v3 = vsel %vm12558_vm6, %v10607_v62, 0  ;;  %v4383_v26 = vrot.slane %v4381_v41, 3  ;;  %v10652_v36 = vpop.f32.mrf.mxu0 }
 0x1ff   : > { %7846 = vmatprep.mubr.msk.bf16.mxu1 %vm12622_vm4, %v4361_v20  ;;  %v5573_v20 = vsel %vm12624_vm15, %v5540_v51, 0  ;;  %v4386_v6 = vrot.slane %v4384_v25, 4  ;;  %v4392_v31 = vrot.slane %v4390_v23, 3  ;;  %v10648_v51 = vld [vmem:[#allocation2 + $0x88] sm:$0xf]  ;;  %vm12626_vm2 = vnez %v12549_v46  ;;  %12627 = vst [vmem:[#allocation32_spill] sm:$0xff] %v10652_v36 }
 0x200   : > { %7881 = vmatmul.mubr.msk.bf16.gmra.mxu0 %vm12622_vm4, %v7279_v58  ;;  %v5574_v58 = vsel %vm12626_vm2, %v5541_v0, 0  ;;  %v4395_v28 = vrot.slane %v4393_v61, 4  ;;  %v4399_v10 = vshrl.u32 %v7250_v52, 16  ;;  %vm12628_vm8 = vnez %v12231_v33  ;;  %v12630_v25 = vld [vmem:[#allocation5_spill] sm:$0xff]  ;;  %v12632_v0 = vld [vmem:[#allocation20_spill] sm:$0xff]  ;;  %v12634_v61 = vld [vmem:[#allocation3_spill] sm:$0xff] }
 0x201   : > { %7884 = vmatprep.mubr.msk.bf16.mxu0 %vm12625_vm7, %v7280_v37  ;;  %v5578_v5 = vsel %vm12628_vm8, %v5545_v56, 0  ;;  %v7339_v8 = vcombine.low %v5573_v20, %v5574_v58  ;;  %v4402_v12 = vshll.u32 %v7250_v52, 16  ;;  %v5700_v18 = vshrl.u32 %v7340_v59, 16 }
 0x202   : > { %v7341_v7 = vcombine.low %v5577_v3, %v5578_v5  ;;  %v5703_v37 = vshll.u32 %v7340_v59, 16  ;;  %vm12629_vm6 = vsmask.f32 4352  ;;  %vm12631_vm15 = vnez %v12630_v25  ;;  %v10671_v59 = vpop.f32.mrf.mxu0 }
 0x203   : > { %v4370_v23 = vsel %vm12629_vm6, %v10583_v45, %v4369_v11  ;;  %v4202_v46 = vsel %vm12631_vm15, %v10640_v27, 0  ;;  %vm12633_vm4 = vnez %v12632_v0  ;;  %vm12635_vm7 = vnez %v12634_v61  ;;  %vm12637_vm8 = vmmov %vm12629_vm6 }
 0x204   : > { %v4203_v41 = vsel %vm12633_vm4, %v10642_v4, 0  ;;  %v4204_v33 = vsel %vm12635_vm7, %v10648_v51, 0  ;;  %vm12636_vm2 = vcmask 31744   ;;  %v4379_v56 = vsel %vm12637_vm8, %v4369_v11, %v4378_v54  ;;  %v12640_v11 = vld [vmem:[#allocation7_spill] sm:$0xff] }
 0x205   : > { %v4387_v52 = vor.u32 %v4386_v6, %v4383_v26  ;;  %v4408_v45 = vshrl.u32 %v7251_v60, 16  ;;  %v4411_v20 = vshll.u32 %v7251_v60, 16  ;;  %vm12638_vm6 = vmmov %vm12636_vm2  ;;  %v4396_v3 = vor.u32 %v4395_v28, %v4392_v31  ;;  %v5551_v60 = vld [vmem:[#allocation2 + $0x40] sm:$0xf] }
 0x206   : > { %7847 = vmatmul.mubr.msk.bf16.gmra.mxu1 %vm12636_vm2, %v4370_v23  ;;  %v4401_v58 = vrot.slane %v4399_v10, 3  ;;  %v5692_v5 = vshrl.u32 %v7339_v8, 16  ;;  %v5695_v62 = vshll.u32 %v7339_v8, 16  ;;  %v4404_v0 = vrot.slane %v4402_v12, 4  ;;  %v5547_v23 = vld [vmem:[#allocation2 + $0x30] sm:$0xf] }
 0x207   : > { %7850 = vmatprep.mubr.msk.bf16.mxu1 %vm12638_vm6, %v4379_v56  ;;  %v5702_v61 = vrot.slane %v5700_v18, 3  ;;  %v5705_v25 = vrot.slane %v5703_v37, 4  ;;  %v5709_v36 = vshrl.u32 %v7341_v7, 16  ;;  %v12639_v26 = vcombine.low %v10522_v22, %v10544_v53  ;;  %v5546_v10 = vld [vmem:[#allocation2 + $0x2c] sm:$0xf]  ;;  %vm12643_vm6 = vmmov %vm12636_vm2  ;;  %v10689_v37 = vpop.f32.mrf.mxu0 }
 0x208   : > { %v7252_v6 = vcombine.low %v4201_v40, %v4202_v46  ;;  %vm12641_vm8 = vcmp.ne.s16.totalorder %v12640_v11, 0  ;;  %v12642_v8 = vcombine.low %v10546_v21, %v10548_v35  ;;  %v7253_v22 = vcombine.low %v4203_v41, %v4204_v33  ;;  %v5548_v18 = vld [vmem:[#allocation2 + $0x34] sm:$0xf]  ;;  %12644 = vst [vmem:[#allocation33_spill] sm:$0xff] %v10689_v37  ;;  %v5549_v33 = vld [vmem:[#allocation2 + $0x38] sm:$0xf] }
 0x209   : > { %7885 = vmatmul.mubr.msk.bf16.gmra.mxu0 %vm12636_vm2, %v12639_v26  ;;  %v4205_v31 = vsel %vm12641_vm8, %v10669_v24, 0  ;;  %v4410_v53 = vrot.slane %v4408_v45, 3  ;;  %v4413_v12 = vrot.slane %v4411_v20, 4  ;;  %v5712_v40 = vshll.u32 %v7341_v7, 16 }
 0x20a   : > { %7888 = vmatprep.mubr.msk.bf16.mxu0 %vm12643_vm6, %v12642_v8  ;;  %vm12645_vm2 = vsmask.f32 4352  ;;  %v5694_v56 = vrot.slane %v5692_v5, 3  ;;  %v5697_v26 = vrot.slane %v5695_v62, 4  ;;  %v5580_v28 = vsel %vm12563_vm1, %v5547_v23, 0 }
 0x20b   : > { %v4388_v46 = vsel %vm12645_vm2, %v4378_v54, %v4387_v52  ;;  %vm12646_vm8 = vmmov %vm12645_vm2  ;;  %v4405_v21 = vor.u32 %v4404_v0, %v4401_v58  ;;  %v10695_v35 = vor.u32 %v5705_v25, %v5702_v61  ;;  %v5711_v41 = vrot.slane %v5709_v36, 3  ;;  %v5550_v62 = vld [vmem:[#allocation2 + $0x3c] sm:$0xf]  ;;  %v10706_v36 = vpop.f32.mrf.mxu0 }
 0x20c   : > { %v4397_v11 = vsel %vm12646_vm8, %v4387_v52, %v4396_v3  ;;  %v4417_v45 = vshrl.u32 %v7252_v6, 16  ;;  %v4420_v7 = vshll.u32 %v7252_v6, 16  ;;  %vm12647_vm6 = vnez %v12235_v13 }
 0x20d   : > { %v5579_v20 = vsel %vm12647_vm6, %v5546_v10, 0  ;;  %vm12648_vm2 = vnez %v12256_v55  ;;  %vm12649_vm7 = vcmask 31744   ;;  %v10702_v2 = vor.u32 %v4413_v12, %v4410_v53  ;;  %v5014_v10 = vld [vmem:[#allocation2 + $0x14] sm:$0xf]  ;;  %v5013_v12 = vld [vmem:[#allocation2 + $0x10] sm:$0xf] }
 0x20e   : > { %v5581_v54 = vsel %vm12648_vm2, %v5548_v18, 0  ;;  %7851 = vmatmul.mubr.msk.bf16.gmra.mxu1 %vm12649_vm7, %v4388_v46  ;;  %v5714_v5 = vrot.slane %v5712_v40, 4  ;;  %v7342_v52 = vcombine.low %v5579_v20, %v5580_v28  ;;  %vm12650_vm1 = vnez %v12569_v48  ;;  %vm12651_vm8 = vmmov %vm12649_vm7  ;;  %v5016_v48 = vld [vmem:[#allocation2 + $0x1c] sm:$0xf]  ;;  %v5015_v40 = vld [vmem:[#allocation2 + $0x18] sm:$0xf] }
 0x20f   : > { %v5584_v25 = vsel %vm12650_vm1, %v5551_v60, 0  ;;  %7854 = vmatprep.mubr.msk.bf16.mxu1 %vm12651_vm8, %v4397_v11  ;;  %v5698_v0 = vor.u32 %v5697_v26, %v5694_v56  ;;  %v4426_v13 = vshrl.u32 %v7253_v22, 16  ;;  %v4429_v61 = vshll.u32 %v7253_v22, 16  ;;  %vm12656_vm1 = vmmov %vm12651_vm8  ;;  %v10722_v22 = vpop.f32.mrf.mxu0  ;;  %v12660_v56 = vld [vmem:[#allocation9_spill] sm:$0xff] }
 0x210   : > { %vm12652_vm6 = vnez %v12253_v42  ;;  %v7254_v58 = vcombine.low %v4205_v31, %v4205_v31  ;;  %vm12653_vm2 = vsmask.f32 4352  ;;  %vm12654_vm7 = vnez %v12265_v14 }
 0x211   : > { %v5582_v55 = vsel %vm12652_vm6, %v5549_v33, 0  ;;  %v4406_v23 = vsel %vm12653_vm2, %v4396_v3, %v4405_v21  ;;  %v5583_v28 = vsel %vm12654_vm7, %v5550_v62, 0  ;;  %v12655_v60 = vcombine.low %v10550_v9, %v10576_v57  ;;  %vm12657_vm8 = vmmov %vm12653_vm2  ;;  %v12662_v33 = vld [vmem:[#allocation13_spill] sm:$0xff] }
 0x212   : > { %v7343_v6 = vcombine.low %v5581_v54, %v5582_v55  ;;  %v10720_v11 = vsel %vm12657_vm8, %v5698_v0, %v10695_v35  ;;  %v4419_v42 = vrot.slane %v4417_v45, 3  ;;  %v4422_v8 = vrot.slane %v4420_v7, 4  ;;  %vm12659_vm6 = vmmov %vm12656_vm1  ;;  %v5552_v54 = vld [vmem:[#allocation2 + $0x44] sm:$0xf]  ;;  %v10740_v0 = vpop.f32.mrf.mxu0 }
 0x213   : > { %7889 = vmatmul.mubr.msk.bf16.gmra.mxu0 %vm12656_vm1, %v12655_v60  ;;  %v7344_v31 = vcombine.low %v5583_v28, %v5584_v25  ;;  %v12658_v14 = vcombine.low %v10578_v29, %v10585_v32  ;;  %v4415_v3 = vsel %vm12653_vm2, %v4405_v21, %v10702_v2  ;;  %v10730_v9 = vor.u32 %v5714_v5, %v5711_v41  ;;  %v12665_v5 = vld [vmem:[#allocation12_spill] sm:$0xff]  ;;  %v7700_v25 = vpop.f32.mrf.mxu1  ;;  %v5017_v28 = vld [vmem:[#allocation2 + $0x20] sm:$0xf] }
 0x214   : > { %v5718_v57 = vshrl.u32 %v7342_v52, 16  ;;  %v5721_v53 = vshll.u32 %v7342_v52, 16  ;;  %v4428_v18 = vrot.slane %v4426_v13, 3  ;;  %v4431_v46 = vrot.slane %v4429_v61, 4 }
 0x215   : > { %7892 = vmatprep.mubr.msk.bf16.mxu0 %vm12659_vm6, %v12658_v14  ;;  %vm12661_vm7 = vnez %v12660_v56  ;;  %vm12663_vm1 = vnez %v12662_v33  ;;  %v5727_v32 = vshrl.u32 %v7343_v6, 16  ;;  %v5730_v29 = vshll.u32 %v7343_v6, 16 }
 0x216   : > { %v5047_v26 = vsel %vm12661_vm7, %v5014_v10, 0  ;;  %v5049_v45 = vsel %vm12663_vm1, %v5016_v48, 0  ;;  %v4435_v7 = vshrl.u32 %v7254_v58, 16  ;;  %v4438_v20 = vshll.u32 %v7254_v58, 16  ;;  %v5553_v58 = vld [vmem:[#allocation2 + $0x48] sm:$0xf] }
 0x217   : > { %v4423_v21 = vor.u32 %v4422_v8, %v4419_v42  ;;  %v5736_v41 = vshrl.u32 %v7344_v31, 16  ;;  %vm12664_vm8 = vcmp.ne.s16.totalorder %v12428_v34, 0  ;;  %vm12666_vm6 = vcmp.ne.s16.totalorder %v12665_v5, 0  ;;  %v5018_v10 = vld [vmem:[#allocation2 + $0x24] sm:$0xf] }
 0x218   : > { %v5046_v62 = vsel %vm12664_vm8, %v5013_v12, 0  ;;  %v5048_v52 = vsel %vm12666_vm6, %v5015_v40, 0  ;;  %vm12667_vm2 = vcmask 31744   ;;  %v5739_v13 = vshll.u32 %v7344_v31, 16  ;;  %v2496_v31 = vpop.f32.mrf.mxu1 }
 0x219   : > { %7855 = vmatmul.mubr.msk.bf16.gmra.mxu1 %vm12667_vm2, %v4406_v23  ;;  %v10743_v61 = vcombine.low %v5046_v62, %v5047_v26  ;;  %v10745_v55 = vcombine.low %v5048_v52, %v5049_v45  ;;  %v10748_v6 = vadd.f32 %v10515_v1, %v7700_v25  ;;  %vm12669_vm8 = vmmov %vm12667_vm2  ;;  %v5720_v48 = vrot.slane %v5718_v57, 3  ;;  %v5554_v23 = vld [vmem:[#allocation2 + $0x4c] sm:$0xf]  ;;  %v5555_v45 = vld [vmem:[#allocation2 + $0x50] sm:$0xf] }
 0x21a   : > { %7858 = vmatprep.mubr.msk.bf16.mxu1 %vm12669_vm8, %v4415_v3  ;;  %v5723_v60 = vrot.slane %v5721_v53, 4  ;;  %v4432_v42 = vor.u32 %v4431_v46, %v4428_v18  ;;  %vm12670_vm6 = vnez %v12578_v47  ;;  %v5729_v14 = vrot.slane %v5727_v32, 3  ;;  %v12673_v57 = vld [vmem:[#allocation17_spill] sm:$0xff]  ;;  %v7701_v18 = vpop.f32.mrf.mxu1  ;;  %v10764_v46 = vpop.f32.mrf.mxu0 }
 0x21b   : > { %12668 = vst [vmem:[#allocation34_spill] sm:$0xff] %v10748_v6  ;;  %v5585_v8 = vsel %vm12670_vm6, %v5552_v54, 0  ;;  %v5732_v12 = vrot.slane %v5730_v29, 4  ;;  %v4437_v40 = vrot.slane %v4435_v7, 3  ;;  %v4440_v26 = vrot.slane %v4438_v20, 4  ;;  %vm12677_vm6 = vmmov %vm12667_vm2  ;;  %v12678_v20 = vld [vmem:[#allocation18_spill] sm:$0xff] }
 0x21c   : > { %v12671_v1 = vcombine.low %v10587_v19, %v10617_v16  ;;  %v5738_v62 = vrot.slane %v5736_v41, 3  ;;  %vm12672_vm8 = vnez %v12575_v63  ;;  %vm12674_vm1 = vnez %v12673_v57  ;;  %v5020_v7 = vld [vmem:[#allocation2 + $0x2c] sm:$0xf] }
 0x21d   : > { %v5586_v3 = vsel %vm12672_vm8, %v5553_v58, 0  ;;  %v5051_v47 = vsel %vm12674_vm1, %v5018_v10, 0  ;;  %v10762_v53 = vadd.f32 %v10542_v38, %v2496_v31  ;;  %v12676_v32 = vcombine.low %v10640_v27, %v10642_v4  ;;  %v5019_v58 = vld [vmem:[#allocation2 + $0x28] sm:$0xf]  ;;  %v12686_v10 = vld [vmem:[#allocation42_spill] sm:$0xff] }
 0x21e   : > { %7893 = vmatmul.mubr.msk.bf16.gmra.mxu0 %vm12667_vm2, %v12671_v1  ;;  %v5741_v16 = vrot.slane %v5739_v13, 4  ;;  %v5167_v19 = vshll.u32 %v10743_v61, 16  ;;  %v5172_v63 = vshll.u32 %v10745_v55, 16  ;;  %v7345_v29 = vcombine.low %v5585_v8, %v5586_v3  ;;  %v10793_v8 = vpop.f32.mrf.mxu0  ;;  %v5557_v31 = vld [vmem:[#allocation2 + $0x58] sm:$0xf] }
 0x21f   : > { %12675 = vst [vmem:[#allocation35_spill] sm:$0xff] %v10762_v53  ;;  %7896 = vmatprep.mubr.msk.bf16.mxu0 %vm12677_vm6, %v12676_v32  ;;  %vm12679_vm2 = vcmp.ne.s16.totalorder %v12678_v20, 0  ;;  %vm12680_vm8 = vnez %v12580_v15  ;;  %vm12681_vm1 = vnez %v12584_v39  ;;  %v10779_v27 = vadd.f32 %v10560_v44, %v7701_v18  ;;  %v5031_v53 = vld [vmem:[#allocation2 + $0x58] sm:$0xf] }
 0x220   : > { %v5050_v54 = vsel %vm12679_vm2, %v5017_v28, 0  ;;  %v5587_v38 = vsel %vm12680_vm8, %v5554_v23, 0  ;;  %v5588_v41 = vsel %vm12681_vm1, %v5555_v45, 0  ;;  %vm12683_vm6 = vsmask.f32 4352  ;;  %v10811_v18 = vpop.f32.mrf.mxu0 }
 0x221   : > { %12682 = vst [vmem:[#allocation36_spill] sm:$0xff] %v10779_v27  ;;  %v10784_v4 = vsel %vm12683_vm6, %v10695_v35, %v10730_v9  ;;  %vm12684_vm7 = vmmov %vm12683_vm6  ;;  %v5724_v25 = vor.u32 %v5723_v60, %v5720_v48  ;;  %v10788_v13 = vcombine.low %v5050_v54, %v5051_v47  ;;  %v5733_v28 = vor.u32 %v5732_v12, %v5729_v14  ;;  %v5556_v23 = vld [vmem:[#allocation2 + $0x54] sm:$0xf]  ;;  %v10805_v47 = vpop.f32.mrf.mxu1  ;;  %v5558_v54 = vld [vmem:[#allocation2 + $0x5c] sm:$0xf] }
 0x222   : > { %v4424_v52 = vsel %vm12684_vm7, %v10702_v2, %v4423_v21  ;;  %vm12685_vm2 = vmmov %vm12683_vm6  ;;  %v4441_v39 = vor.u32 %v4440_v26, %v4437_v40  ;;  %vm12687_vm1 = vnez %v12686_v10  ;;  %vm12688_vm8 = vcmask 31744   ;;  %v12690_v40 = vld [vmem:[#allocation22_spill] sm:$0xff]  ;;  %v5022_v45 = vld [vmem:[#allocation2 + $0x34] sm:$0xf]  ;;  %12692 = vst [vmem:[#allocation38_spill] sm:$0xff] %v10805_v47 }
 0x223   : > { %v4433_v15 = vsel %vm12685_vm2, %v4423_v21, %v4432_v42  ;;  %v5053_v44 = vsel %vm12687_vm1, %v5020_v7, 0  ;;  %7859 = vmatmul.mubr.msk.bf16.gmra.mxu1 %vm12688_vm8, %v4424_v52  ;;  %v10796_v35 = vor.u32 %v5741_v16, %v5738_v62  ;;  %v5165_v2 = vshrl.u32 %v10743_v61, 16  ;;  %vm12689_vm7 = vmmov %vm12688_vm8  ;;  %v12701_v7 = vld [vmem:[#allocation24_spill] sm:$0xff]  ;;  %v12745_v47 = vld [vmem:[#allocation31_spill] sm:$0xff] }
 0x224   : > { %v5169_v48 = vrot.slane %v5167_v19, 1  ;;  %v7346_v60 = vcombine.low %v5587_v38, %v5588_v41  ;;  %7862 = vmatprep.mubr.msk.bf16.mxu1 %vm12689_vm7, %v4433_v15  ;;  %v5174_v21 = vrot.slane %v5172_v63, 1  ;;  %v5745_v14 = vshrl.u32 %v7345_v29, 16  ;;  %vm12695_vm8 = vmmov %vm12689_vm7  ;;  %v5559_v38 = vld [vmem:[#allocation2 + $0x60] sm:$0xf] }
 0x225   : > { %v5748_v12 = vshll.u32 %v7345_v29, 16  ;;  %vm12691_vm6 = vcmp.ne.s16.totalorder %v12690_v40, 0  ;;  %v5180_v1 = vshll.u32 %v10788_v13, 16  ;;  %vm12693_vm2 = vnez %v12591_v43  ;;  %v5021_v29 = vld [vmem:[#allocation2 + $0x30] sm:$0xf] }
 0x226   : > { %v5052_v26 = vsel %vm12691_vm6, %v5019_v58, 0  ;;  %v5589_v61 = vsel %vm12693_vm2, %v5556_v23, 0  ;;  %v5590_v62 = vsel %vm12595_vm14, %v5557_v31, 0  ;;  %v12694_v32 = vcombine.low %v10648_v51, %v10669_v24  ;;  %vm12699_vm14 = vmmov %vm12695_vm8 }
 0x227   : > { %v10803_v3 = vcombine.low %v5052_v26, %v5053_v44  ;;  %vm12696_vm7 = vsmask.f32 4352  ;;  %v5176_v43 = vshrl.u32 %v10745_v55, 16  ;;  %v5170_v51 = vor.u32 %v5169_v48, %v5165_v2  ;;  %v10835_v44 = vpop.f32.mrf.mxu0 }
 0x228   : > { %7897 = vmatmul.mubr.msk.bf16.gmra.mxu0 %vm12695_vm8, %v12694_v32  ;;  %v5725_v16 = vsel %vm12696_vm7, %v10730_v9, %v5724_v25  ;;  %vm12697_vm6 = vmmov %vm12696_vm7  ;;  %v5754_v24 = vshrl.u32 %v7346_v60, 16  ;;  %vm12702_vm8 = vnez %v12701_v7  ;;  %v5747_v52 = vrot.slane %v5745_v14, 3  ;;  %v5024_v14 = vld [vmem:[#allocation2 + $0x3c] sm:$0xf]  ;;  %v5560_v32 = vld [vmem:[#allocation2 + $0x64] sm:$0xf] }
 0x229   : > { %v10820_v19 = vsel %vm12697_vm6, %v5724_v25, %v5733_v28  ;;  %vm12698_vm1 = vmmov %vm12697_vm6  ;;  %7936 = vmatprep.mubr.msk.bf16.mxu0 %vm12699_vm14, %v10720_v11  ;;  %v5055_v9 = vsel %vm12702_vm8, %v5022_v45, 0  ;;  %v5178_v41 = vor.u32 %v5176_v43, %v5174_v21  ;;  %v7347_v25 = vcombine.low %v5589_v61, %v5590_v62  ;;  %v7704_v11 = vpop.f32.mrf.mxu1 }
 0x22a   : > { %v4442_v63 = vsel %vm12698_vm1, %v4432_v42, %v4441_v39  ;;  %vm12700_vm2 = vmmov %vm12698_vm1  ;;  %v5757_v42 = vshll.u32 %v7346_v60, 16  ;;  %v5750_v55 = vrot.slane %v5748_v12, 4  ;;  %v5182_v58 = vrot.slane %v5180_v1, 1  ;;  %v12703_v39 = vld [vmem:[#allocation23_spill] sm:$0xff]  ;;  %v5023_v60 = vld [vmem:[#allocation2 + $0x38] sm:$0xf] }
 0x22b   : > { %v10828_v30 = vsel %vm12700_vm2, %v5733_v28, %v10796_v35  ;;  %v5188_v15 = vshll.u32 %v10803_v3, 16  ;;  %vm12704_vm1 = vcmp.ne.s16.totalorder %v12703_v39, 0  ;;  %v10838_v23 = vadd.f32 %v10625_v49, %v7704_v11  ;;  %v5026_v12 = vld [vmem:[#allocation2 + $0x44] sm:$0xf]  ;;  %7863 = vmatmul.mubr.msk.bf16.gmra.mxu1 %vm12699_vm14, %v4442_v63  ;;  %v12709_v1 = vld [vmem:[#allocation6_spill] sm:$0xff]  ;;  %v2512_v62 = vpop.f32.mrf.mxu1  ;;  %vm12711_vm8 = vmmov %vm12699_vm14 }
 0x22c   : > { %v5054_v28 = vsel %vm12704_vm1, %v5021_v29, 0  ;;  %vm12706_vm7 = vnez %v12597_v17  ;;  %vm12707_vm6 = vnez %v12599_v50  ;;  %vm12708_vm2 = vsmask.f32 7424  ;;  %v12712_v50 = vld [vmem:[#allocation4_spill] sm:$0xff]  ;;  %vm12719_vm14 = vmmov %vm12711_vm8 }
 0x22d   : > { %12705 = vst [vmem:[#allocation37_spill] sm:$0xff] %v10838_v23  ;;  %v10840_v31 = vcombine.low %v5054_v28, %v5055_v9  ;;  %v5591_v2 = vsel %vm12706_vm7, %v5558_v54, 0  ;;  %v5592_v48 = vsel %vm12707_vm6, %v5559_v38, 0  ;;  %v5175_v26 = vsel %vm12708_vm2, %v5170_v51, %v5174_v21  ;;  %v12714_v9 = vld [vmem:[#allocation32_spill] sm:$0xff]  ;;  %v12716_v38 = vld [vmem:[#allocation21_spill] sm:$0xff]  ;;  %v10859_v28 = vpop.f32.mrf.mxu0 }
 0x22e   : > { %v5756_v45 = vrot.slane %v5754_v24, 3  ;;  %vm12710_vm1 = vcmask 1041408   ;;  %v5184_v61 = vshrl.u32 %v10788_v13, 16  ;;  %7902 = vmatprep.mubr.msk.bf16.mxu1 %vm12711_vm8, %v5175_v26  ;;  %v5759_v17 = vrot.slane %v5757_v42, 4  ;;  %v5561_v63 = vld [vmem:[#allocation2 + $0x68] sm:$0xf]  ;;  %v7705_v13 = vpop.f32.mrf.mxu1 }
 0x22f   : > { %v6218_v49 = vsel %vm12710_vm1, %v12709_v1, 0  ;;  %vm12713_vm7 = vmmov %vm12710_vm1  ;;  %v5763_v29 = vshrl.u32 %v7347_v25, 16  ;;  %v10855_v54 = vadd.f32 %v12714_v9, %v2512_v62  ;;  %v5751_v21 = vor.u32 %v5750_v55, %v5747_v52  ;;  %v12720_v52 = vld [vmem:[#allocation19_spill] sm:$0xff]  ;;  %v10881_v37 = vpop.f32.mrf.mxu0 }
 0x230   : > { %v6745_v43 = vsel %vm12713_vm7, %v12712_v50, 0  ;;  %v5766_v51 = vshll.u32 %v7347_v25, 16  ;;  %v7348_v24 = vcombine.low %v5591_v2, %v5592_v48  ;;  %vm12717_vm6 = vnez %v12716_v38  ;;  %7937 = vmatmul.mubr.msk.bf16.vlgmr.msra.gmra.mxu0 %vm12711_vm8, %v10784_v4  ;;  %v5025_v50 = vld [vmem:[#allocation2 + $0x40] sm:$0xf] }
 0x231   : > { %12715 = vst [vmem:[#allocation39_spill] sm:$0xff] %v10855_v54  ;;  %v5057_v11 = vsel %vm12717_vm6, %v5024_v14, 0  ;;  %v5186_v42 = vor.u32 %v5184_v61, %v5182_v58  ;;  %v5190_v26 = vrot.slane %v5188_v15, 1  ;;  %v5196_v1 = vshll.u32 %v10840_v31, 16  ;;  %7940 = vmatprep.mubr.msk.bf16.mxu0 %vm12719_vm14, %v5725_v16  ;;  %8003 = vmatpush3.bf16.msra.mxu0 %v6745_v43  ;;  %v12724_v14 = vld [vmem:[#allocation45_spill] sm:$0xff] }
 0x232   : > { %v10865_v62 = vadd.f32 %v10671_v59, %v7705_v13  ;;  %vm12721_vm2 = vcmp.ne.s16.totalorder %v12720_v52, 0  ;;  %v5593_v2 = vsel %vm9708_vm13, %v5560_v32, 0  ;;  %v5594_v4 = vsel %vm12607_vm5, %v5561_v63, 0  ;;  %v5562_v16 = vld [vmem:[#allocation2 + $0x6c] sm:$0xf] }
 0x233   : > { %v5056_v25 = vsel %vm12721_vm2, %v5023_v60, 0  ;;  %vm12725_vm1 = vnez %v12724_v14  ;;  %v10876_v61 = vor.u32 %v5759_v17, %v5756_v45  ;;  %v5192_v59 = vshrl.u32 %v10803_v3, 16  ;;  %v12726_v32 = vld [vmem:[#allocation28_spill] sm:$0xff]  ;;  %v5563_v63 = vld [vmem:[#allocation2 + $0x70] sm:$0xf] }
 0x234   : > { %12718 = vst [vmem:[#allocation40_spill] sm:$0xff] %v10865_v62  ;;  %v5059_v15 = vsel %vm12725_vm1, %v5026_v12, 0  ;;  %v5765_v9 = vrot.slane %v5763_v29, 3  ;;  %v10879_v13 = vcombine.low %v5056_v25, %v5057_v11  ;;  %v5768_v43 = vrot.slane %v5766_v51, 4  ;;  %v5028_v3 = vld [vmem:[#allocation2 + $0x4c] sm:$0xf]  ;;  %v10903_v25 = vpop.f32.mrf.mxu1 }
 0x235   : > { %v5772_v62 = vshrl.u32 %v7348_v24, 16  ;;  %v5775_v60 = vshll.u32 %v7348_v24, 16  ;;  %vm12727_vm13 = vcmp.ne.s16.totalorder %v12726_v32, 0  ;;  %vm12728_vm5 = vsmask.f32 7424  ;;  %12733 = vst [vmem:[#allocation9_spill] sm:$0xff] %v10903_v25 }
 0x236   : > { %v5058_v55 = vsel %vm12727_vm13, %v5025_v50, 0  ;;  %v5183_v48 = vsel %vm12728_vm5, %v5178_v41, %v5182_v58  ;;  %v5198_v12 = vrot.slane %v5196_v1, 1  ;;  %v7349_v45 = vcombine.low %v5593_v2, %v5594_v4  ;;  %vm12731_vm2 = vmmov %vm12728_vm5  ;;  %v10898_v50 = vpop.f32.mrf.mxu0  ;;  %v5027_v41 = vld [vmem:[#allocation2 + $0x48] sm:$0xf]  ;;  %v5029_v58 = vld [vmem:[#allocation2 + $0x50] sm:$0xf] }
 0x237   : > { %v10886_v17 = vcombine.low %v5058_v55, %v5059_v15  ;;  %vm12729_vm7 = vsmask.f32 4352  ;;  %7903 = vmatmul.mubr.msk.bf16.vlgmr.msra.gmra.mxu1 %vm12711_vm8, %v5183_v48  ;;  %v5191_v24 = vsel %vm12731_vm2, %v5186_v42, %v5190_v26  ;;  %v5194_v11 = vor.u32 %v5192_v59, %v5190_v26  ;;  %vm12732_vm13 = vmmov %vm12711_vm8  ;;  %v5030_v26 = vld [vmem:[#allocation2 + $0x54] sm:$0xf]  ;;  %v12736_v48 = vld [vmem:[#allocation47_spill] sm:$0xff] }
 0x238   : > { %v10890_v29 = vsel %vm12729_vm7, %v10796_v35, %v5751_v21  ;;  %vm12730_vm14 = vmmov %vm12729_vm7  ;;  %7969 = vmatpush3.bf16.msra.mxu1 %v6218_v49  ;;  %7906 = vmatprep.mubr.msk.bf16.mxu1 %vm12732_vm13, %v5191_v24  ;;  %v5200_v1 = vshrl.u32 %v10840_v31, 16  ;;  %v5204_v35 = vshll.u32 %v10879_v13, 16  ;;  %v5596_v42 = vsel %vm9780_vm9, %v5563_v63, 0  ;;  %v10911_v24 = vpop.f32.mrf.mxu0  ;;  %v5564_v31 = vld [vmem:[#allocation2 + $0x74] sm:$0xf] }
 0x239   : > { %v10895_v51 = vsel %vm12730_vm14, %v5751_v21, %v10876_v61  ;;  %v5595_v21 = vsel %vm12609_vm10, %v5562_v16, 0  ;;  %v5769_v15 = vor.u32 %v5768_v43, %v5765_v9  ;;  %v5774_v59 = vrot.slane %v5772_v62, 3  ;;  %vm12738_vm7 = vmmov %vm12711_vm8  ;;  %v5565_v4 = vld [vmem:[#allocation2 + $0x78] sm:$0xf] }
 0x23a   : > { %v5777_v55 = vrot.slane %v5775_v60, 4  ;;  %vm12737_vm5 = vnez %v12736_v48  ;;  %7941 = vmatmul.mubr.msk.bf16.gmra.mxu0 %vm12738_vm7, %v10820_v19  ;;  %v5202_v25 = vor.u32 %v5200_v1, %v5198_v12  ;;  %v5781_v54 = vshrl.u32 %v7349_v45, 16  ;;  %vm12739_vm9 = vmmov %vm12738_vm7  ;;  %v12741_v60 = vld [vmem:[#allocation25_spill] sm:$0xff]  ;;  %v7708_v1 = vpop.f32.mrf.mxu1 }
 0x23b   : > { %v5061_v49 = vsel %vm12737_vm5, %v5028_v3, 0  ;;  %v5784_v2 = vshll.u32 %v7349_v45, 16  ;;  %v5212_v16 = vshll.u32 %v10886_v17, 16  ;;  %7944 = vmatprep.mubr.msk.bf16.mxu0 %vm12739_vm9, %v10828_v30  ;;  %vm12740_vm10 = vmmov %vm12731_vm2  ;;  %v5208_v9 = vshrl.u32 %v10879_v13, 16  ;;  %v10922_v3 = vpop.f32.mrf.mxu0  ;;  %v12743_v45 = vld [vmem:[#allocation46_spill] sm:$0xff] }
 0x23c   : > { %v5199_v62 = vsel %vm12740_vm10, %v5194_v11, %v5198_v12  ;;  %v7350_v43 = vcombine.low %v5595_v21, %v5596_v42  ;;  %vm12742_vm8 = vcmp.ne.s16.totalorder %v12741_v60, 0  ;;  %v5206_v19 = vrot.slane %v5204_v35, 1  ;;  %vm12751_vm13 = vmmov %vm12740_vm10  ;;  %v12755_v21 = vld [vmem:[#allocation44_spill] sm:$0xff] }
 0x23d   : > { %v5060_v63 = vsel %vm12742_vm8, %v5027_v41, 0  ;;  %vm12744_vm14 = vcmp.ne.s16.totalorder %v12743_v45, 0  ;;  %vm12746_vm2 = vnez %v12745_v47  ;;  %v10930_v12 = vor.u32 %v5777_v55, %v5774_v59  ;;  %v10935_v11 = vpop.f32.mrf.mxu0  ;;  %v2528_v55 = vpop.f32.mrf.mxu1  ;;  %v5032_v47 = vld [vmem:[#allocation2 + $0x5c] sm:$0xf] }
 0x23e   : > { %v10924_v23 = vcombine.low %v5060_v63, %v5061_v49  ;;  %v5062_v27 = vsel %vm12744_vm14, %v5029_v58, 0  ;;  %v5063_v30 = vsel %vm12746_vm2, %v5030_v26, 0  ;;  %v10933_v13 = vadd.f32 %v10706_v36, %v7708_v1  ;;  %v10941_v49 = vld [vmem:[#allocation2 + $0x7c] sm:$0xf]  ;;  %v5567_v58 = vld [vmem:[#allocation2 + $0x80] sm:$0xf] }
 0x23f   : > { %v5597_v35 = vsel %vm9809_vm3, %v5564_v31, 0  ;;  %v5598_v42 = vsel %vm9825_vm0, %v5565_v4, 0  ;;  %12750 = vst [vmem:[#allocation12_spill] sm:$0xff] %v10941_v49  ;;  %v5207_v63 = vsel %vm12751_vm13, %v5202_v25, %v5206_v19  ;;  %v5783_v26 = vrot.slane %v5781_v54, 3  ;;  %7907 = vmatmul.mubr.msk.bf16.gmra.mxu1 %vm12738_vm7, %v5199_v62  ;;  %v10951_v4 = vpop.f32.mrf.mxu0  ;;  %vm12753_vm3 = vmmov %vm12738_vm7  ;;  %v7709_v25 = vpop.f32.mrf.mxu1 }
 0x240   : > { %12747 = vst [vmem:[#allocation13_spill] sm:$0xff] %v10933_v13  ;;  %v5786_v6 = vrot.slane %v5784_v2, 4  ;;  %v5214_v59 = vrot.slane %v5212_v16, 1  ;;  %v5790_v36 = vshrl.u32 %v7350_v43, 16  ;;  %v5216_v1 = vshrl.u32 %v10886_v17, 16  ;;  %7910 = vmatprep.mubr.msk.bf16.mxu1 %vm12753_vm3, %v5207_v63  ;;  %vm12762_vm8 = vmmov %vm12753_vm3 }
 0x241   : > { %v10947_v31 = vadd.f32 %v10722_v22, %v2528_v55  ;;  %v10949_v41 = vcombine.low %v5062_v27, %v5063_v30  ;;  %v5220_v54 = vshll.u32 %v10924_v23, 16  ;;  %v7351_v2 = vcombine.low %v5597_v35, %v5598_v42  ;;  %v12758_v27 = vld [vmem:[#allocation30_spill] sm:$0xff]  ;;  %v12760_v55 = vld [vmem:[#allocation48_spill] sm:$0xff]  ;;  %vm12765_vm13 = vmmov %vm12753_vm3 }
 0x242   : > { %v5599_v62 = vsel %vm12618_vm12, %v10941_v49, 0  ;;  %vm12756_vm0 = vnez %v12755_v21  ;;  %v5793_v13 = vshll.u32 %v7350_v43, 16  ;;  %v10961_v22 = vadd.f32 %v10740_v0, %v7709_v25  ;;  %7945 = vmatmul.mubr.msk.bf16.gmra.mxu0 %vm12762_vm8, %v10890_v29  ;;  %v5034_v21 = vld [vmem:[#allocation2 + $0x64] sm:$0xf] }
 0x243   : > { %12752 = vst [vmem:[#allocation17_spill] sm:$0xff] %v10947_v31  ;;  %v5600_v17 = vsel %vm12756_vm0, %v5567_v58, 0  ;;  %vm12759_vm9 = vcmp.ne.s16.totalorder %v12758_v27, 0  ;;  %vm12761_vm10 = vnez %v12760_v55  ;;  %v10967_v31 = vpop.f32.mrf.mxu0  ;;  %vm12763_vm12 = vsmask.f32 4352  ;;  %v2531_v58 = vpop.f32.mrf.mxu1  ;;  %7948 = vmatprep.mubr.msk.bf16.mxu0 %vm12765_vm13, %v10895_v51 }
 0x244   : > { %12757 = vst [vmem:[#allocation18_spill] sm:$0xff] %v10961_v22  ;;  %v5064_v30 = vsel %vm12759_vm9, %v5031_v53, 0  ;;  %v5065_v63 = vsel %vm12761_vm10, %v5032_v47, 0  ;;  %v5770_v35 = vsel %vm12763_vm12, %v10876_v61, %v5769_v15  ;;  %vm12764_vm14 = vmmov %vm12763_vm12  ;;  %v5210_v42 = vor.u32 %v5208_v9, %v5206_v19  ;;  %v5033_v61 = vld [vmem:[#allocation2 + $0x60] sm:$0xf] }
 0x245   : > { %v5779_v43 = vsel %vm12764_vm14, %v5769_v15, %v10930_v12  ;;  %v5218_v0 = vor.u32 %v5216_v1, %v5214_v59  ;;  %v10977_v53 = vor.u32 %v5786_v6, %v5783_v26  ;;  %v10980_v47 = vadd.f32 %v10764_v46, %v2531_v58  ;;  %v10983_v16 = vpop.f32.mrf.mxu0  ;;  %v7712_v19 = vpop.f32.mrf.mxu1  ;;  %v10997_v22 = vld [vmem:[#allocation2 + $0x88] sm:$0xf]  ;;  %vm12777_vm12 = vmmov %vm12762_vm8 }
 0x246   : > { %v5228_v25 = vshll.u32 %v10949_v41, 16  ;;  %v7352_v29 = vcombine.low %v5599_v62, %v5600_v17  ;;  %v5222_v49 = vrot.slane %v5220_v54, 1  ;;  %v5799_v15 = vshrl.u32 %v7351_v2, 16  ;;  %v10993_v62 = vld [vmem:[#allocation2 + $0x84] sm:$0xf]  ;;  %12771 = vst [vmem:[#allocation23_spill] sm:$0xff] %v10997_v22  ;;  %vm12781_vm14 = vmmov %vm12762_vm8 }
 0x247   : > { %12766 = vst [vmem:[#allocation42_spill] sm:$0xff] %v10980_v47  ;;  %v5802_v9 = vshll.u32 %v7351_v2, 16  ;;  %v10985_v1 = vcombine.low %v5064_v30, %v5065_v63  ;;  %vm12767_vm7 = vsmask.f32 7424  ;;  %v5792_v6 = vrot.slane %v5790_v36, 3  ;;  %v10991_v58 = vpop.f32.mrf.mxu0  ;;  %12769 = vst [vmem:[#allocation24_spill] sm:$0xff] %v10993_v62  ;;  %v2544_v2 = vpop.f32.mrf.mxu1 }
 0x248   : > { %v5215_v51 = vsel %vm12767_vm7, %v5210_v42, %v5214_v59  ;;  %v5795_v26 = vrot.slane %v5793_v13, 4  ;;  %v10989_v46 = vadd.f32 %v10793_v8, %v7712_v19  ;;  %v5035_v17 = vld [vmem:[#allocation2 + $0x68] sm:$0xf]  ;;  %vm12770_vm3 = vmmov %vm12767_vm7  ;;  %v5232_v54 = vshrl.u32 %v10949_v41, 16  ;;  %v12772_v30 = vld [vmem:[#allocation49_spill] sm:$0xff] }
 0x249   : > { %v5223_v47 = vsel %vm12770_vm3, %v5218_v0, %v5222_v49  ;;  %vm12773_vm0 = vcmp.ne.s16.totalorder %v12772_v30, 0  ;;  %v12774_v36 = vld [vmem:[#allocation51_spill] sm:$0xff]  ;;  %7911 = vmatmul.mubr.msk.bf16.gmra.mxu1 %vm12762_vm8, %v5215_v51  ;;  %v5230_v8 = vrot.slane %v5228_v25, 1  ;;  %v5808_v63 = vshrl.u32 %v7352_v29, 16  ;;  %v11007_v0 = vpop.f32.mrf.mxu0  ;;  %v5036_v41 = vld [vmem:[#allocation2 + $0x6c] sm:$0xf] }
 0x24a   : > { %12768 = vst [vmem:[#allocation22_spill] sm:$0xff] %v10989_v46  ;;  %v5066_v59 = vsel %vm12773_vm0, %v5033_v61, 0  ;;  %vm12775_vm9 = vnez %v12774_v36  ;;  %v5811_v42 = vshll.u32 %v7352_v29, 16  ;;  %v11005_v19 = vadd.f32 %v10811_v18, %v2544_v2  ;;  %7914 = vmatprep.mubr.msk.bf16.mxu1 %vm12777_vm12, %v5223_v47  ;;  %7949 = vmatmul.mubr.msk.bf16.gmra.mxu0 %vm12781_vm14, %v5770_v35  ;;  %vm12796_vm12 = vmmov %vm12770_vm3 }
 0x24b   : > { %v5067_v13 = vsel %vm12775_vm9, %v5034_v21, 0  ;;  %v5224_v46 = vshrl.u32 %v10924_v23, 16  ;;  %v5801_v30 = vrot.slane %v5799_v15, 3  ;;  %v5804_v61 = vrot.slane %v5802_v9, 4  ;;  %v7713_v21 = vpop.f32.mrf.mxu1  ;;  %v11023_v23 = vld [vmem:[#allocation2 + $0x8c] sm:$0xf]  ;;  %v11025_v47 = vpop.f32.mrf.mxu0 }
 0x24c   : > { %12776 = vst [vmem:[#allocation6_spill] sm:$0xff] %v11005_v19  ;;  %v5236_v36 = vshll.u32 %v10985_v1, 16  ;;  %v11013_v51 = vadd.f32 %v10835_v44, %v7713_v21  ;;  %v5601_v18 = vsel %vm10023_vm11, %v10993_v62, 0  ;;  %v5602_v2 = vsel %vm12631_vm15, %v10997_v22, 0  ;;  %v11028_v21 = vld [vmem:[#allocation2 + $0x90] sm:$0xf]  ;;  %vm12786_vm15 = vmmov %vm12762_vm8 }
 0x24d   : > { %v11021_v19 = vcombine.low %v5066_v59, %v5067_v13  ;;  %v5796_v15 = vor.u32 %v5795_v26, %v5792_v6  ;;  %v5226_v9 = vor.u32 %v5224_v46, %v5222_v49  ;;  %v2547_v44 = vpop.f32.mrf.mxu1  ;;  %v12784_v62 = vld [vmem:[#allocation53_spill] sm:$0xff]  ;;  %7952 = vmatprep.mubr.msk.bf16.mxu0 %vm12786_vm15, %v5779_v43  ;;  %v5810_v59 = vrot.slane %v5808_v63, 3  ;;  %v11038_v35 = vpop.f32.mrf.mxu0  ;;  %vm12800_vm15 = vmmov %vm12762_vm8 }
 0x24e   : > { %12778 = vst [vmem:[#allocation4_spill] sm:$0xff] %v11013_v51  ;;  %v12782_v51 = vld [vmem:[#allocation50_spill] sm:$0xff]  ;;  %vm12785_vm11 = vnez %v12784_v62  ;;  %v5813_v13 = vrot.slane %v5811_v42, 4  ;;  %v5234_v22 = vor.u32 %v5232_v54, %v5230_v8  ;;  %v11036_v55 = vadd.f32 %v10859_v28, %v2547_v44  ;;  %v5037_v49 = vld [vmem:[#allocation2 + $0x70] sm:$0xf]  ;;  %v12790_v28 = vld [vmem:[#allocation3_spill] sm:$0xff] }
 0x24f   : > { %vm12783_vm13 = vcmp.ne.s16.totalorder %v12782_v51, 0  ;;  %v5069_v29 = vsel %vm12785_vm11, %v5036_v41, 0  ;;  %v5038_v6 = vld [vmem:[#allocation2 + $0x74] sm:$0xf]  ;;  %v5805_v26 = vor.u32 %v5804_v61, %v5801_v30  ;;  %v5238_v46 = vrot.slane %v5236_v36, 1  ;;  %v7716_v51 = vpop.f32.mrf.mxu1  ;;  %v11052_v44 = vpop.f32.mrf.mxu0 }
 0x250   : > { %v5068_v25 = vsel %vm12783_vm13, %v5035_v17, 0  ;;  %12787 = vst [vmem:[#allocation32_spill] sm:$0xff] %v11036_v55  ;;  %v7353_v27 = vcombine.low %v5601_v18, %v5602_v2  ;;  %v5603_v41 = vsel %vm12633_vm4, %v11023_v23, 0  ;;  %v11044_v43 = vadd.f32 %v10881_v37, %v7716_v51  ;;  %v12792_v18 = vld [vmem:[#allocation52_spill] sm:$0xff]  ;;  %v12794_v37 = vld [vmem:[#allocation55_spill] sm:$0xff] }
 0x251   : > { %v5244_v54 = vshll.u32 %v11021_v19, 16  ;;  %vm12791_vm7 = vnez %v12790_v28  ;;  %v11050_v42 = vcombine.low %v5068_v25, %v5069_v29  ;;  %v5231_v30 = vsel %vm12770_vm3, %v5226_v9, %v5230_v8  ;;  %v2560_v61 = vpop.f32.mrf.mxu1  ;;  %v11068_v8 = vpop.f32.mrf.mxu0  ;;  %v5040_v9 = vld [vmem:[#allocation2 + $0x7c] sm:$0xf]  ;;  %v6415_v62 = vld [vmem:[#allocation2 + $0x20] sm:$0xf] }
 0x252   : > { %12789 = vst [vmem:[#allocation21_spill] sm:$0xff] %v11044_v43  ;;  %v5604_v63 = vsel %vm12791_vm7, %v11028_v21, 0  ;;  %v5240_v36 = vshrl.u32 %v10985_v1, 16  ;;  %vm12793_vm4 = vcmp.ne.s16.totalorder %v12792_v18, 0  ;;  %vm12795_vm0 = vnez %v12794_v37  ;;  %7915 = vmatmul.mubr.msk.bf16.gmra.mxu1 %vm12762_vm8, %v5231_v30  ;;  %v5039_v1 = vld [vmem:[#allocation2 + $0x78] sm:$0xf]  ;;  %vm12802_vm7 = vmmov %vm12762_vm8 }
 0x253   : > { %v5070_v2 = vsel %vm12793_vm4, %v5037_v49, 0  ;;  %v5071_v51 = vsel %vm12795_vm0, %v5038_v6, 0  ;;  %v11061_v17 = vor.u32 %v5813_v13, %v5810_v59  ;;  %v5239_v25 = vsel %vm12796_vm12, %v5234_v22, %v5238_v46  ;;  %v7717_v13 = vpop.f32.mrf.mxu1  ;;  %v11082_v43 = vpop.f32.mrf.mxu0  ;;  %vm12807_vm8 = vmmov %vm12802_vm7  ;;  %v12815_v18 = vld [vmem:[#allocation56_spill] sm:$0xff] }
 0x254   : > { %v5248_v29 = vshrl.u32 %v11021_v19, 16  ;;  %v11066_v28 = vadd.f32 %v10898_v50, %v2560_v61  ;;  %vm12798_vm14 = vsmask.f32 4352  ;;  %7918 = vmatprep.mubr.msk.bf16.mxu1 %vm12800_vm15, %v5239_v25  ;;  %v5817_v59 = vshrl.u32 %v7353_v27, 16  ;;  %v11080_v61 = vld [vmem:[#allocation2 + $0x94] sm:$0xf] }
 0x255   : > { %v5788_v49 = vsel %vm12798_vm14, %v10930_v12, %v10977_v53  ;;  %vm12799_vm13 = vmmov %vm12798_vm14  ;;  %v7354_v22 = vcombine.low %v5603_v41, %v5604_v63  ;;  %v5246_v19 = vrot.slane %v5244_v54, 1  ;;  %v5252_v50 = vshll.u32 %v11050_v42, 16  ;;  %v2563_v55 = vpop.f32.mrf.mxu1  ;;  %v12803_v25 = vld [vmem:[#allocation54_spill] sm:$0xff]  ;;  %v12805_v63 = vld [vmem:[#allocation57_spill] sm:$0xff] }
 0x256   : > { %12797 = vst [vmem:[#allocation19_spill] sm:$0xff] %v11066_v28  ;;  %v5797_v6 = vsel %vm12799_vm13, %v10977_v53, %v5796_v15  ;;  %v11078_v30 = vadd.f32 %v10911_v24, %v7717_v13  ;;  %v7317_v28 = vcombine.low %v5070_v2, %v5071_v51  ;;  %7953 = vmatmul.mubr.msk.bf16.gmra.mxu0 %vm12802_vm7, %v5788_v49  ;;  %v5820_v53 = vshll.u32 %v7353_v27, 16  ;;  %vm12808_vm12 = vmmov %vm12799_vm13  ;;  %v5041_v27 = vld [vmem:[#allocation2 + $0x80] sm:$0xf] }
 0x257   : > { %v5242_v12 = vor.u32 %v5240_v36, %v5238_v46  ;;  %vm12804_vm3 = vcmp.ne.s16.totalorder %v12803_v25, 0  ;;  %vm12806_vm4 = vnez %v12805_v63  ;;  %7956 = vmatprep.mubr.msk.bf16.mxu0 %vm12807_vm8, %v5797_v6  ;;  %v5806_v24 = vsel %vm12808_vm12, %v5796_v15, %v5805_v26  ;;  %vm12809_vm14 = vmmov %vm12808_vm12  ;;  %v11096_v46 = vpop.f32.mrf.mxu0  ;;  %v7720_v6 = vpop.f32.mrf.mxu1  ;;  %v5042_v63 = vld [vmem:[#allocation2 + $0x84] sm:$0xf] }
 0x258   : > { %12801 = vst [vmem:[#allocation41_spill] sm:$0xff] %v11078_v30  ;;  %v5072_v41 = vsel %vm12804_vm3, %v5039_v1, 0  ;;  %v5073_v54 = vsel %vm12806_vm4, %v5040_v9, 0  ;;  %v5815_v2 = vsel %vm12809_vm14, %v5805_v26, %v11061_v17  ;;  %v5250_v51 = vor.u32 %v5248_v29, %v5246_v19  ;;  %v12811_v30 = vld [vmem:[#allocation7_spill] sm:$0xff]  ;;  %v6414_v29 = vld [vmem:[#allocation2 + $0x1c] sm:$0xf]  ;;  %vm12817_vm3 = vmmov %vm12807_vm8 }
 0x259   : > { %v11094_v13 = vadd.f32 %v10922_v3, %v2563_v55  ;;  %v5819_v36 = vrot.slane %v5817_v59, 3  ;;  %v5826_v49 = vshrl.u32 %v7354_v22, 16  ;;  %v5829_v1 = vshll.u32 %v7354_v22, 16  ;;  %v6413_v22 = vld [vmem:[#allocation2 + $0x18] sm:$0xf]  ;;  %v2576_v37 = vpop.f32.mrf.mxu1  ;;  %vm12822_vm14 = vmmov %vm12817_vm3 }
 0x25a   : > { %vm12812_vm13 = vcmp.ne.s16.totalorder %v12811_v30, 0  ;;  %v5254_v15 = vrot.slane %v5252_v50, 1  ;;  %v11102_v25 = vadd.f32 %v10935_v11, %v7720_v6  ;;  %v5260_v26 = vshll.u32 %v7317_v28, 16  ;;  %v6416_v11 = vld [vmem:[#allocation2 + $0x24] sm:$0xf] }
 0x25b   : > { %12810 = vst [vmem:[#allocation14_spill] sm:$0xff] %v11094_v13  ;;  %v5605_v9 = vsel %vm12812_vm13, %v11080_v61, 0  ;;  %v11104_v3 = vcombine.low %v5072_v41, %v5073_v54  ;;  %v5822_v55 = vrot.slane %v5820_v53, 4  ;;  %vm12814_vm15 = vsmask.f32 7424  ;;  %v11115_v41 = vpop.f32.mrf.mxu0  ;;  %v12820_v53 = vld [vmem:[#allocation59_spill] sm:$0xff] }
 0x25c   : > { %12813 = vst [vmem:[#allocation45_spill] sm:$0xff] %v11102_v25  ;;  %v5247_v13 = vsel %vm12814_vm15, %v5242_v12, %v5246_v19  ;;  %v5256_v59 = vshrl.u32 %v11050_v42, 16  ;;  %vm12816_vm7 = vcmp.ne.s16.totalorder %v12815_v18, 0  ;;  %vm12818_vm8 = vmmov %vm12814_vm15  ;;  %v5264_v6 = vshrl.u32 %v7317_v28, 16  ;;  %v5043_v42 = vld [vmem:[#allocation2 + $0x88] sm:$0xf] }
 0x25d   : > { %v5074_v30 = vsel %vm12816_vm7, %v5041_v27, 0  ;;  %7919 = vmatmul.mubr.msk.bf16.gmra.mxu1 %vm12817_vm3, %v5247_v13  ;;  %v5255_v50 = vsel %vm12818_vm8, %v5250_v51, %v5254_v15  ;;  %v11113_v25 = vadd.f32 %v10951_v4, %v2576_v37  ;;  %vm12821_vm12 = vnez %v12820_v53  ;;  %v7721_v51 = vpop.f32.mrf.mxu1  ;;  %v5044_v18 = vld [vmem:[#allocation2 + $0x8c] sm:$0xf]  ;;  %vm12824_vm15 = vmmov %vm12817_vm3 }
 0x25e   : > { %v5075_v19 = vsel %vm12821_vm12, %v5042_v63, 0  ;;  %v5828_v12 = vrot.slane %v5826_v49, 3  ;;  %v5831_v54 = vrot.slane %v5829_v1, 4  ;;  %7922 = vmatprep.mubr.msk.bf16.mxu1 %vm12822_vm14, %v5255_v50  ;;  %v7355_v27 = vcombine.low %v5605_v9, %v5605_v9  ;;  %7957 = vmatmul.mubr.msk.bf16.gmra.mxu0 %vm12824_vm15, %v5806_v24  ;;  %v12827_v9 = vld [vmem:[#allocation58_spill] sm:$0xff]  ;;  %v12829_v24 = vld [vmem:[#allocation61_spill] sm:$0xff] }
 0x25f   : > { %12819 = vst [vmem:[#allocation28_spill] sm:$0xff] %v11113_v25  ;;  %vm12823_vm13 = vnez %v12660_v56  ;;  %v5262_v28 = vrot.slane %v5260_v26, 1  ;;  %v5268_v4 = vshll.u32 %v11104_v3, 16  ;;  %v11124_v37 = vadd.f32 %v10967_v31, %v7721_v51  ;;  %v2579_v1 = vpop.f32.mrf.mxu1  ;;  %7960 = vmatprep.mubr.msk.bf16.mxu0 %vm12822_vm14, %v5815_v2 }
 0x260   : > { %v6447_v13 = vsel %vm12823_vm13, %v6414_v29, 0  ;;  %v7319_v25 = vcombine.low %v5074_v30, %v5075_v19  ;;  %v5258_v63 = vor.u32 %v5256_v59, %v5254_v15  ;;  %vm12825_vm7 = vcmp.ne.s16.totalorder %v12428_v34, 0  ;;  %v11137_v30 = vpop.f32.mrf.mxu0 }
 0x261   : > { %v6446_v49 = vsel %vm12825_vm7, %v6413_v22, 0  ;;  %vm12826_vm3 = vnez %v12662_v33  ;;  %vm12828_vm8 = vcmp.ne.s16.totalorder %v12827_v9, 0  ;;  %v5266_v50 = vor.u32 %v5264_v6, %v5262_v28 }
 0x262   : > { %v6449_v56 = vsel %vm12826_vm3, %v6416_v11, 0  ;;  %v5076_v26 = vsel %vm12828_vm8, %v5043_v42, 0  ;;  %v7406_v29 = vcombine.low %v6446_v49, %v6447_v13  ;;  %v11135_v31 = vadd.f32 %v10983_v16, %v2579_v1  ;;  %v5045_v11 = vld [vmem:[#allocation2 + $0x90] sm:$0x1]  ;;  %v6418_v49 = vld [vmem:[#allocation2 + $0x2c] sm:$0xf]  ;;  %vm12833_vm3 = vmmov %vm12822_vm14 }
 0x263   : > { %vm12830_vm13 = vnez %v12829_v24  ;;  %v5823_v15 = vor.u32 %v5822_v55, %v5819_v36  ;;  %v5835_v59 = vshrl.u32 %v7355_v27, 16  ;;  %v5838_v33 = vshll.u32 %v7355_v27, 16  ;;  %v6420_v55 = vld [vmem:[#allocation2 + $0x34] sm:$0xf]  ;;  %v12835_v27 = vld [vmem:[#allocation60_spill] sm:$0xff] }
 0x264   : > { %v5077_v34 = vsel %vm12830_vm13, %v5044_v18, 0  ;;  %vm12831_vm15 = vcmp.ne.s16.totalorder %v12665_v5, 0  ;;  %v5270_v2 = vrot.slane %v5268_v4, 1  ;;  %v5276_v42 = vshll.u32 %v7319_v25, 16 }
 0x265   : > { %v6448_v22 = vsel %vm12831_vm15, %v6415_v62, 0  ;;  %v7320_v6 = vcombine.low %v5076_v26, %v5077_v34  ;;  %v5832_v13 = vor.u32 %v5831_v54, %v5828_v12  ;;  %vm12832_vm7 = vsmask.f32 7424  ;;  %v11149_v62 = vpop.f32.mrf.mxu0 }
 0x266   : > { %v11143_v19 = vcombine.low %v6448_v22, %v6449_v56  ;;  %v5263_v16 = vsel %vm12832_vm7, %v5258_v63, %v5262_v28  ;;  %v5272_v51 = vshrl.u32 %v11104_v3, 16  ;;  %v6567_v18 = vshll.u32 %v7406_v29, 16  ;;  %vm12834_vm8 = vmmov %vm12832_vm7  ;;  %v6417_v3 = vld [vmem:[#allocation2 + $0x28] sm:$0xf] }
 0x267   : > { %7923 = vmatmul.mubr.msk.bf16.gmra.mxu1 %vm12833_vm3, %v5263_v16  ;;  %v5271_v36 = vsel %vm12834_vm8, %v5266_v50, %v5270_v2  ;;  %v5280_v5 = vshrl.u32 %v7319_v25, 16  ;;  %vm12836_vm14 = vnez %v12835_v27  ;;  %vm12837_vm15 = vsmask.f32 4352  ;;  %vm12838_vm7 = vmmov %vm12833_vm3  ;;  %v6419_v25 = vld [vmem:[#allocation2 + $0x30] sm:$0xf] }
 0x268   : > { %v5078_v4 = vsel %vm12836_vm14, %v5045_v11, 0  ;;  %v5824_v12 = vsel %vm12837_vm15, %v11061_v17, %v5823_v15  ;;  %v5837_v54 = vrot.slane %v5835_v59, 3  ;;  %v5840_v28 = vrot.slane %v5838_v33, 4  ;;  %7926 = vmatprep.mubr.msk.bf16.mxu1 %vm12838_vm7, %v5271_v36  ;;  %vm12840_vm8 = vmmov %vm12838_vm7  ;;  %v11166_v11 = vpop.f32.mrf.mxu0  ;;  %v6422_v36 = vld [vmem:[#allocation2 + $0x3c] sm:$0xf] }
 0x269   : > { %v6572_v63 = vshll.u32 %v11143_v19, 16  ;;  %vm12839_vm3 = vnez %v12673_v57  ;;  %v5278_v1 = vrot.slane %v5276_v42, 1  ;;  %v5284_v26 = vshll.u32 %v7320_v6, 16  ;;  %7961 = vmatmul.mubr.msk.bf16.gmra.mxu0 %vm12840_vm8, %v5824_v12  ;;  %vm12841_vm13 = vmmov %vm12837_vm15  ;;  %v7724_v12 = vpop.f32.mrf.mxu1 }
 0x26a   : > { %v6451_v56 = vsel %vm12839_vm3, %v6418_v49, 0  ;;  %v5833_v50 = vsel %vm12841_vm13, %v5823_v15, %v5832_v13  ;;  %v5274_v34 = vor.u32 %v5272_v51, %v5270_v2  ;;  %vm12842_vm15 = vnez %v12686_v10  ;;  %vm12843_vm14 = vmmov %vm12838_vm7 }
 0x26b   : > { %v6453_v17 = vsel %vm12842_vm15, %v6420_v55, 0  ;;  %v7321_v59 = vcombine.low %v5078_v4, %v5078_v4  ;;  %7964 = vmatprep.mubr.msk.bf16.mxu0 %vm12843_vm14, %v5833_v50  ;;  %v6569_v33 = vrot.slane %v6567_v18, 1  ;;  %vm12844_vm7 = vcmp.ne.s16.totalorder %v12678_v20, 0  ;;  %vm12847_vm14 = vmmov %vm12840_vm8 }
 0x26c   : > { %v6450_v22 = vsel %vm12844_vm7, %v6417_v3, 0  ;;  %v5282_v57 = vor.u32 %v5280_v5, %v5278_v1  ;;  %v5841_v42 = vor.u32 %v5840_v28, %v5837_v54  ;;  %vm12845_vm3 = vcmp.ne.s16.totalorder %v12690_v40, 0  ;;  %v11175_v54 = vpop.f32.mrf.mxu0  ;;  %v6421_v40 = vld [vmem:[#allocation2 + $0x38] sm:$0xf]  ;;  %vm12849_vm15 = vmmov %vm12847_vm14 }
 0x26d   : > { %v7408_v16 = vcombine.low %v6450_v22, %v6451_v56  ;;  %v6452_v49 = vsel %vm12845_vm3, %v6419_v25, 0  ;;  %v6565_v15 = vshrl.u32 %v7406_v29, 16  ;;  %v6574_v2 = vrot.slane %v6572_v63, 1 }
 0x26e   : > { %v11170_v51 = vcombine.low %v6452_v49, %v6453_v17  ;;  %v5286_v10 = vrot.slane %v5284_v26, 1  ;;  %vm12846_vm13 = vsmask.f32 7424  ;;  %v5288_v18 = vshrl.u32 %v7320_v6, 16  ;;  %v6424_v6 = vld [vmem:[#allocation2 + $0x44] sm:$0xf]  ;;  %v2592_v26 = vpop.f32.mrf.mxu1  ;;  %v11196_v22 = vpop.f32.mrf.mxu0 }
 0x26f   : > { %v5279_v55 = vsel %vm12846_vm13, %v5274_v34, %v5278_v1  ;;  %v5292_v4 = vshll.u32 %v7321_v59, 16  ;;  %v6570_v20 = vor.u32 %v6569_v33, %v6565_v15  ;;  %vm12848_vm8 = vmmov %vm12846_vm13  ;;  %v6580_v28 = vshll.u32 %v7408_v16, 16  ;;  %v6423_v17 = vld [vmem:[#allocation2 + $0x40] sm:$0xf]  ;;  %v6426_v59 = vld [vmem:[#allocation2 + $0x4c] sm:$0xf] }
 0x270   : > { %7927 = vmatmul.mubr.msk.bf16.gmra.mxu1 %vm12847_vm14, %v5279_v55  ;;  %v5287_v5 = vsel %vm12848_vm8, %v5282_v57, %v5286_v10  ;;  %v11178_v29 = vadd.f32 %v10991_v58, %v7724_v12  ;;  %vm12850_vm7 = vnez %v12701_v7  ;;  %vm12851_vm3 = vsmask.f32 4352  ;;  %vm12852_vm13 = vmmov %vm12848_vm8  ;;  %v6425_v49 = vld [vmem:[#allocation2 + $0x48] sm:$0xf]  ;;  %v6427_v12 = vld [vmem:[#allocation2 + $0x50] sm:$0xf] }
 0x271   : > { %7930 = vmatprep.mubr.msk.bf16.mxu1 %vm12849_vm15, %v5287_v5  ;;  %v6455_v3 = vsel %vm12850_vm7, %v6422_v36, 0  ;;  %v5842_v63 = vsel %vm12851_vm3, %v5832_v13, %v5841_v42  ;;  %v6575_v56 = vsel %vm12852_vm13, %v6570_v20, %v6574_v2  ;;  %v6576_v1 = vshrl.u32 %v11143_v19, 16  ;;  %vm12854_vm15 = vmmov %vm12847_vm14  ;;  %v7725_v13 = vpop.f32.mrf.mxu1 }
 0x272   : > { %v6588_v25 = vshll.u32 %v11170_v51, 16  ;;  %7965 = vmatmul.mubr.msk.bf16.gmra.mxu0 %vm12847_vm14, %v5842_v63  ;;  %v5290_v50 = vor.u32 %v5288_v18, %v5286_v10  ;;  %v11189_v58 = vadd.f32 %v11007_v0, %v2592_v26  ;;  %vm12853_vm8 = vcmp.ne.s16.totalorder %v12703_v39, 0  ;;  %vm12857_vm3 = vmmov %vm12847_vm14  ;;  %v6429_v26 = vld [vmem:[#allocation2 + $0x58] sm:$0xf] }
 0x273   : > { %v6454_v7 = vsel %vm12853_vm8, %v6421_v40, 0  ;;  %v5294_v34 = vrot.slane %v5292_v4, 1  ;;  %8004 = vmatprep.mubr.msk.bf16.mxu0 %vm12854_vm15, %v6575_v56  ;;  %v6457_v19 = vsel %vm12717_vm6, %v6424_v6, 0  ;;  %v6578_v57 = vor.u32 %v6576_v1, %v6574_v2  ;;  %v2595_v10 = vpop.f32.mrf.mxu1  ;;  %vm12856_vm6 = vmmov %vm12852_vm13  ;;  %v8111_v4 = vld [vmem:[#allocation2 + $0x1c] sm:$0xf] }
 0x274   : > { %v7410_v33 = vcombine.low %v6454_v7, %v6455_v3  ;;  %v6582_v42 = vrot.slane %v6580_v28, 1  ;;  %v11199_v0 = vadd.f32 %v11025_v47, %v7725_v13  ;;  %v6584_v39 = vshrl.u32 %v7408_v16, 16  ;;  %v8112_v47 = vld [vmem:[#allocation2 + $0x18] sm:$0xf]  ;;  %v6428_v16 = vld [vmem:[#allocation2 + $0x54] sm:$0xf]  ;;  %vm12859_vm13 = vmmov %vm12857_vm3 }
 0x275   : > { %v6590_v15 = vrot.slane %v6588_v25, 1  ;;  %vm12855_vm7 = vcmp.ne.s16.totalorder %v12720_v52, 0  ;;  %v6459_v55 = vsel %vm12725_vm1, %v6426_v59, 0  ;;  %v11206_v38 = vadd.f32 %v11038_v35, %v2595_v10  ;;  %v7728_v40 = vpop.f32.mrf.mxu1  ;;  %v11212_v52 = vpop.f32.mrf.mxu0  ;;  %vm12860_vm14 = vmmov %vm12856_vm6 }
 0x276   : > { %v6456_v36 = vsel %vm12855_vm7, %v6423_v17, 0  ;;  %v5295_v18 = vsel %vm12856_vm6, %v5290_v50, %v5294_v34  ;;  %v7373_v20 = vcombine.low %v8112_v47, %v8111_v4  ;;  %v6596_v5 = vshll.u32 %v7410_v33, 16  ;;  %vm12862_vm15 = vmmov %vm12857_vm3  ;;  %v6430_v50 = vld [vmem:[#allocation2 + $0x5c] sm:$0xf] }
 0x277   : > { %v11209_v2 = vcombine.low %v6456_v36, %v6457_v19  ;;  %vm12858_vm1 = vcmp.ne.s16.totalorder %v12726_v32, 0  ;;  %v6586_v35 = vor.u32 %v6584_v39, %v6582_v42  ;;  %v11217_v28 = vadd.f32 %v11052_v44, %v7728_v40  ;;  %v2608_v63 = vpop.f32.mrf.mxu1  ;;  %vm12863_vm7 = vmmov %vm12856_vm6  ;;  %v11233_v17 = vpop.f32.mrf.mxu0  ;;  %v8113_v36 = vld [vmem:[#allocation2 + $0x28] sm:$0xf] }
 0x278   : > { %7931 = vmatmul.mubr.msk.bf16.gmra.mxu1 %vm12857_vm3, %v5295_v18  ;;  %v6458_v14 = vsel %vm12858_vm1, %v6425_v49, 0  ;;  %v6583_v6 = vsel %vm12860_vm14, %v6578_v57, %v6582_v42  ;;  %vm12861_vm8 = vcmp.ne.s16.totalorder %v12741_v60, 0  ;;  %v6461_v1 = vsel %vm12737_vm5, %v6428_v16, 0  ;;  %vm12864_vm6 = vmmov %vm12857_vm3 }
 0x279   : > { %7970 = vmatprep.mubr.msk.bf16.mxu1 %vm12859_vm13, %v7373_v20  ;;  %v7412_v3 = vcombine.low %v6458_v14, %v6459_v55  ;;  %v6460_v56 = vsel %vm12861_vm8, %v6427_v12, 0  ;;  %v6591_v32 = vsel %vm12863_vm7, %v6586_v35, %v6590_v15  ;;  %v6604_v25 = vshll.u32 %v11209_v2, 16  ;;  %v7729_v34 = vpop.f32.mrf.mxu1  ;;  %v8114_v55 = vld [vmem:[#allocation2 + $0x2c] sm:$0xf]  ;;  %v11247_v4 = vpop.f32.mrf.mxu0  ;;  %v6432_v12 = vld [vmem:[#allocation2 + $0x64] sm:$0xf]  ;;  %vm12872_vm1 = vmmov %vm12863_vm7 }
 0x27a   : > { %8005 = vmatmul.mubr.msk.bf16.vlgmr.msra.gmra.mxu0 %vm12862_vm15, %v6583_v6  ;;  %v11229_v44 = vadd.f32 %v11068_v8, %v2608_v63  ;;  %v6592_v7 = vshrl.u32 %v11170_v51, 16  ;;  %v6598_v60 = vrot.slane %v6596_v5, 1  ;;  %v11236_v48 = vadd.f32 %v11082_v43, %v7729_v34  ;;  %v12870_v5 = vld [vmem:[#allocation34_spill] sm:$0xff]  ;;  %vm12874_vm14 = vmmov %vm12872_vm1 }
 0x27b   : > { %8008 = vmatprep.mubr.msk.bf16.mxu0 %vm12864_vm6, %v6591_v32  ;;  %v6612_v59 = vshll.u32 %v7412_v3, 16  ;;  %v11238_v13 = vcombine.low %v6460_v56, %v6461_v1  ;;  %v6600_v57 = vshrl.u32 %v7410_v33, 16  ;;  %v2611_v8 = vpop.f32.mrf.mxu1  ;;  %vm12865_vm5 = vcmp.ne.s16.totalorder %v12743_v45, 0  ;;  %v12868_v33 = vld [vmem:[#allocation29_spill] sm:$0xff]  ;;  %v6431_v45 = vld [vmem:[#allocation2 + $0x60] sm:$0xf]  ;;  %v11260_v56 = vpop.f32.mrf.mxu0  ;;  %vm12887_vm7 = vmmov %vm12872_vm1 }
 0x27c   : > { %v6594_v19 = vor.u32 %v6592_v7, %v6590_v15  ;;  %v6462_v42 = vsel %vm12865_vm5, %v6429_v26, 0  ;;  %v6463_v51 = vsel %vm12746_vm2, %v6430_v50, 0  ;;  %v6606_v39 = vrot.slane %v6604_v25, 1  ;;  %v12867_v15 = vld [vmem:[#allocation8_spill] sm:$0xff]  ;;  %vm12871_vm2 = vmmov %vm12857_vm3  ;;  %v12875_v25 = vld [vmem:[#allocation35_spill] sm:$0xff] }
 0x27d   : > { %v11245_v10 = vadd.f32 %v11096_v46, %v2611_v8  ;;  %v7375_v43 = vcombine.low %v8113_v36, %v8114_v55  ;;  %v6602_v18 = vor.u32 %v6600_v57, %v6598_v60  ;;  %v7768_v47 = vpop.f32.mrf.mxu1  ;;  %v12869_v20 = vcombine.low %v12867_v15, %v12868_v33  ;;  %vm12873_vm13 = vmmov %vm12871_vm2  ;;  %v12876_v50 = vld [vmem:[#allocation30_spill] sm:$0xff]  ;;  %v6433_v57 = vld [vmem:[#allocation2 + $0x68] sm:$0xf] }
 0x27e   : > { %v6614_v16 = vrot.slane %v6612_v59, 1  ;;  %v3131_v40 = vadd.f32 %v7768_v47, %v12870_v5  ;;  %v6620_v46 = vshll.u32 %v11238_v13, 16  ;;  %v11256_v14 = vcombine.low %v6462_v42, %v6463_v51  ;;  %vm12881_vm15 = vmmov %vm12871_vm2  ;;  %v11272_v42 = vpop.f32.mrf.mxu0  ;;  %v8115_v51 = vld [vmem:[#allocation2 + $0x30] sm:$0xf]  ;;  %v8116_v36 = vld [vmem:[#allocation2 + $0x34] sm:$0xf] }
 0x27f   : > { %v6599_v35 = vsel %vm12872_vm1, %v6594_v19, %v6598_v60  ;;  %v6608_v6 = vshrl.u32 %v11209_v2, 16  ;;  %v6616_v63 = vshrl.u32 %v7412_v3, 16  ;;  %v3002_v1 = vpop.f32.mrf.mxu1  ;;  %v6607_v32 = vsel %vm12874_vm14, %v6602_v18, %v6606_v39  ;;  %v6434_v60 = vld [vmem:[#allocation2 + $0x6c] sm:$0xf]  ;;  %v12879_v19 = vld [vmem:[#allocation38_spill] sm:$0xff]  ;;  %vm12888_vm6 = vmmov %vm12871_vm2 }
 0x280   : > { %7971 = vmatmul.mubr.msk.bf16.vlgmr.msra.gmra.mxu1 %vm12857_vm3, %v12869_v20  ;;  %v3129_v26 = vadd.f32 %v3002_v1, %v12875_v25  ;;  %vm12877_vm8 = vcmp.ne.s16.totalorder %v12876_v50, 0  ;;  %v6465_v59 = vsel %vm12761_vm10, %v6432_v12, 0  ;;  %v12880_v2 = vld [vmem:[#allocation26_spill] sm:$0xff]  ;;  %v7376_v55 = vcombine.low %v8115_v51, %v8116_v36  ;;  %v12882_v47 = vld [vmem:[#allocation36_spill] sm:$0xff]  ;;  %v12883_v12 = vld [vmem:[#allocation49_spill] sm:$0xff] }
 0x281   : > { %7974 = vmatprep.mubr.msk.bf16.mxu1 %vm12871_vm2, %v7375_v43  ;;  %v6464_v7 = vsel %vm12877_vm8, %v6431_v45, 0  ;;  %v2712_v3 = vadd.f32 %v12880_v2, %v12879_v19  ;;  %v6610_v8 = vor.u32 %v6608_v6, %v6606_v39  ;;  %v7769_v49 = vpop.f32.mrf.mxu1  ;;  %v6618_v43 = vor.u32 %v6616_v63, %v6614_v16  ;;  %v12886_v6 = vld [vmem:[#allocation23_spill] sm:$0xff]  ;;  %v8118_v25 = vld [vmem:[#allocation2 + $0x3c] sm:$0xf]  ;;  %v11286_v19 = vpop.f32.mrf.mxu0  ;;  %vm12891_vm5 = vmmov %vm12871_vm2 }
 0x282   : > { %8009 = vmatmul.mubr.msk.bf16.gmra.mxu0 %vm12873_vm13, %v6599_v35  ;;  %v6622_v18 = vrot.slane %v6620_v46, 1  ;;  %v3132_v15 = vadd.f32 %v7769_v49, %v12882_v47  ;;  %v6628_v33 = vshll.u32 %v11256_v14, 16  ;;  %v11276_v45 = vcombine.low %v6464_v7, %v6465_v59  ;;  %v8117_v46 = vld [vmem:[#allocation2 + $0x38] sm:$0xf]  ;;  %v6435_v59 = vld [vmem:[#allocation2 + $0x70] sm:$0xf]  ;;  %vm12892_vm3 = vmmov %vm12871_vm2 }
 0x283   : > { %8012 = vmatprep.mubr.msk.bf16.mxu0 %vm12881_vm15, %v6607_v32  ;;  %v3005_v20 = vpop.f32.mrf.mxu1  ;;  %vm12884_vm10 = vcmp.ne.s16.totalorder %v12883_v12, 0  ;;  %v6467_v35 = vsel %vm12775_vm9, %v6434_v60, 0  ;;  %v7387_v1 = vcombine.low %v12886_v6, %v11023_v23  ;;  %v6624_v32 = vshrl.u32 %v11238_v13, 16  ;;  %vm12889_vm9 = vmmov %vm12872_vm1  ;;  %v12890_v49 = vld [vmem:[#allocation37_spill] sm:$0xff] }
 0x284   : > { %v6466_v39 = vsel %vm12884_vm10, %v6433_v57, 0  ;;  %v3130_v63 = vadd.f32 %v3005_v20, %v2712_v3  ;;  %v7377_v50 = vcombine.low %v8117_v46, %v8118_v25  ;;  %v6615_v34 = vsel %vm12887_vm7, %v6610_v8, %v6614_v16  ;;  %v6436_v57 = vld [vmem:[#allocation2 + $0x74] sm:$0xf]  ;;  %vm12899_vm1 = vmmov %vm12892_vm3 }
 0x285   : > { %v7772_v7 = vpop.f32.mrf.mxu1  ;;  %v11292_v2 = vadd.f32 %v11115_v41, %v3131_v40  ;;  %v11295_v13 = vadd.f32 %v11137_v30, %v3129_v26  ;;  %v6623_v3 = vsel %vm12889_vm9, %v6618_v43, %v6622_v18  ;;  %v6632_v8 = vshrl.u32 %v11256_v14, 16  ;;  %v12893_v40 = vld [vmem:[#allocation39_spill] sm:$0xff]  ;;  %v12894_v43 = vld [vmem:[#allocation50_spill] sm:$0xff]  ;;  %v12898_v5 = vld [vmem:[#allocation33_spill] sm:$0xff] }
 0x286   : > { %v3135_v16 = vadd.f32 %v7772_v7, %v12890_v49  ;;  %v11301_v51 = vcombine.low %v6466_v39, %v6467_v35  ;;  %v6630_v36 = vrot.slane %v6628_v33, 1  ;;  %v11305_v41 = vadd.f32 %v11149_v62, %v3132_v15  ;;  %v12897_v39 = vld [vmem:[#allocation9_spill] sm:$0xff]  ;;  %vm12906_vm14 = vmmov %vm12899_vm1 }
 0x287   : > { %v3018_v47 = vpop.f32.mrf.mxu1  ;;  %v11308_v30 = vadd.f32 %v11166_v11, %v3130_v63  ;;  %vm12895_vm2 = vcmp.ne.s16.totalorder %v12894_v43, 0  ;;  %v6469_v12 = vsel %vm12785_vm11, %v6436_v57, 0  ;;  %v2728_v62 = vadd.f32 %v12898_v5, %v12897_v39  ;;  %v11322_v11 = vpop.f32.mrf.mxu0  ;;  %v12900_v63 = vld [vmem:[#allocation40_spill] sm:$0xff]  ;;  %v6439_v39 = vld [vmem:[#allocation2 + $0x80] sm:$0xf]  ;;  %vm12901_vm11 = vmmov %vm12899_vm1 }
 0x288   : > { %7975 = vmatmul.mubr.msk.bf16.gmra.mxu1 %vm12888_vm6, %v7376_v55  ;;  %v6636_v55 = vshll.u32 %v11276_v45, 16  ;;  %v3133_v26 = vadd.f32 %v3018_v47, %v12893_v40  ;;  %v6468_v14 = vsel %vm12895_vm2, %v6435_v59, 0  ;;  %v11317_v33 = vadd.f32 %v11175_v54, %v3135_v16  ;;  %v8119_v16 = vld [vmem:[#allocation2 + $0x40] sm:$0xf]  ;;  %v8122_v43 = vld [vmem:[#allocation2 + $0x4c] sm:$0xf]  ;;  %vm12907_vm8 = vmmov %vm12887_vm7 }
 0x289   : > { %7978 = vmatprep.mubr.msk.bf16.mxu1 %vm12891_vm5, %v7377_v50  ;;  %v7773_v15 = vpop.f32.mrf.mxu1  ;;  %v6626_v35 = vor.u32 %v6624_v32, %v6622_v18  ;;  %v6644_v25 = vshll.u32 %v11301_v51, 16  ;;  %v6437_v50 = vld [vmem:[#allocation2 + $0x78] sm:$0xf]  ;;  %v6634_v54 = vor.u32 %v6632_v8, %v6630_v36  ;;  %v11329_v57 = vpop.f32.mrf.mxu0  ;;  %v11331_v40 = vcombine.low %v6468_v14, %v6469_v12  ;;  %v8121_v32 = vld [vmem:[#allocation2 + $0x48] sm:$0xf]  ;;  %vm12908_vm15 = vmmov %vm12887_vm7 }
 0x28a   : > { %8013 = vmatmul.mubr.msk.bf16.gmra.mxu0 %vm12892_vm3, %v6615_v34  ;;  %v3136_v46 = vadd.f32 %v7773_v15, %v12900_v63  ;;  %v6438_v34 = vld [vmem:[#allocation2 + $0x7c] sm:$0xf]  ;;  %v11327_v7 = vadd.f32 %v11196_v22, %v3133_v26  ;;  %v6638_v59 = vrot.slane %v6636_v55, 1  ;;  %v7379_v20 = vcombine.low %v8121_v32, %v8122_v43  ;;  %v12902_v26 = vld [vmem:[#allocation52_spill] sm:$0xff]  ;;  %vm12911_vm10 = vmmov %vm12899_vm1 }
 0x28b   : > { %8016 = vmatprep.mubr.msk.bf16.mxu0 %vm12899_vm1, %v6623_v3  ;;  %v3021_v49 = vpop.f32.mrf.mxu1  ;;  %v8120_v3 = vld [vmem:[#allocation2 + $0x44] sm:$0xf]  ;;  %v6640_v22 = vshrl.u32 %v11276_v45, 16  ;;  %v11337_v8 = vpop.f32.mrf.mxu0  ;;  %vm12903_vm13 = vcmp.ne.s16.totalorder %v12902_v26, 0  ;;  %v6471_v12 = vsel %vm12795_vm0, %v6438_v34, 0  ;;  %v6646_v63 = vrot.slane %v6644_v25, 1  ;;  %vm12914_vm7 = vmmov %vm12899_vm1 }
 0x28c   : > { %v7378_v47 = vcombine.low %v8119_v16, %v8120_v3  ;;  %v3134_v18 = vadd.f32 %v3021_v49, %v2728_v62  ;;  %v11334_v5 = vadd.f32 %v11212_v52, %v3136_v46  ;;  %v6470_v15 = vsel %vm12903_vm13, %v6437_v50, 0  ;;  %v6440_v62 = vld [vmem:[#allocation2 + $0x84] sm:$0xf]  ;;  %v12905_v49 = vld [vmem:[#allocation13_spill] sm:$0xff]  ;;  %v12909_v32 = vld [vmem:[#allocation54_spill] sm:$0xff] }
 0x28d   : > { %v7776_v55 = vpop.f32.mrf.mxu1  ;;  %v6648_v52 = vshrl.u32 %v11301_v51, 16  ;;  %v6631_v46 = vsel %vm12907_vm8, %v6626_v35, %v6630_v36  ;;  %v6639_v3 = vsel %vm12908_vm15, %v6634_v54, %v6638_v59  ;;  %v6652_v50 = vshll.u32 %v11331_v40, 16  ;;  %v12912_v51 = vld [vmem:[#allocation17_spill] sm:$0xff]  ;;  %v6441_v36 = vld [vmem:[#allocation2 + $0x88] sm:$0xf]  ;;  %vm12919_vm6 = vmmov %vm12899_vm1 }
 0x28e   : > { %v3139_v16 = vadd.f32 %v7776_v55, %v12905_v49  ;;  %v11348_v45 = vadd.f32 %v11233_v17, %v3134_v18  ;;  %vm12910_vm0 = vcmp.ne.s16.totalorder %v12909_v32, 0  ;;  %v6473_v18 = vsel %vm12806_vm4, %v6440_v62, 0  ;;  %v12915_v49 = vld [vmem:[#allocation18_spill] sm:$0xff]  ;;  %vm12921_vm9 = vmmov %vm12899_vm1 }
 0x28f   : > { %v3034_v34 = vpop.f32.mrf.mxu1  ;;  %v6472_v25 = vsel %vm12910_vm0, %v6439_v39, 0  ;;  %v6642_v54 = vor.u32 %v6640_v22, %v6638_v59  ;;  %v6442_v39 = vld [vmem:[#allocation2 + $0x8c] sm:$0xf]  ;;  %v6650_v14 = vor.u32 %v6648_v52, %v6646_v63  ;;  %v6654_v62 = vrot.slane %v6652_v50, 1  ;;  %v8125_v59 = vld [vmem:[#allocation2 + $0x58] sm:$0xf]  ;;  %vm12922_vm5 = vmmov %vm12907_vm8 }
 0x290   : > { %7979 = vmatmul.mubr.msk.bf16.gmra.mxu1 %vm12901_vm11, %v7378_v47  ;;  %v11352_v47 = vpop.f32.mrf.mxu0  ;;  %v3137_v43 = vadd.f32 %v3034_v34, %v12912_v51  ;;  %v11364_v35 = vadd.f32 %v11247_v4, %v3139_v16  ;;  %v8123_v34 = vld [vmem:[#allocation2 + $0x50] sm:$0xf]  ;;  %v11373_v4 = vcombine.low %v6472_v25, %v6473_v18  ;;  %v8126_v22 = vld [vmem:[#allocation2 + $0x5c] sm:$0xf]  ;;  %vm12924_vm3 = vmmov %vm12899_vm1  ;;  %vm12928_vm11 = vnez %v12829_v24 }
 0x291   : > { %7982 = vmatprep.mubr.msk.bf16.mxu1 %vm12906_vm14, %v7379_v20  ;;  %v11359_v20 = vcombine.low %v6470_v15, %v6471_v12  ;;  %v7777_v26 = vpop.f32.mrf.mxu1  ;;  %v8124_v15 = vld [vmem:[#allocation2 + $0x54] sm:$0xf]  ;;  %v7381_v16 = vcombine.low %v8125_v59, %v8126_v22  ;;  %v12918_v52 = vld [vmem:[#allocation42_spill] sm:$0xff]  ;;  %v6647_v53 = vsel %vm12922_vm5, %v6642_v54, %v6646_v63  ;;  %vm12926_vm2 = vmmov %vm12899_vm1  ;;  %vm12927_vm1 = vcmp.ne.s16.totalorder %v12827_v9, 0 }
 0x292   : > { %8017 = vmatmul.mubr.msk.bf16.gmra.mxu0 %vm12911_vm10, %v6631_v46  ;;  %v11367_v55 = vpop.f32.mrf.mxu0  ;;  %v3140_v46 = vadd.f32 %v7777_v26, %v12915_v49  ;;  %v7380_v12 = vcombine.low %v8123_v34, %v8124_v15  ;;  %v11371_v32 = vadd.f32 %v11260_v56, %v3137_v43  ;;  %v6475_v56 = vsel %vm12821_vm12, %v6442_v39, 0  ;;  %v12920_v18 = vld [vmem:[#allocation22_spill] sm:$0xff]  ;;  %v6444_v15 = vld [vmem:[#allocation2 + $0x94] sm:$0xf]  ;;  %vm12923_vm12 = vmmov %vm12922_vm5 }
 0x293   : > { %8020 = vmatprep.mubr.msk.bf16.mxu0 %vm12914_vm7, %v6639_v3  ;;  %v3037_v51 = vpop.f32.mrf.mxu1  ;;  %v12916_v3 = vld [vmem:[#allocation56_spill] sm:$0xff]  ;;  %v6660_v49 = vshll.u32 %v11359_v20, 16  ;;  %v6656_v43 = vshrl.u32 %v11331_v40, 16  ;;  %v6655_v39 = vsel %vm12923_vm12, %v6650_v14, %v6654_v62  ;;  %v6664_v22 = vshrl.u32 %v11359_v20, 16  ;;  %v6445_v9 = vld [vmem:[#allocation2 + $0x98] sm:$0x1]  ;;  %vm12931_vm13 = vmmov %vm12926_vm2 }
 0x294   : > { %vm12917_vm4 = vcmp.ne.s16.totalorder %v12916_v3, 0  ;;  %v11377_v60 = vpop.f32.mrf.mxu0  ;;  %v3138_v26 = vadd.f32 %v3037_v51, %v12918_v52  ;;  %v11384_v50 = vadd.f32 %v11272_v42, %v3140_v46  ;;  %v6668_v42 = vshll.u32 %v11373_v4, 16  ;;  %v12930_v24 = vld [vmem:[#allocation32_spill] sm:$0xff]  ;;  %vm12933_vm14 = vmmov %vm12926_vm2 }
 0x295   : > { %v6474_v17 = vsel %vm12917_vm4, %v6441_v36, 0  ;;  %v7780_v25 = vpop.f32.mrf.mxu1  ;;  %v6443_v36 = vld [vmem:[#allocation2 + $0x90] sm:$0xf]  ;;  %v6477_v54 = vsel %vm12928_vm11, %v6444_v15, 0  ;;  %v6658_v14 = vor.u32 %v6656_v43, %v6654_v62  ;;  %vm12934_vm8 = vnez %v12835_v27  ;;  %vm12935_vm15 = vmmov %vm12922_vm5 }
 0x296   : > { %v3143_v34 = vadd.f32 %v7780_v25, %v12920_v18  ;;  %v11391_v51 = vadd.f32 %v11286_v19, %v3138_v26  ;;  %v7420_v59 = vcombine.low %v6474_v17, %v6475_v56  ;;  %v7819_v40 = vpop.f32.mrf.mxu0  ;;  %v6476_v63 = vsel %vm12927_vm1, %v6443_v36, 0  ;;  %v12929_v17 = vld [vmem:[#allocation4_spill] sm:$0xff]  ;;  %v8128_v18 = vld [vmem:[#allocation2 + $0x64] sm:$0xf]  ;;  %vm12936_vm0 = vmmov %vm12926_vm2 }
 0x297   : > { %v3050_v46 = vpop.f32.mrf.mxu1  ;;  %v6670_v20 = vrot.slane %v6668_v42, 1  ;;  %v7421_v62 = vcombine.low %v6476_v63, %v6477_v54  ;;  %v12932_v42 = vld [vmem:[#allocation21_spill] sm:$0xff]  ;;  %v6672_v63 = vshrl.u32 %v11373_v4, 16  ;;  %vm12937_vm10 = vmmov %vm12922_vm5 }
 0x298   : > { %7983 = vmatmul.mubr.msk.bf16.gmra.mxu1 %vm12919_vm6, %v7380_v12  ;;  %v6662_v12 = vrot.slane %v6660_v49, 1  ;;  %v11400_v52 = vadd.f32 %v11322_v11, %v3143_v34  ;;  %v6676_v25 = vshll.u32 %v7420_v59, 16  ;;  %v8127_v11 = vld [vmem:[#allocation2 + $0x60] sm:$0xf]  ;;  %v4048_v36 = vpop.f32.mrf.mxu0  ;;  %vm12939_vm7 = vmmov %vm12936_vm0  ;;  %v12940_v4 = vld [vmem:[#allocation41_spill] sm:$0xff] }
 0x299   : > { %7986 = vmatprep.mubr.msk.bf16.mxu1 %vm12921_vm9, %v7381_v16  ;;  %v12925_v16 = vld [vmem:[#allocation6_spill] sm:$0xff]  ;;  %v7781_v19 = vpop.f32.mrf.mxu1  ;;  %v7382_v34 = vcombine.low %v8127_v11, %v8128_v18  ;;  %v6684_v18 = vshll.u32 %v7421_v62, 16  ;;  %vm12943_vm4 = vmmov %vm12936_vm0 }
 0x29a   : > { %8021 = vmatmul.mubr.msk.bf16.gmra.mxu0 %vm12924_vm3, %v6647_v53  ;;  %v3141_v3 = vadd.f32 %v3050_v46, %v12925_v16  ;;  %v3144_v26 = vadd.f32 %v7781_v19, %v12929_v17  ;;  %v8129_v53 = vld [vmem:[#allocation2 + $0x68] sm:$0xf]  ;;  %v6666_v16 = vor.u32 %v6664_v22, %v6662_v12  ;;  %v6478_v19 = vsel %vm12934_vm8, %v6445_v9, 0  ;;  %v8131_v9 = vld [vmem:[#allocation2 + $0x70] sm:$0xf]  ;;  %vm12945_vm6 = vmmov %vm12936_vm0 }
 0x29b   : > { %8024 = vmatprep.mubr.msk.bf16.mxu0 %vm12926_vm2, %v6655_v39  ;;  %v3053_v56 = vpop.f32.mrf.mxu1  ;;  %v8130_v39 = vld [vmem:[#allocation2 + $0x6c] sm:$0xf]  ;;  %v6663_v22 = vsel %vm12935_vm15, %v6658_v14, %v6662_v12  ;;  %v6678_v54 = vrot.slane %v6676_v25, 1  ;;  %v7422_v12 = vcombine.low %v6478_v19, %v6478_v19  ;;  %vm12946_vm9 = vmmov %vm12922_vm5  ;;  %vm6972_vm8 = vcmask 130048  }
 0x29c   : > { %v11409_v49 = vadd.f32 %v11329_v57, %v3141_v3  ;;  %v7383_v46 = vcombine.low %v8129_v53, %v8130_v39  ;;  %v3142_v15 = vadd.f32 %v3053_v56, %v12930_v24  ;;  %v11413_v43 = vadd.f32 %v11337_v8, %v3144_v26  ;;  %v7822_v56 = vpop.f32.mrf.mxu0  ;;  %vm12947_vm5 = vmmov %vm12936_vm0 }
 0x29d   : > { %v7784_v57 = vpop.f32.mrf.mxu1  ;;  %v6680_v8 = vshrl.u32 %v7420_v59, 16  ;;  %v6671_v11 = vsel %vm12937_vm10, %v6666_v16, %v6670_v20  ;;  %v6674_v39 = vor.u32 %v6672_v63, %v6670_v20  ;;  %v8132_v16 = vld [vmem:[#allocation2 + $0x74] sm:$0xf]  ;;  %vm12948_vm12 = vmmov %vm12946_vm9 }
 0x29e   : > { %v3147_v3 = vadd.f32 %v7784_v57, %v12932_v42  ;;  %v11421_v17 = vadd.f32 %v11352_v47, %v3142_v15  ;;  %v4061_v14 = vpop.f32.mrf.mxu0  ;;  %v7384_v24 = vcombine.low %v8131_v9, %v8132_v16  ;;  %v8133_v15 = vld [vmem:[#allocation2 + $0x78] sm:$0xf]  ;;  %v12941_v57 = vld [vmem:[#allocation12_spill] sm:$0xff]  ;;  %v12944_v63 = vld [vmem:[#allocation45_spill] sm:$0xff] }
 0x29f   : > { %v3066_v26 = vpop.f32.mrf.mxu1  ;;  %v7385_v42 = vcombine.low %v8133_v15, %v12941_v57  ;;  %v6679_v9 = vsel %vm12946_vm9, %v6674_v39, %v6678_v54  ;;  %vm12950_vm3 = vmmov %vm12936_vm0  ;;  %v8134_v39 = vld [vmem:[#allocation2 + $0x80] sm:$0xf] }
 0x2a0   : > { %7987 = vmatmul.mubr.msk.bf16.gmra.mxu1 %vm12931_vm13, %v7382_v34  ;;  %v12938_v34 = vld [vmem:[#allocation19_spill] sm:$0xff]  ;;  %v11429_v27 = vadd.f32 %v11367_v55, %v3147_v3  ;;  %v7823_v55 = vpop.f32.mrf.mxu0  ;;  %v6682_v3 = vor.u32 %v6680_v8, %v6678_v54  ;;  %vm12952_vm2 = vmmov %vm12936_vm0 }
 0x2a1   : > { %7990 = vmatprep.mubr.msk.bf16.mxu1 %vm12933_vm14, %v7383_v46  ;;  %v3145_v53 = vadd.f32 %v3066_v26, %v12938_v34  ;;  %v7785_v47 = vpop.f32.mrf.mxu1  ;;  %v12942_v26 = vld [vmem:[#allocation14_spill] sm:$0xff]  ;;  %v6688_v34 = vshrl.u32 %v7421_v62, 16  ;;  %v12949_v62 = vld [vmem:[#allocation28_spill] sm:$0xff]  ;;  %vm12953_vm1 = vmmov %vm12946_vm9 }
 0x2a2   : > { %8025 = vmatmul.mubr.msk.bf16.gmra.mxu0 %vm12936_vm0, %v6663_v22  ;;  %v3148_v25 = vadd.f32 %v7785_v47, %v12940_v4  ;;  %v6686_v22 = vrot.slane %v6684_v18, 1  ;;  %v4064_v20 = vpop.f32.mrf.mxu0  ;;  %vm12954_vm11 = vmmov %vm12936_vm0 }
 0x2a3   : > { %8028 = vmatprep.mubr.msk.bf16.mxu0 %vm12939_vm7, %v6671_v11  ;;  %v11434_v59 = vadd.f32 %v11377_v60, %v3145_v53  ;;  %v3069_v46 = vpop.f32.mrf.mxu1  ;;  %v6692_v60 = vshll.u32 %v7422_v12, 16  ;;  %vm12955_vm13 = vmmov %vm12936_vm0 }
 0x2a4   : > { %v3146_v11 = vadd.f32 %v3069_v46, %v12942_v26  ;;  %v11438_v19 = vadd.f32 %v7819_v40, %v3148_v25  ;;  %v7826_v18 = vpop.f32.mrf.mxu0  ;;  %v6687_v40 = vsel %vm12948_vm12, %v6682_v3, %v6686_v22  ;;  %v6690_v12 = vor.u32 %v6688_v34, %v6686_v22  ;;  %vm12957_vm14 = vmmov %vm12936_vm0 }
 0x2a5   : > { %v7788_v47 = vpop.f32.mrf.mxu1 }
 0x2a6   : > { %v3151_v53 = vadd.f32 %v7788_v47, %v12944_v63  ;;  %v11443_v4 = vadd.f32 %v4048_v36, %v3146_v11  ;;  %v4077_v15 = vpop.f32.mrf.mxu0 }
 0x2a7   : > { %v3082_v8 = vpop.f32.mrf.mxu1 }
 0x2a8   : > { %7991 = vmatmul.mubr.msk.bf16.gmra.mxu1 %vm12943_vm4, %v7384_v24  ;;  %v3149_v25 = vadd.f32 %v3082_v8, %v12949_v62  ;;  %v11449_v46 = vadd.f32 %v7822_v56, %v3151_v53  ;;  %v6694_v24 = vrot.slane %v6692_v60, 1  ;;  %v7827_v11 = vpop.f32.mrf.mxu0 }
 0x2a9   : > { %7994 = vmatprep.mubr.msk.bf16.mxu1 %vm12945_vm6, %v7385_v42  ;;  %v7789_v16 = vpop.f32.mrf.mxu1  ;;  %v12951_v42 = vld [vmem:[#allocation24_spill] sm:$0xff] }
 0x2aa   : > { %8029 = vmatmul.mubr.msk.bf16.gmra.mxu0 %vm12947_vm5, %v6679_v9  ;;  %v3152_v36 = vadd.f32 %v7789_v16, %v11124_v37  ;;  %v11453_v57 = vadd.f32 %v4061_v14, %v3149_v25  ;;  %v7386_v26 = vcombine.low %v8134_v39, %v12951_v42  ;;  %v6695_v22 = vsel %vm12953_vm1, %v6690_v12, %v6694_v24  ;;  %v4080_v34 = vpop.f32.mrf.mxu0 }
 0x2ab   : > { %8032 = vmatprep.mubr.msk.bf16.mxu0 %vm12950_vm3, %v6687_v40  ;;  %v3085_v54 = vpop.f32.mrf.mxu1 }
 0x2ac   : > { %v3150_v3 = vadd.f32 %v3085_v54, %v11135_v31  ;;  %v11457_v47 = vadd.f32 %v7823_v55, %v3152_v36  ;;  %v7830_v63 = vpop.f32.mrf.mxu0 }
 0x2ad   : > { %v7792_v56 = vpop.f32.mrf.mxu1 }
 0x2ae   : > { %v3155_v60 = vadd.f32 %v7792_v56, %v11178_v29  ;;  %v11466_v37 = vadd.f32 %v4064_v20, %v3150_v3  ;;  %v4093_v9 = vpop.f32.mrf.mxu0 }
 0x2af   : > { %v3098_v14 = vpop.f32.mrf.mxu1 }
 0x2b0   : > { %7995 = vmatmul.mubr.msk.bf16.gmra.mxu1 %vm12952_vm2, %v7386_v26  ;;  %v3153_v31 = vadd.f32 %v3098_v14, %v11189_v58  ;;  %v11470_v55 = vadd.f32 %v7826_v18, %v3155_v60  ;;  %v7831_v23 = vpop.f32.mrf.mxu0  ;;  %v12956_v58 = vcombine.low %v11028_v21, %v11080_v61 }
 0x2b1   : > { %7998 = vmatprep.mubr.msk.bf16.mxu1 %vm12954_vm11, %v7387_v1  ;;  %v7793_v53 = vpop.f32.mrf.mxu1 }
 0x2b2   : > { %8033 = vmatmul.mubr.msk.bf16.gmra.mxu0 %vm12955_vm13, %v6695_v22  ;;  %v3156_v8 = vadd.f32 %v7793_v53, %v11199_v0  ;;  %v11473_v29 = vadd.f32 %v4077_v15, %v3153_v31  ;;  %v4096_v18 = vpop.f32.mrf.mxu0 }
 0x2b3   : > { %v3101_v40 = vpop.f32.mrf.mxu1 }
 0x2b4   : > { %v3154_v6 = vadd.f32 %v3101_v40, %v11206_v38  ;;  %v11476_v1 = vadd.f32 %v7827_v11, %v3156_v8  ;;  %v7870_v12 = vpop.f32.mrf.mxu0 }
 0x2b5   : > { %v7796_v20 = vpop.f32.mrf.mxu1 }
 0x2b6   : > { %v3159_v62 = vadd.f32 %v7796_v20, %v11217_v28  ;;  %v11483_v25 = vadd.f32 %v4080_v34, %v3154_v6  ;;  %v4854_v15 = vpop.f32.mrf.mxu0 }
 0x2b7   : > { %v3114_v0 = vpop.f32.mrf.mxu1 }
 0x2b8   : > { %7999 = vmatmul.mubr.msk.bf16.gmra.mxu1 %vm12957_vm14, %v12956_v58  ;;  %v3157_v16 = vadd.f32 %v3114_v0, %v11229_v44  ;;  %v11486_v24 = vadd.f32 %v7830_v63, %v3159_v62  ;;  %v7871_v61 = vpop.f32.mrf.mxu0 }
 0x2b9   : > { %v7797_v38 = vpop.f32.mrf.mxu1 }
 0x2ba   : > { %v3160_v36 = vadd.f32 %v7797_v38, %v11236_v48  ;;  %v11489_v54 = vadd.f32 %v4093_v9, %v3157_v16  ;;  %v4857_v26 = vpop.f32.mrf.mxu0 }
 0x2bb   : > { %v3117_v21 = vpop.f32.mrf.mxu1 }
 0x2bc   : > { %v3158_v39 = vadd.f32 %v3117_v21, %v11245_v10  ;;  %v11492_v42 = vadd.f32 %v7831_v23, %v3160_v36  ;;  %v7874_v56 = vpop.f32.mrf.mxu0 }
 0x2bd   : > { %v7836_v28 = vpop.f32.mrf.mxu1 }
 0x2be   : > { %v4657_v11 = vadd.f32 %v7836_v28, %v11292_v2  ;;  %v11495_v3 = vadd.f32 %v4096_v18, %v3158_v39  ;;  %v4870_v60 = vpop.f32.mrf.mxu0 }
 0x2bf   : > { %v4528_v44 = vpop.f32.mrf.mxu1 }
 0x2c0   : > { %v4655_v22 = vadd.f32 %v4528_v44, %v11295_v13  ;;  %v11498_v34 = vadd.f32 %v7870_v12, %v4657_v11  ;;  %v7875_v31 = vpop.f32.mrf.mxu0 }
 0x2c1   : > { %v7837_v48 = vpop.f32.mrf.mxu1 }
 0x2c2   : > { %v4658_v14 = vadd.f32 %v7837_v48, %v11305_v41  ;;  %v11501_v63 = vadd.f32 %v4854_v15, %v4655_v22  ;;  %v4873_v8 = vpop.f32.mrf.mxu0 }
 0x2c3   : > { %v4531_v10 = vpop.f32.mrf.mxu1 }
 0x2c4   : > { %v4656_v53 = vadd.f32 %v4531_v10, %v11308_v30  ;;  %v11504_v9 = vadd.f32 %v7871_v61, %v4658_v14  ;;  %v7878_v6 = vpop.f32.mrf.mxu0 }
 0x2c5   : > { %v7840_v2 = vpop.f32.mrf.mxu1 }
 0x2c6   : > { %v4661_v40 = vadd.f32 %v7840_v2, %v11317_v33  ;;  %v11507_v23 = vadd.f32 %v4857_v26, %v4656_v53  ;;  %v4886_v18 = vpop.f32.mrf.mxu0 }
 0x2c7   : > { %v4544_v13 = vpop.f32.mrf.mxu1 }
 0x2c8   : > { %v4659_v20 = vadd.f32 %v4544_v13, %v11327_v7  ;;  %v11510_v58 = vadd.f32 %v7874_v56, %v4661_v40  ;;  %v7879_v12 = vpop.f32.mrf.mxu0 }
 0x2c9   : > { %v7841_v41 = vpop.f32.mrf.mxu1 }
 0x2ca   : > { %v4662_v62 = vadd.f32 %v7841_v41, %v11334_v5  ;;  %v11513_v0 = vadd.f32 %v4870_v60, %v4659_v20  ;;  %v4889_v15 = vpop.f32.mrf.mxu0 }
 0x2cb   : > { %v4547_v30 = vpop.f32.mrf.mxu1 }
 0x2cc   : > { %v4660_v16 = vadd.f32 %v4547_v30, %v11348_v45  ;;  %v11516_v38 = vadd.f32 %v7875_v31, %v4662_v62  ;;  %v7882_v61 = vpop.f32.mrf.mxu0 }
 0x2cd   : > { %v7844_v33 = vpop.f32.mrf.mxu1 }
 0x2ce   : > { %v4665_v36 = vadd.f32 %v7844_v33, %v11364_v35  ;;  %v11519_v21 = vadd.f32 %v4873_v8, %v4660_v16  ;;  %v4902_v26 = vpop.f32.mrf.mxu0 }
 0x2cf   : > { %v4560_v7 = vpop.f32.mrf.mxu1 }
 0x2d0   : > { %v4663_v39 = vadd.f32 %v4560_v7, %v11371_v32  ;;  %v11522_v28 = vadd.f32 %v7878_v6, %v4665_v36  ;;  %v7883_v56 = vpop.f32.mrf.mxu0 }
 0x2d1   : > { %v7845_v5 = vpop.f32.mrf.mxu1 }
 0x2d2   : > { %v4666_v11 = vadd.f32 %v7845_v5, %v11384_v50  ;;  %v11525_v44 = vadd.f32 %v4886_v18, %v4663_v39  ;;  %v4905_v60 = vpop.f32.mrf.mxu0 }
 0x2d3   : > { %v4563_v45 = vpop.f32.mrf.mxu1 }
 0x2d4   : > { %v4664_v22 = vadd.f32 %v4563_v45, %v11391_v51  ;;  %v11528_v48 = vadd.f32 %v7879_v12, %v4666_v11  ;;  %v7886_v31 = vpop.f32.mrf.mxu0 }
 0x2d5   : > { %v7848_v35 = vpop.f32.mrf.mxu1 }
 0x2d6   : > { %v4669_v14 = vadd.f32 %v7848_v35, %v11400_v52  ;;  %v11531_v10 = vadd.f32 %v4889_v15, %v4664_v22  ;;  %v4918_v8 = vpop.f32.mrf.mxu0 }
 0x2d7   : > { %v4576_v32 = vpop.f32.mrf.mxu1 }
 0x2d8   : > { %v4667_v53 = vadd.f32 %v4576_v32, %v11409_v49  ;;  %v11534_v2 = vadd.f32 %v7882_v61, %v4669_v14  ;;  %v7887_v6 = vpop.f32.mrf.mxu0 }
 0x2d9   : > { %v7849_v50 = vpop.f32.mrf.mxu1 }
 0x2da   : > { %v4670_v40 = vadd.f32 %v7849_v50, %v11413_v43  ;;  %v11537_v13 = vadd.f32 %v4902_v26, %v4667_v53  ;;  %v4921_v18 = vpop.f32.mrf.mxu0 }
 0x2db   : > { %v4579_v51 = vpop.f32.mrf.mxu1 }
 0x2dc   : > { %v4668_v20 = vadd.f32 %v4579_v51, %v11421_v17  ;;  %v11540_v41 = vadd.f32 %v7883_v56, %v4670_v40  ;;  %v7890_v12 = vpop.f32.mrf.mxu0 }
 0x2dd   : > { %v7852_v52 = vpop.f32.mrf.mxu1 }
 0x2de   : > { %v4673_v62 = vadd.f32 %v7852_v52, %v11429_v27  ;;  %v11543_v30 = vadd.f32 %v4905_v60, %v4668_v20  ;;  %v4934_v15 = vpop.f32.mrf.mxu0 }
 0x2df   : > { %v4592_v49 = vpop.f32.mrf.mxu1 }
 0x2e0   : > { %v4671_v16 = vadd.f32 %v4592_v49, %v11434_v59  ;;  %v11546_v33 = vadd.f32 %v7886_v31, %v4673_v62  ;;  %v7891_v61 = vpop.f32.mrf.mxu0 }
 0x2e1   : > { %v7853_v43 = vpop.f32.mrf.mxu1 }
 0x2e2   : > { %v4674_v36 = vadd.f32 %v7853_v43, %v11438_v19  ;;  %v11549_v7 = vadd.f32 %v4918_v8, %v4671_v16  ;;  %v4937_v26 = vpop.f32.mrf.mxu0 }
 0x2e3   : > { %v4595_v17 = vpop.f32.mrf.mxu1 }
 0x2e4   : > { %v4672_v39 = vadd.f32 %v4595_v17, %v11443_v4  ;;  %v11552_v5 = vadd.f32 %v7887_v6, %v4674_v36  ;;  %v7894_v56 = vpop.f32.mrf.mxu0 }
 0x2e5   : > { %v7856_v27 = vpop.f32.mrf.mxu1 }
 0x2e6   : > { %12958 = vst [vmem:[#allocation10_spill] sm:$0xff] %v11552_v5  ;;  %v4677_v11 = vadd.f32 %v7856_v27, %v11449_v46  ;;  %v11555_v45 = vadd.f32 %v4921_v18, %v4672_v39  ;;  %v4950_v60 = vpop.f32.mrf.mxu0 }
 0x2e7   : > { %v4608_v59 = vpop.f32.mrf.mxu1 }
 0x2e8   : > { %12959 = vst [vmem:[#allocation15_spill] sm:$0xff] %v11555_v45  ;;  %v4675_v22 = vadd.f32 %v4608_v59, %v11453_v57  ;;  %v11558_v35 = vadd.f32 %v7890_v12, %v4677_v11  ;;  %v7895_v31 = vpop.f32.mrf.mxu0 }
 0x2e9   : > { %v7857_v19 = vpop.f32.mrf.mxu1 }
 0x2ea   : > { %12960 = vst [vmem:[#allocation47_spill] sm:$0xff] %v11558_v35  ;;  %v4678_v14 = vadd.f32 %v7857_v19, %v11457_v47  ;;  %v11561_v32 = vadd.f32 %v4934_v15, %v4675_v22  ;;  %v4953_v8 = vpop.f32.mrf.mxu0 }
 0x2eb   : > { %v4611_v4 = vpop.f32.mrf.mxu1 }
 0x2ec   : > { %12961 = vst [vmem:[#allocation25_spill] sm:$0xff] %v11561_v32  ;;  %v4676_v53 = vadd.f32 %v4611_v4, %v11466_v37  ;;  %v11564_v50 = vadd.f32 %v7891_v61, %v4678_v14  ;;  %v7898_v6 = vpop.f32.mrf.mxu0 }
 0x2ed   : > { %v7860_v46 = vpop.f32.mrf.mxu1 }
 0x2ee   : > { %12962 = vst [vmem:[#allocation46_spill] sm:$0xff] %v11564_v50  ;;  %v4681_v40 = vadd.f32 %v7860_v46, %v11470_v55  ;;  %v11567_v51 = vadd.f32 %v4937_v26, %v4676_v53  ;;  %v4966_v18 = vpop.f32.mrf.mxu0 }
 0x2ef   : > { %v4624_v57 = vpop.f32.mrf.mxu1 }
 0x2f0   : > { %12963 = vst [vmem:[#allocation11_spill] sm:$0xff] %v11567_v51  ;;  %v4679_v20 = vadd.f32 %v4624_v57, %v11473_v29  ;;  %v11570_v52 = vadd.f32 %v7894_v56, %v4681_v40  ;;  %v7899_v12 = vpop.f32.mrf.mxu0 }
 0x2f1   : > { %v7861_v47 = vpop.f32.mrf.mxu1 }
 0x2f2   : > { %12964 = vst [vmem:[#allocation16_spill] sm:$0xff] %v11570_v52  ;;  %v4682_v62 = vadd.f32 %v7861_v47, %v11476_v1  ;;  %v11573_v49 = vadd.f32 %v4950_v60, %v4679_v20  ;;  %v4969_v15 = vpop.f32.mrf.mxu0 }
 0x2f3   : > { %v4627_v37 = vpop.f32.mrf.mxu1 }
 0x2f4   : > { %12965 = vst [vmem:[#allocation43_spill] sm:$0xff] %v11573_v49  ;;  %v4680_v16 = vadd.f32 %v4627_v37, %v11483_v25  ;;  %v11576_v43 = vadd.f32 %v7895_v31, %v4682_v62  ;;  %v11581_v61 = vpop.f32.mrf.mxu0 }
 0x2f5   : > { %v7864_v55 = vpop.f32.mrf.mxu1 }
 0x2f6   : > { %12966 = vst [vmem:[#allocation44_spill] sm:$0xff] %v11576_v43  ;;  %v4685_v36 = vadd.f32 %v7864_v55, %v11486_v24  ;;  %v11579_v17 = vadd.f32 %v4953_v8, %v4680_v16  ;;  %v11586_v26 = vpop.f32.mrf.mxu0 }
 0x2f7   : > { %v4640_v29 = vpop.f32.mrf.mxu1 }
 0x2f8   : > { %12967 = vst [vmem:[#allocation27_spill] sm:$0xff] %v11579_v17  ;;  %v4683_v39 = vadd.f32 %v4640_v29, %v11489_v54  ;;  %v11584_v1 = vadd.f32 %v7898_v6, %v4685_v36  ;;  %v11591_v56 = vpop.f32.mrf.mxu0 }
 0x2f9   : > { %v7865_v27 = vpop.f32.mrf.mxu1 }
 0x2fa   : > { %12968 = vst [vmem:[#allocation5_spill] sm:$0xff] %v11584_v1  ;;  %v4686_v25 = vadd.f32 %v7865_v27, %v11492_v42  ;;  %v11589_v11 = vadd.f32 %v4966_v18, %v4683_v39  ;;  %v11596_v60 = vpop.f32.mrf.mxu0 }
 0x2fb   : > { %v4643_v59 = vpop.f32.mrf.mxu1 }
 0x2fc   : > { %12969 = vst [vmem:[#allocation20_spill] sm:$0xff] %v11589_v11  ;;  %v4684_v24 = vadd.f32 %v4643_v59, %v11495_v3  ;;  %v11594_v22 = vadd.f32 %v7899_v12, %v4686_v25  ;;  %v11600_v4 = vpop.f32.mrf.mxu0 }
 0x2fd   : > { %v7904_v19 = vpop.f32.mrf.mxu1 }
 0x2fe   : > { %12970 = vst [vmem:[#allocation3_spill] sm:$0xff] %v11594_v22  ;;  %v11598_v54 = vadd.f32 %v4969_v15, %v4684_v24  ;;  %v11602_v53 = vpop.f32.mrf.mxu0 }
 0x2ff   : > { %v5381_v14 = vpop.f32.mrf.mxu1 }
 0x300   : > { %12971 = vst [vmem:[#allocation7_spill] sm:$0xff] %v11598_v54  ;;  %v11606_v46 = vpop.f32.mrf.mxu0 }
 0x301   : > { %v7905_v31 = vpop.f32.mrf.mxu1 }
 0x302   : > { %v11610_v3 = vpop.f32.mrf.mxu0 }
 0x303   : > { %v11604_v42 = vpop.f32.mrf.mxu1 }
 0x304   : > { %v11614_v57 = vpop.f32.mrf.mxu0 }
 0x305   : > { %v11608_v8 = vpop.f32.mrf.mxu1 }
 0x306   : > { %v11618_v20 = vpop.f32.mrf.mxu0 }
 0x307   : > { %v11612_v40 = vpop.f32.mrf.mxu1 }
 0x308   : > { %v11622_v18 = vpop.f32.mrf.mxu0 }
 0x309   : > { %v11616_v6 = vpop.f32.mrf.mxu1 }
 0x30a   : > { %v11626_v37 = vpop.f32.mrf.mxu0 }
 0x30b   : > { %v11620_v47 = vpop.f32.mrf.mxu1 }
 0x30c   : > { %v11630_v16 = vpop.f32.mrf.mxu0 }
 0x30d   : > { %v11624_v62 = vpop.f32.mrf.mxu1 }
 0x30e   : > { %v11634_v15 = vpop.f32.mrf.mxu0 }
 0x30f   : > { %v11628_v12 = vpop.f32.mrf.mxu1 }
 0x310   : > { %v11638_v29 = vpop.f32.mrf.mxu0 }
 0x311   : > { %v11632_v55 = vpop.f32.mrf.mxu1 }
 0x312   : > { %v11642_v27 = vpop.f32.mrf.mxu0 }
 0x313   : > { %v11636_v36 = vpop.f32.mrf.mxu1  ;;  %12972 = vst [vmem:[#allocation59_spill] sm:$0xff] %v11642_v27 }
 0x315   : > { %v11640_v39 = vpop.f32.mrf.mxu1 }
 0x316   : > { %v11646_v59 = vpop.f32.mrf.mxu0 }
 0x317   : > { %v11644_v25 = vpop.f32.mrf.mxu1  ;;  %12973 = vst [vmem:[#allocation58_spill] sm:$0xff] %v11646_v59 }
 0x318   : > { %v11650_v54 = vpop.f32.mrf.mxu0 }
 0x319   : > { %v11648_v24 = vpop.f32.mrf.mxu1  ;;  %12974 = vst [vmem:[#allocation61_spill] sm:$0xff] %v11650_v54 }
 0x31a   : > { %v11654_v11 = vpop.f32.mrf.mxu0 }
 0x31b   : > { %v11652_v22 = vpop.f32.mrf.mxu1  ;;  %12975 = vst [vmem:[#allocation60_spill] sm:$0xff] %v11654_v11 }
 0x31c   : > { %v11658_v17 = vpop.f32.mrf.mxu0 }
 0x31d   : > { %v11656_v1 = vpop.f32.mrf.mxu1  ;;  %12976 = vst [vmem:[#allocation31_spill] sm:$0xff] %v11658_v17 }
 0x31e   : > { %v11662_v49 = vpop.f32.mrf.mxu0 }
 0x31f   : > { %v11660_v43 = vpop.f32.mrf.mxu1  ;;  %12977 = vst [vmem:[#allocation8_spill] sm:$0xff] %v11662_v49 }
 0x320   : > { %v11666_v51 = vpop.f32.mrf.mxu0 }
 0x321   : > { %v11664_v52 = vpop.f32.mrf.mxu1  ;;  %12979 = vst [vmem:[#allocation34_spill] sm:$0xff] %v11666_v51 }
 0x322   : > { %12978 = vst [vmem:[#allocation29_spill] sm:$0xff] %v11664_v52  ;;  %v11670_v32 = vpop.f32.mrf.mxu0 }
 0x323   : > { %v11668_v50 = vpop.f32.mrf.mxu1  ;;  %12981 = vst [vmem:[#allocation30_spill] sm:$0xff] %v11670_v32 }
 0x324   : > { %12980 = vst [vmem:[#allocation35_spill] sm:$0xff] %v11668_v50  ;;  %v11674_v45 = vpop.f32.mrf.mxu0 }
 0x325   : > { %12983 = vst [vmem:[#allocation38_spill] sm:$0xff] %v11674_v45 }
 0x327   : > { %v11672_v35 = vpop.f32.mrf.mxu1 }
 0x328   : > { %12982 = vst [vmem:[#allocation48_spill] sm:$0xff] %v11672_v35 }
 0x329   : > { %v11676_v11 = vpop.f32.mrf.mxu1  ;;  %v11678_v54 = vpop.f32.mrf.mxu0 }
 0x32a   : > { %12984 = vst [vmem:[#allocation26_spill] sm:$0xff] %v11676_v11  ;;  %12985 = vst [vmem:[#allocation36_spill] sm:$0xff] %v11678_v54 }
 0x32b   : > { %v11680_v17 = vpop.f32.mrf.mxu1  ;;  %v11682_v5 = vpop.f32.mrf.mxu0 }
 0x32c   : > { %12986 = vst [vmem:[#allocation49_spill] sm:$0xff] %v11680_v17  ;;  %12987 = vst [vmem:[#allocation51_spill] sm:$0xff] %v11682_v5 }
 0x32d   : > { %v11684_v49 = vpop.f32.mrf.mxu1  ;;  %v11686_v52 = vpop.f32.mrf.mxu0 }
 0x32e   : > { %12988 = vst [vmem:[#allocation23_spill] sm:$0xff] %v11684_v49  ;;  %12989 = vst [vmem:[#allocation37_spill] sm:$0xff] %v11686_v52 }
 0x32f   : > { %v11690_v50 = vpop.f32.mrf.mxu0 }
 0x330   : > { %v11688_v51 = vpop.f32.mrf.mxu1  ;;  %12991 = vst [vmem:[#allocation50_spill] sm:$0xff] %v11690_v50  ;;  %v5510_v50 = vadd.f32 %v7904_v19, %v11498_v34 }
 0x331   : > { %12990 = vst [vmem:[#allocation39_spill] sm:$0xff] %v11688_v51 }
 0x332   : > { %v11692_v32 = vpop.f32.mrf.mxu1  ;;  %v11694_v35 = vpop.f32.mrf.mxu0 }
 0x333   : > { %12992 = vst [vmem:[#allocation53_spill] sm:$0xff] %v11692_v32  ;;  %12993 = vst [vmem:[#allocation9_spill] sm:$0xff] %v11694_v35  ;;  %v5508_v35 = vadd.f32 %v5381_v14, %v11501_v63  ;;  %v5514_v63 = vadd.f32 %v11608_v8, %v11510_v58 }
 0x334   : > { %v11696_v45 = vpop.f32.mrf.mxu1  ;;  %v11698_v11 = vpop.f32.mrf.mxu0 }
 0x335   : > { %12994 = vst [vmem:[#allocation33_spill] sm:$0xff] %v11696_v45  ;;  %12995 = vst [vmem:[#allocation40_spill] sm:$0xff] %v11698_v11  ;;  %v6055_v19 = vadd.f32 %v11586_v26, %v5508_v35 }
 0x336   : > { %v11700_v54 = vpop.f32.mrf.mxu1  ;;  %v11702_v17 = vpop.f32.mrf.mxu0 }
 0x337   : > { %12996 = vst [vmem:[#allocation52_spill] sm:$0xff] %v11700_v54  ;;  %12997 = vst [vmem:[#allocation55_spill] sm:$0xff] %v11702_v17  ;;  %v5511_v54 = vadd.f32 %v7905_v31, %v11504_v9 }
 0x338   : > { %v11704_v5 = vpop.f32.mrf.mxu1  ;;  %v11706_v49 = vpop.f32.mrf.mxu0 }
 0x339   : > { %12998 = vst [vmem:[#allocation13_spill] sm:$0xff] %v11704_v5  ;;  %12999 = vst [vmem:[#allocation54_spill] sm:$0xff] %v11706_v49  ;;  %v6057_v5 = vadd.f32 %v11581_v61, %v5510_v50  ;;  %v5509_v49 = vadd.f32 %v11604_v42, %v11507_v23  ;;  %v6058_v9 = vadd.f32 %v11591_v56, %v5511_v54 }
 0x33a   : > { %v11708_v52 = vpop.f32.mrf.mxu1  ;;  %v8006_v51 = vpop.f32.mrf.mxu0  ;;  %v5512_v23 = vadd.f32 %v11612_v40, %v11513_v0  ;;  %v6061_v56 = vadd.f32 %v11600_v4, %v5514_v63  ;;  %v5515_v54 = vadd.f32 %v11616_v6, %v11516_v38  ;;  %v5518_v4 = vadd.f32 %v11624_v62, %v11522_v28 }
 0x33b   : > { %13000 = vst [vmem:[#allocation17_spill] sm:$0xff] %v11708_v52  ;;  %v6056_v61 = vadd.f32 %v11596_v60, %v5509_v49 }
 0x33c   : > { %v11711_v32 = vpop.f32.mrf.mxu1  ;;  %v6781_v45 = vpop.f32.mrf.mxu0 }
 0x33d   : > { %13001 = vst [vmem:[#allocation57_spill] sm:$0xff] %v11711_v32 }
 0x33e   : > { %v11714_v11 = vpop.f32.mrf.mxu1  ;;  %v8007_v17 = vpop.f32.mrf.mxu0 }
 0x33f   : > { %13002 = vst [vmem:[#allocation18_spill] sm:$0xff] %v11714_v11 }
 0x340   : > { %v7972_v59 = vpop.f32.mrf.mxu1  ;;  %v6784_v52 = vpop.f32.mrf.mxu0 }
 0x341   : > { %v6383_v34 = vadd.f32 %v7972_v59, %v6057_v5 }
 0x342   : > { %v6254_v14 = vpop.f32.mrf.mxu1  ;;  %v8010_v32 = vpop.f32.mrf.mxu0 }
 0x343   : > { %v6910_v27 = vadd.f32 %v8006_v51, %v6383_v34  ;;  %v6381_v11 = vadd.f32 %v6254_v14, %v6055_v19 }
 0x344   : > { %v7973_v5 = vpop.f32.mrf.mxu1  ;;  %v6797_v35 = vpop.f32.mrf.mxu0 }
 0x345   : > { %v6942_v58 = vmax.f32 %v6910_v27, 0.0  ;;  %v6908_v50 = vadd.f32 %v6781_v45, %v6381_v11  ;;  %v6384_v51 = vadd.f32 %v7973_v5, %v6058_v9  ;;  %v6059_v27 = vadd.f32 %v11602_v53, %v5512_v23 }
 0x346   : > { %v6257_v26 = vpop.f32.mrf.mxu1  ;;  %v8011_v31 = vpop.f32.mrf.mxu0  ;;  %v5513_v45 = vadd.f32 %v11620_v47, %v11519_v21  ;;  %v6062_v21 = vadd.f32 %v11606_v46, %v5515_v54  ;;  %v5516_v47 = vadd.f32 %v11628_v12, %v11525_v44  ;;  %v6065_v23 = vadd.f32 %v11614_v57, %v5518_v4 }
 0x347   : > { %6975 = vst.msk [vmem:[%s11729_s16 + $0x10] sm:$0xff] %vm6972_vm8, %v6942_v58  ;;  %v6940_v0 = vmax.f32 %v6908_v50, 0.0  ;;  %v6911_v42 = vadd.f32 %v8007_v17, %v6384_v51  ;;  %v6382_v8 = vadd.f32 %v6257_v26, %v6056_v61 }
 0x348   : > { %v7976_v40 = vpop.f32.mrf.mxu1  ;;  %v6800_v49 = vpop.f32.mrf.mxu0  ;;  %v6060_v14 = vadd.f32 %v11610_v3, %v5513_v45  ;;  %v6063_v50 = vadd.f32 %v11618_v20, %v5516_v47  ;;  %v5523_v45 = vadd.f32 %v11648_v24, %v11540_v41  ;;  %v5526_v24 = vadd.f32 %v11656_v1, %v11546_v33 }
 0x349   : > { %6973 = vst.msk [vmem:[%s11729_s16] sm:$0xff] %vm6972_vm8, %v6940_v0  ;;  %v6943_v11 = vmax.f32 %v6911_v42, 0.0  ;;  %v6909_v60 = vadd.f32 %v6784_v52, %v6382_v8  ;;  %v6387_v38 = vadd.f32 %v7976_v40, %v6061_v56 }
 0x34a   : > { %v6270_v6 = vpop.f32.mrf.mxu1  ;;  %v8014_v59 = vpop.f32.mrf.mxu0 }
 0x34b   : > { %6976 = vst.msk [vmem:[%s11729_s16 + $0x18] sm:$0xff] %vm6972_vm8, %v6943_v11  ;;  %v6941_v17 = vmax.f32 %v6909_v60, 0.0  ;;  %v6914_v53 = vadd.f32 %v8010_v32, %v6387_v38  ;;  %v6385_v34 = vadd.f32 %v6270_v6, %v6059_v27  ;;  %v5519_v32 = vadd.f32 %v11632_v55, %v11528_v48 }
 0x34c   : > { %v7977_v19 = vpop.f32.mrf.mxu1  ;;  %v6813_v63 = vpop.f32.mrf.mxu0  ;;  %v5522_v55 = vadd.f32 %v11640_v39, %v11534_v2  ;;  %v5521_v38 = vadd.f32 %v11652_v22, %v11543_v30  ;;  %v6070_v30 = vadd.f32 %v11638_v29, %v5523_v45  ;;  %v5524_v22 = vadd.f32 %v11660_v43, %v11549_v7 }
 0x34d   : > { %6974 = vst.msk [vmem:[%s11729_s16 + $0x8] sm:$0xff] %vm6972_vm8, %v6941_v17  ;;  %v6946_v52 = vmax.f32 %v6914_v53, 0.0  ;;  %v6912_v28 = vadd.f32 %v6797_v35, %v6385_v34  ;;  %v6388_v62 = vadd.f32 %v7977_v19, %v6062_v21  ;;  %v5517_v35 = vadd.f32 %v11636_v36, %v11531_v10  ;;  %v13003_v19 = vld [vmem:[#allocation59_spill] sm:$0xff] }
 0x34e   : > { %v6273_v9 = vpop.f32.mrf.mxu1  ;;  %v8015_v46 = vpop.f32.mrf.mxu0  ;;  %v6066_v10 = vadd.f32 %v11622_v18, %v5519_v32  ;;  %v5520_v36 = vadd.f32 %v11644_v25, %v11537_v13  ;;  %v6069_v27 = vadd.f32 %v11630_v16, %v5522_v55  ;;  %v13011_v55 = vld [vmem:[#allocation48_spill] sm:$0xff] }
 0x34f   : > { %6979 = vst.msk [vmem:[%s11729_s16 + $0x30] sm:$0xff] %vm6972_vm8, %v6946_v52  ;;  %v6944_v44 = vmax.f32 %v6912_v28, 0.0  ;;  %v6915_v12 = vadd.f32 %v8011_v31, %v6388_v62  ;;  %v6386_v5 = vadd.f32 %v6273_v9, %v6060_v14  ;;  %v6064_v8 = vadd.f32 %v11626_v37, %v5517_v35  ;;  %v13004_v28 = vld [vmem:[#allocation58_spill] sm:$0xff]  ;;  %v13006_v9 = vld [vmem:[#allocation29_spill] sm:$0xff] }
 0x350   : > { %v7980_v58 = vpop.f32.mrf.mxu1  ;;  %v6816_v3 = vpop.f32.mrf.mxu0  ;;  %v6067_v60 = vadd.f32 %v11634_v15, %v5520_v36  ;;  %v6073_v62 = vadd.f32 %v13004_v28, %v5526_v24  ;;  %v13005_v14 = vld [vmem:[#allocation10_spill] sm:$0xff]  ;;  %v13012_v36 = vld [vmem:[#allocation60_spill] sm:$0xff] }
 0x351   : > { %6977 = vst.msk [vmem:[%s11729_s16 + $0x20] sm:$0xff] %vm6972_vm8, %v6944_v44  ;;  %v6947_v57 = vmax.f32 %v6915_v12, 0.0  ;;  %v6913_v51 = vadd.f32 %v6800_v49, %v6386_v5  ;;  %v6391_v48 = vadd.f32 %v7980_v58, %v6065_v23  ;;  %v5527_v23 = vadd.f32 %v13006_v9, %v13005_v14  ;;  %v13007_v44 = vld [vmem:[#allocation61_spill] sm:$0xff]  ;;  %v13008_v5 = vld [vmem:[#allocation15_spill] sm:$0xff]  ;;  %v13024_v9 = vld [vmem:[#allocation30_spill] sm:$0xff] }
 0x352   : > { %v6286_v61 = vpop.f32.mrf.mxu1  ;;  %v8018_v26 = vpop.f32.mrf.mxu0  ;;  %v6071_v12 = vadd.f32 %v13007_v44, %v5524_v22  ;;  %v13009_v58 = vld [vmem:[#allocation35_spill] sm:$0xff] }
 0x353   : > { %6980 = vst.msk [vmem:[%s11729_s16 + $0x38] sm:$0xff] %vm6972_vm8, %v6947_v57  ;;  %v6945_v56 = vmax.f32 %v6913_v51, 0.0  ;;  %v6918_v20 = vadd.f32 %v8014_v59, %v6391_v48  ;;  %v6389_v54 = vadd.f32 %v6286_v61, %v6063_v50  ;;  %v5525_v50 = vadd.f32 %v13009_v58, %v13008_v5  ;;  %v13010_v48 = vld [vmem:[#allocation47_spill] sm:$0xff]  ;;  %v13027_v58 = vld [vmem:[#allocation38_spill] sm:$0xff] }
 0x354   : > { %v7981_v31 = vpop.f32.mrf.mxu1  ;;  %v6829_v0 = vpop.f32.mrf.mxu0  ;;  %v5530_v61 = vadd.f32 %v13011_v55, %v13010_v48  ;;  %v13030_v48 = vld [vmem:[#allocation33_spill] sm:$0xff] }
 0x355   : > { %6978 = vst.msk [vmem:[%s11729_s16 + $0x28] sm:$0xff] %vm6972_vm8, %v6945_v56  ;;  %v6950_v42 = vmax.f32 %v6918_v20, 0.0  ;;  %v6916_v2 = vadd.f32 %v6813_v63, %v6389_v54  ;;  %v6392_v39 = vadd.f32 %v7981_v31, %v6066_v10  ;;  %v6068_v63 = vadd.f32 %v13003_v19, %v5521_v38  ;;  %v13018_v38 = vld [vmem:[#allocation49_spill] sm:$0xff] }
 0x356   : > { %v6289_v40 = vpop.f32.mrf.mxu1  ;;  %v8019_v18 = vpop.f32.mrf.mxu0  ;;  %v6074_v31 = vadd.f32 %v13012_v36, %v5527_v23 }
 0x357   : > { %6983 = vst.msk [vmem:[%s11729_s16 + $0x50] sm:$0xff] %vm6972_vm8, %v6950_v42  ;;  %v6948_v13 = vmax.f32 %v6916_v2, 0.0  ;;  %v6919_v25 = vadd.f32 %v8015_v46, %v6392_v39  ;;  %v6390_v49 = vadd.f32 %v6289_v40, %v6064_v8  ;;  %v13014_v42 = vld [vmem:[#allocation26_spill] sm:$0xff] }
 0x358   : > { %v7984_v11 = vpop.f32.mrf.mxu1  ;;  %v6832_v37 = vpop.f32.mrf.mxu0 }
 0x359   : > { %6981 = vst.msk [vmem:[%s11729_s16 + $0x40] sm:$0xff] %vm6972_vm8, %v6948_v13  ;;  %v6951_v16 = vmax.f32 %v6919_v25, 0.0  ;;  %v6917_v4 = vadd.f32 %v6816_v3, %v6390_v49  ;;  %v6395_v41 = vadd.f32 %v7984_v11, %v6069_v27  ;;  %v13016_v49 = vld [vmem:[#allocation8_spill] sm:$0xff] }
 0x35a   : > { %v6302_v6 = vpop.f32.mrf.mxu1  ;;  %v8022_v59 = vpop.f32.mrf.mxu0  ;;  %v6077_v11 = vadd.f32 %v13016_v49, %v5530_v61 }
 0x35b   : > { %6984 = vst.msk [vmem:[%s11729_s16 + $0x58] sm:$0xff] %vm6972_vm8, %v6951_v16  ;;  %v6949_v17 = vmax.f32 %v6917_v4, 0.0  ;;  %v6922_v15 = vadd.f32 %v8018_v26, %v6395_v41  ;;  %v6393_v53 = vadd.f32 %v6302_v6, %v6067_v60  ;;  %v13017_v60 = vld [vmem:[#allocation46_spill] sm:$0xff] }
 0x35c   : > { %v7985_v34 = vpop.f32.mrf.mxu1  ;;  %v6845_v21 = vpop.f32.mrf.mxu0 }
 0x35d   : > { %6982 = vst.msk [vmem:[%s11729_s16 + $0x48] sm:$0xff] %vm6972_vm8, %v6949_v17  ;;  %v6954_v47 = vmax.f32 %v6922_v15, 0.0  ;;  %v6920_v33 = vadd.f32 %v6829_v0, %v6393_v53  ;;  %v6396_v1 = vadd.f32 %v7985_v34, %v6070_v30  ;;  %v13013_v0 = vld [vmem:[#allocation25_spill] sm:$0xff]  ;;  %v13020_v15 = vld [vmem:[#allocation11_spill] sm:$0xff] }
 0x35e   : > { %v6305_v52 = vpop.f32.mrf.mxu1  ;;  %v8023_v29 = vpop.f32.mrf.mxu0  ;;  %v5528_v2 = vadd.f32 %v13014_v42, %v13013_v0  ;;  %v13021_v53 = vld [vmem:[#allocation23_spill] sm:$0xff]  ;;  %v13033_v0 = vld [vmem:[#allocation52_spill] sm:$0xff] }
 0x35f   : > { %6987 = vst.msk [vmem:[%s11729_s16 + $0x70] sm:$0xff] %vm6972_vm8, %v6954_v47  ;;  %v6952_v7 = vmax.f32 %v6920_v33, 0.0  ;;  %v6923_v43 = vadd.f32 %v8019_v18, %v6396_v1  ;;  %v6394_v32 = vadd.f32 %v6305_v52, %v6068_v63  ;;  %v13015_v18 = vld [vmem:[#allocation31_spill] sm:$0xff]  ;;  %v5529_v30 = vadd.f32 %v13021_v53, %v13020_v15  ;;  %v13022_v33 = vld [vmem:[#allocation16_spill] sm:$0xff]  ;;  %v13039_v15 = vld [vmem:[#allocation50_spill] sm:$0xff] }
 0x360   : > { %v7988_v46 = vpop.f32.mrf.mxu1  ;;  %v6848_v35 = vpop.f32.mrf.mxu0  ;;  %v6072_v13 = vadd.f32 %v13015_v18, %v5525_v50  ;;  %v13023_v1 = vld [vmem:[#allocation39_spill] sm:$0xff] }
 0x361   : > { %6985 = vst.msk [vmem:[%s11729_s16 + $0x60] sm:$0xff] %vm6972_vm8, %v6952_v7  ;;  %v6955_v3 = vmax.f32 %v6923_v43, 0.0  ;;  %v6921_v57 = vadd.f32 %v6832_v37, %v6394_v32  ;;  %v6399_v51 = vadd.f32 %v7988_v46, %v6073_v62  ;;  %v5531_v37 = vadd.f32 %v13018_v38, %v13017_v60  ;;  %v13026_v7 = vld [vmem:[#allocation53_spill] sm:$0xff] }
 0x362   : > { %v6318_v26 = vpop.f32.mrf.mxu1  ;;  %v8026_v56 = vpop.f32.mrf.mxu0  ;;  %v5534_v19 = vadd.f32 %v13023_v1, %v13022_v33  ;;  %v6076_v50 = vadd.f32 %v13027_v58, %v5529_v30  ;;  %v13036_v60 = vld [vmem:[#allocation37_spill] sm:$0xff]  ;;  %v13046_v58 = vld [vmem:[#allocation55_spill] sm:$0xff] }
 0x363   : > { %6988 = vst.msk [vmem:[%s11729_s16 + $0x78] sm:$0xff] %vm6972_vm8, %v6955_v3  ;;  %v6953_v20 = vmax.f32 %v6921_v57, 0.0  ;;  %v6926_v54 = vadd.f32 %v8022_v59, %v6399_v51  ;;  %v6397_v10 = vadd.f32 %v6318_v26, %v6071_v12  ;;  %v13019_v59 = vld [vmem:[#allocation34_spill] sm:$0xff]  ;;  %v6078_v23 = vadd.f32 %v13024_v9, %v5531_v37  ;;  %v13028_v3 = vld [vmem:[#allocation36_spill] sm:$0xff]  ;;  %v13044_v9 = vld [vmem:[#allocation7_spill] sm:$0xff] }
 0x364   : > { %v7989_v39 = vpop.f32.mrf.mxu1  ;;  %v6861_v8 = vpop.f32.mrf.mxu0  ;;  %v6075_v17 = vadd.f32 %v13019_v59, %v5528_v2  ;;  %v6081_v57 = vadd.f32 %v13028_v3, %v5534_v19  ;;  %v13029_v51 = vld [vmem:[#allocation44_spill] sm:$0xff] }
 0x365   : > { %6986 = vst.msk [vmem:[%s11729_s16 + $0x68] sm:$0xff] %vm6972_vm8, %v6953_v20  ;;  %v6958_v40 = vmax.f32 %v6926_v54, 0.0  ;;  %v6924_v27 = vadd.f32 %v6845_v21, %v6397_v10  ;;  %v6400_v45 = vadd.f32 %v7989_v39, %v6074_v31  ;;  %v5535_v55 = vadd.f32 %v13030_v48, %v13029_v51  ;;  %v13031_v10 = vld [vmem:[#allocation51_spill] sm:$0xff]  ;;  %v13037_v37 = vld [vmem:[#allocation20_spill] sm:$0xff] }
 0x366   : > { %v6321_v25 = vpop.f32.mrf.mxu1  ;;  %v8027_v16 = vpop.f32.mrf.mxu0  ;;  %v13032_v31 = vld [vmem:[#allocation27_spill] sm:$0xff] }
 0x367   : > { %6991 = vst.msk [vmem:[%s11729_s16 + $0x90] sm:$0xff] %vm6972_vm8, %v6958_v40  ;;  %v6956_v4 = vmax.f32 %v6924_v27, 0.0  ;;  %v6927_v41 = vadd.f32 %v8023_v29, %v6400_v45  ;;  %v6398_v24 = vadd.f32 %v6321_v25, %v6072_v13  ;;  %v13025_v29 = vld [vmem:[#allocation43_spill] sm:$0xff]  ;;  %v5533_v42 = vadd.f32 %v13033_v0, %v13032_v31  ;;  %v13034_v40 = vld [vmem:[#allocation5_spill] sm:$0xff] }
 0x368   : > { %v7992_v6 = vpop.f32.mrf.mxu1  ;;  %v6864_v22 = vpop.f32.mrf.mxu0  ;;  %v5532_v43 = vadd.f32 %v13026_v7, %v13025_v29  ;;  %v13035_v27 = vld [vmem:[#allocation13_spill] sm:$0xff]  ;;  %v6082_v38 = vadd.f32 %v13036_v60, %v5535_v55  ;;  %v13047_v55 = vld [vmem:[#allocation54_spill] sm:$0xff] }
 0x369   : > { %6989 = vst.msk [vmem:[%s11729_s16 + $0x80] sm:$0xff] %vm6972_vm8, %v6956_v4  ;;  %v6959_v34 = vmax.f32 %v6927_v41, 0.0  ;;  %v6925_v21 = vadd.f32 %v6848_v35, %v6398_v24  ;;  %v6403_v47 = vadd.f32 %v7992_v6, %v6077_v11  ;;  %v5538_v45 = vadd.f32 %v13035_v27, %v13034_v40 }
 0x36a   : > { %v6334_v63 = vpop.f32.mrf.mxu1  ;;  %v8030_v52 = vpop.f32.mrf.mxu0  ;;  %v6079_v36 = vadd.f32 %v13031_v10, %v5532_v43  ;;  %v6080_v53 = vadd.f32 %v13039_v15, %v5533_v42 }
 0x36b   : > { %6992 = vst.msk [vmem:[%s11729_s16 + $0x98] sm:$0xff] %vm6972_vm8, %v6959_v34  ;;  %v6957_v28 = vmax.f32 %v6925_v21, 0.0  ;;  %v6930_v62 = vadd.f32 %v8026_v56, %v6403_v47  ;;  %v6401_v14 = vadd.f32 %v6334_v63, %v6075_v17  ;;  %v13041_v21 = vld [vmem:[#allocation3_spill] sm:$0xff]  ;;  %v13042_v47 = vld [vmem:[#allocation57_spill] sm:$0xff] }
 0x36c   : > { %v7993_v32 = vpop.f32.mrf.mxu1  ;;  %v6877_v46 = vpop.f32.mrf.mxu0  ;;  %v5539_v33 = vadd.f32 %v13042_v47, %v13041_v21 }
 0x36d   : > { %6990 = vst.msk [vmem:[%s11729_s16 + $0x88] sm:$0xff] %vm6972_vm8, %v6957_v28  ;;  %v6962_v44 = vmax.f32 %v6930_v62, 0.0  ;;  %v6928_v12 = vadd.f32 %v6861_v8, %v6401_v14  ;;  %v6404_v5 = vadd.f32 %v7993_v32, %v6078_v23  ;;  %v13043_v62 = vld [vmem:[#allocation40_spill] sm:$0xff]  ;;  %v13045_v23 = vld [vmem:[#allocation18_spill] sm:$0xff] }
 0x36e   : > { %v6337_v35 = vpop.f32.mrf.mxu1  ;;  %v8031_v61 = vpop.f32.mrf.mxu0  ;;  %v5537_v29 = vadd.f32 %v13045_v23, %v13044_v9 }
 0x36f   : > { %6995 = vst.msk [vmem:[%s11729_s16 + $0xb0] sm:$0xff] %vm6972_vm8, %v6962_v44  ;;  %v6960_v26 = vmax.f32 %v6928_v12, 0.0  ;;  %v6931_v56 = vadd.f32 %v8027_v16, %v6404_v5  ;;  %v6402_v20 = vadd.f32 %v6337_v35, %v6076_v50  ;;  %v13038_v16 = vld [vmem:[#allocation17_spill] sm:$0xff]  ;;  %v6086_v50 = vadd.f32 %v13046_v58, %v5539_v33 }
 0x370   : > { %v7996_v54 = vpop.f32.mrf.mxu1  ;;  %v6880_v18 = vpop.f32.mrf.mxu0  ;;  %v5536_v4 = vadd.f32 %v13038_v16, %v13037_v37 }
 0x371   : > { %6993 = vst.msk [vmem:[%s11729_s16 + $0xa0] sm:$0xff] %vm6972_vm8, %v6960_v26  ;;  %v6963_v2 = vmax.f32 %v6931_v56, 0.0  ;;  %v6929_v39 = vadd.f32 %v6864_v22, %v6402_v20  ;;  %v6407_v8 = vadd.f32 %v7996_v54, %v6081_v57  ;;  %v13040_v22 = vld [vmem:[#allocation9_spill] sm:$0xff] }
 0x372   : > { %v6350_v13 = vpop.f32.mrf.mxu1  ;;  %v8034_v24 = vpop.f32.mrf.mxu0  ;;  %v6085_v34 = vadd.f32 %v13040_v22, %v5538_v45  ;;  %v6083_v14 = vadd.f32 %v13043_v62, %v5536_v4 }
 0x373   : > { %6996 = vst.msk [vmem:[%s11729_s16 + $0xb8] sm:$0xff] %vm6972_vm8, %v6963_v2  ;;  %v6961_v25 = vmax.f32 %v6929_v39, 0.0  ;;  %v6934_v49 = vadd.f32 %v8030_v52, %v6407_v8  ;;  %v6405_v11 = vadd.f32 %v6350_v13, %v6079_v36 }
 0x374   : > { %v7997_v41 = vpop.f32.mrf.mxu1  ;;  %v6893_v52 = vpop.f32.mrf.mxu0 }
 0x375   : > { %6994 = vst.msk [vmem:[%s11729_s16 + $0xa8] sm:$0xff] %vm6972_vm8, %v6961_v25  ;;  %v6966_v6 = vmax.f32 %v6934_v49, 0.0  ;;  %v6932_v59 = vadd.f32 %v6877_v46, %v6405_v11  ;;  %v6408_v17 = vadd.f32 %v7997_v41, %v6082_v38 }
 0x376   : > { %v6353_v30 = vpop.f32.mrf.mxu1  ;;  %v8035_v35 = vpop.f32.mrf.mxu0 }
 0x377   : > { %6999 = vst.msk [vmem:[%s11729_s16 + $0xd0] sm:$0xff] %vm6972_vm8, %v6966_v6  ;;  %v6964_v1 = vmax.f32 %v6932_v59, 0.0  ;;  %v6935_v19 = vadd.f32 %v8031_v61, %v6408_v17  ;;  %v6406_v63 = vadd.f32 %v6353_v30, %v6080_v53  ;;  %v6084_v61 = vadd.f32 %v13047_v55, %v5537_v29 }
 0x378   : > { %v8000_v28 = vpop.f32.mrf.mxu1  ;;  %v6896_v10 = vpop.f32.mrf.mxu0 }
 0x379   : > { %6997 = vst.msk [vmem:[%s11729_s16 + $0xc0] sm:$0xff] %vm6972_vm8, %v6964_v1  ;;  %v6967_v7 = vmax.f32 %v6935_v19, 0.0  ;;  %v6933_v43 = vadd.f32 %v6880_v18, %v6406_v63  ;;  %v6411_v32 = vadd.f32 %v8000_v28, %v6085_v34 }
 0x37a   : > { %v6366_v46 = vpop.f32.mrf.mxu1 }
 0x37b   : > { %7000 = vst.msk [vmem:[%s11729_s16 + $0xd8] sm:$0xff] %vm6972_vm8, %v6967_v7  ;;  %v6965_v44 = vmax.f32 %v6933_v43, 0.0  ;;  %v6938_v12 = vadd.f32 %v8034_v24, %v6411_v32  ;;  %v6409_v5 = vadd.f32 %v6366_v46, %v6083_v14 }
 0x37c   : > { %v8001_v3 = vpop.f32.mrf.mxu1 }
 0x37d   : > { %6998 = vst.msk [vmem:[%s11729_s16 + $0xc8] sm:$0xff] %vm6972_vm8, %v6965_v44  ;;  %v6970_v57 = vmax.f32 %v6938_v12, 0.0  ;;  %v6936_v51 = vadd.f32 %v6893_v52, %v6409_v5  ;;  %v6412_v48 = vadd.f32 %v8001_v3, %v6086_v50 }
 0x37e   : > { %v6369_v26 = vpop.f32.mrf.mxu1 }
 0x37f   : > { %7003 = vst.msk [vmem:[%s11729_s16 + $0xf0] sm:$0xff] %vm6972_vm8, %v6970_v57  ;;  %v6968_v56 = vmax.f32 %v6936_v51, 0.0  ;;  %v6939_v20 = vadd.f32 %v8035_v35, %v6412_v48  ;;  %v6410_v54 = vadd.f32 %v6369_v26, %v6084_v61 }
 0x381   : > { %7001 = vst.msk [vmem:[%s11729_s16 + $0xe0] sm:$0xff] %vm6972_vm8, %v6968_v56  ;;  %v6971_v36 = vmax.f32 %v6939_v20, 0.0  ;;  %v6937_v31 = vadd.f32 %v6896_v10, %v6410_v54 }
 0x383   : > { %7004 = vst.msk [vmem:[%s11729_s16 + $0xf8] sm:$0xff] %vm6972_vm8, %v6971_v36  ;;  %v6969_v0 = vmax.f32 %v6937_v31, 0.0 }
 0x385   : > { %7002 = vst.msk [vmem:[%s11729_s16 + $0xe8] sm:$0xff] %vm6972_vm8, %v6969_v0 }
 0x386 PF: > { %s16_s21 = sadd.s32 1, %s8141_s21  }
 0x387   : > { %p13_p4 = scmp.ge.s32.totalorder %s16_s21, 4  }
 0x389   :  { %15 = sbr.rel (!%p13_p4) target bundleno = 1 (0x1), region = 83 }

</bundles_post_ra>
